<compile_context>
chip_gen: v7x
topology: tpu7x:2x2x1
jax: 0.10.0
libtpu: 0.0.40
codegen_flags: <defaults>
</compile_context>

<pallas_src>
import jax
import jax.numpy as jnp
from jax import lax
from jax.experimental import pallas as pl
from jax.experimental.pallas import tpu as pltpu


def _logistic_bow_kernel(x_ref, w_ref, b_ref, o_ref):
    # x_ref : (nk, B, tk)  VMEM-resident activations (constant block index)
    # w_ref : (tn, tk)     streamed weight tile (dominant HBM traffic)
    # b_ref : (1, tn)      bias tile for the current class block
    # o_ref : (B, tn)      output tile == accumulator (same block across k)
    k = pl.program_id(1)  # reduction step over the vocab axis

    @pl.when(k == 0)
    def _():
        # Initialize the resident output tile with the broadcast bias, so no
        # separate accumulator scratch and no epilogue add are needed.
        o_ref[...] = jnp.broadcast_to(b_ref[...], o_ref.shape)

    # Contract the vocab axis of both operands (== x @ W.T) with W in its
    # native (C, V) layout; no HBM-level transpose anywhere.
    # TODO(synk): confirm via bundle dump that this trans-B contraction stays
    # on the MXU transposed-latch path (no per-step XLU vxpose) on v7x.
    o_ref[...] += lax.dot_general(
        x_ref[k],            # (B, tk) slab of the resident activations
        w_ref[...],          # (tn, tk)
        dimension_numbers=(((1,), (1,)), ((), ())),
        preferred_element_type=jnp.float32,
    )


def _round_up(x: int, m: int) -> int:
    return ((x + m - 1) // m) * m


def _pick_tile(dim: int, max_tile: int, prefer_even_blocks: bool = False) -> int:
    """Largest power-of-two multiple of 128 <= max_tile that divides dim.
    If prefer_even_blocks, prefer a tile giving an even (>=2) block count
    (balances the 'parallel' class axis across v7x's two TensorCores)."""
    cands = []
    t = 128
    while t <= max_tile and t <= dim:
        if dim % t == 0:
            cands.append(t)
        t *= 2
    if not cands:
        return dim  # block == full array dim is legal (only hit for dim < 128)
    if prefer_even_blocks:
        even = [t for t in cands if (dim // t) % 2 == 0]
        if even:
            return max(even)
    return max(cands)


def logistic_bow_forward(x, weight, bias, *, tk_max=2048, tn_max=512):
    """x: (B, V) f32, weight: (C, V) f32 (PyTorch nn.Linear layout), bias: (C,) f32."""
    B, V = x.shape
    C, V2 = weight.shape
    assert V == V2, "weight / input vocab-size mismatch"
    assert bias.shape == (C,)

    # Zero-pad ragged dims once (exact for a linear layer). V is padded to a
    # 512-granule so the reduction tile stays reasonably large even for
    # vocab sizes that are not nice multiples of 2048.
    v_unit = 512 if V >= 512 else 128
    c_unit = 256 if C >= 256 else 128
    V_pad = _round_up(V, v_unit)
    C_pad = _round_up(C, c_unit)
    if V_pad != V:
        x = jnp.pad(x, ((0, 0), (0, V_pad - V)))
        weight = jnp.pad(weight, ((0, 0), (0, V_pad - V)))
    if C_pad != C:
        weight = jnp.pad(weight, ((0, C_pad - C), (0, 0)))
        bias = jnp.pad(bias, (0, C_pad - C))

    tk = _pick_tile(V_pad, tk_max)                            # vocab (reduction) tile
    tn = _pick_tile(C_pad, tn_max, prefer_even_blocks=True)   # class (output) tile
    nk = V_pad // tk
    nj = C_pad // tn

    # Lay x out as (nk, B, tk) once in the wrapper (tiny array, layout plumbing
    # only) so the kernel indexes the k-th slab along the leading axis; the
    # whole thing stays VMEM-resident and is DMA'd from HBM exactly once.
    x3 = x.reshape(B, nk, tk).transpose(1, 0, 2)
    b2 = bias.reshape(1, C_pad)

    # Generation-aware VMEM budget: actual need + headroom, clamped to chip capacity.
    need = (
        2 * tn * tk * 4        # double-buffered weight stream (dominant)
        + 2 * B * V_pad * 4    # resident activations (count 2 bufs, conservative)
        + 2 * B * tn * 4       # output / accumulator tile
        + 2 * tn * 4           # bias tile
    )
    headroom = 4 * 1024 * 1024
    try:
        cap = int(pltpu.get_tpu_info().vmem_capacity_bytes)
    except Exception:
        cap = 64 * 1024 * 1024  # v7x is the smallest-VMEM target
    vmem_limit = max(16 * 1024 * 1024, need + headroom)
    vmem_limit = int(min(vmem_limit, cap - 8 * 1024 * 1024))

    cost = pl.CostEstimate(
        flops=2 * B * C_pad * V_pad,
        transcendentals=0,
        bytes_accessed=4 * (C_pad * V_pad + B * V_pad + B * C_pad),
    )

    out = pl.pallas_call(
        _logistic_bow_kernel,
        out_shape=jax.ShapeDtypeStruct((B, C_pad), jnp.float32),
        grid_spec=pltpu.PrefetchScalarGridSpec(
            num_scalar_prefetch=0,
            grid=(nj, nk),
            in_specs=[
                # whole activation tensor, constant block index -> resident, single DMA
                pl.BlockSpec((nk, B, tk), lambda j, k: (0, 0, 0)),
                # weight tile in native (C, V) layout (default double-buffered stream)
                pl.BlockSpec((tn, tk), lambda j, k: (j, k)),
                # bias tile for the current class block (resident across k)
                pl.BlockSpec((1, tn), lambda j, k: (0, j)),
            ],
            # same block index for every k -> output tile is the accumulator
            out_specs=pl.BlockSpec((B, tn), lambda j, k: (0, j)),
        ),
        compiler_params=pltpu.CompilerParams(
            dimension_semantics=("parallel", "arbitrary"),
            vmem_limit_bytes=vmem_limit,
        ),
        cost_estimate=cost,
    )(x3, weight, b2)

    return out[:, :C] if C_pad != C else out


if __name__ == "__main__":
    # Deterministic setup consistent with LogisticBOWModel(vocab_size, num_classes).
    # Shapes chosen so both grid axes have 2 blocks (exercises the parallel class
    # axis, the vocab reduction, and the bias-init-then-accumulate path).
    batch = 8
    vocab_size = 4096
    num_classes = 1024

    key = jax.random.PRNGKey(0)
    kx, kw, kb = jax.random.split(key, 3)

    # nn.Linear-style init (uniform in [-1/sqrt(V), 1/sqrt(V)]), deterministic.
    bound = 1.0 / jnp.sqrt(jnp.float32(vocab_size))
    weight = jax.random.uniform(
        kw, (num_classes, vocab_size), jnp.float32, minval=-bound, maxval=bound
    )
    bias = jax.random.uniform(
        kb, (num_classes,), jnp.float32, minval=-bound, maxval=bound
    )
    x = jax.random.normal(kx, (batch, vocab_size), jnp.float32)

    y = jax.block_until_ready(logistic_bow_forward(x, weight, bias))

    # correctness check against plain JAX reference (raw logits, as in the module)
    y_ref = x @ weight.T + bias
    assert y.shape == (batch, num_classes)
    assert jnp.allclose(y, y_ref, atol=1e-4, rtol=1e-4), float(
        jnp.max(jnp.abs(y - y_ref))
    )

    print("KERNEL_OK")
</pallas_src>

<mosaic_0001>
module attributes {stable_mosaic.version = 11 : i64} {
  func.func @_logistic_bow_kernel(%arg0: i32, %arg1: i32, %arg2: memref<2x8x2048xf32, #tpu.memory_space<vmem>>, %arg3: memref<512x2048xf32, #tpu.memory_space<vmem>>, %arg4: memref<1x512xf32, #tpu.memory_space<vmem>>, %arg5: memref<8x512xf32, #tpu.memory_space<vmem>>) attributes {dimension_semantics = [#tpu.dimension_semantics<parallel>, #tpu.dimension_semantics<arbitrary>], iteration_bounds = array<i64: 2, 2>, scalar_prefetch = 0 : i64, scratch_operands = 0 : i64, tpu.core_type = #tpu.core_type<tc>, window_params = [{pipeline_mode = #tpu.pipeline_mode<synchronous>, transform_indices = @transform_0, window_bounds = array<i64: 2, 8, 2048>}, {transform_indices = @transform_1, window_bounds = array<i64: 512, 2048>}, {transform_indices = @transform_2, window_bounds = array<i64: 1, 512>}, {transform_indices = @transform_3, window_bounds = array<i64: 8, 512>}]} {
    %c0_i32 = arith.constant 0 : i32
    %0 = arith.cmpi eq, %arg1, %c0_i32 : i32
    %1 = arith.extui %0 : i1 to i32
    %c0_i32_0 = arith.constant 0 : i32
    %2 = arith.cmpi ne, %1, %c0_i32_0 : i32
    scf.if %2 {
      %c0_8 = arith.constant 0 : index
      %c0_9 = arith.constant 0 : index
      %11 = vector.load %arg4[%c0_8, %c0_9] : memref<1x512xf32, #tpu.memory_space<vmem>>, vector<1x512xf32>
      %12 = vector.shape_cast %11 : vector<1x512xf32> to vector<1x512xf32>
      %13 = vector.broadcast %12 : vector<1x512xf32> to vector<8x512xf32>
      %c0_10 = arith.constant 0 : index
      %c0_11 = arith.constant 0 : index
      %14 = vector.load %arg5[%c0_10, %c0_11] : memref<8x512xf32, #tpu.memory_space<vmem>>, vector<8x512xf32>
      tpu.vector_store %arg5[%c0_10, %c0_11], %13 {strides = array<i32>} : memref<8x512xf32, #tpu.memory_space<vmem>>, vector<8x512xf32>,
    } else {
    }
    %c0 = arith.constant 0 : index
    %c0_1 = arith.constant 0 : index
    %3 = vector.load %arg5[%c0, %c0_1] : memref<8x512xf32, #tpu.memory_space<vmem>>, vector<8x512xf32>
    %4 = arith.index_cast %arg1 : i32 to index
    %c0_2 = arith.constant 0 : index
    %c0_3 = arith.constant 0 : index
    %5 = vector.load %arg2[%4, %c0_2, %c0_3] : memref<2x8x2048xf32, #tpu.memory_space<vmem>>, vector<1x8x2048xf32>
    %6 = vector.shape_cast %5 : vector<1x8x2048xf32> to vector<8x2048xf32>
    %c0_4 = arith.constant 0 : index
    %c0_5 = arith.constant 0 : index
    %7 = vector.load %arg3[%c0_4, %c0_5] : memref<512x2048xf32, #tpu.memory_space<vmem>>, vector<512x2048xf32>
    %cst = arith.constant dense<0.000000e+00> : vector<8x512xf32>
    %8 = tpu.matmul %6, %7, %cst {dimension_numbers = #tpu.dot_dimension_numbers<[1], [1], [0], [0], [0, 0, 1, 0], [], []>} : vector<8x2048xf32>, vector<512x2048xf32>, vector<8x512xf32> -> vector<8x512xf32>
    %9 = arith.addf %3, %8 : vector<8x512xf32>
    %c0_6 = arith.constant 0 : index
    %c0_7 = arith.constant 0 : index
    %10 = vector.load %arg5[%c0_6, %c0_7] : memref<8x512xf32, #tpu.memory_space<vmem>>, vector<8x512xf32>
    tpu.vector_store %arg5[%c0_6, %c0_7], %9 {strides = array<i32>} : memref<8x512xf32, #tpu.memory_space<vmem>>, vector<8x512xf32>,
    return
  }
  func.func @transform_0(%arg0: i32, %arg1: i32) -> (i32, i32, i32) {
    %c0_i32 = arith.constant 0 : i32
    %c0_i32_0 = arith.constant 0 : i32
    %c0_i32_1 = arith.constant 0 : i32
    %c0_i32_2 = arith.constant 0 : i32
    return %c0_i32, %c0_i32_0, %c0_i32_1 : i32, i32, i32
  }
  func.func @transform_1(%arg0: i32, %arg1: i32) -> (i32, i32) {
    %c0_i32 = arith.constant 0 : i32
    return %arg0, %arg1 : i32, i32
  }
  func.func @transform_2(%arg0: i32, %arg1: i32) -> (i32, i32) {
    %c0_i32 = arith.constant 0 : i32
    %c0_i32_0 = arith.constant 0 : i32
    return %c0_i32, %arg0 : i32, i32
  }
  func.func @transform_3(%arg0: i32, %arg1: i32) -> (i32, i32) {
    %c0_i32 = arith.constant 0 : i32
    %c0_i32_0 = arith.constant 0 : i32
    return %c0_i32, %arg0 : i32, i32
  }
}

</mosaic_0001>

<bundles_post_ra>
// kernel: tpu_custom_call.1
= control target key start
LH: loop header
LB: loop body
LE: loop exit
PB: predicated region body
PF: predicated region fallthrough
CT: control target
= control target key end

     0   :  { %s5468_s0 = inlined_call_operand.hbm [shape: f32[2,8,2048], index: 0, kind: input, shape index: {}]   ;;  %s5469_s1 = inlined_call_operand.hbm [shape: f32[1024,4096], index: 1, kind: input, shape index: {}]   ;;  %s5470_s2 = inlined_call_operand.hbm [shape: f32[1,1024], index: 2, kind: input, shape index: {}]   ;;  %s5471_s3 = inlined_call_operand.hbm [shape: f32[8,1024], index: 3, kind: output, shape index: {}]  }
   0x1   :  { %5482 = sst [smem:[#allocation15_spill]] %s5468_s0 }
   0x2   :  { %5483 = sst [smem:[#allocation16_spill]] %s5471_s3 }
   0x3   :  { %8 = vsyncpa [#allocation3], 0 }
   0x4   :  { %9 = vsyncpa [#allocation6], 0 }
   0x5   :  { %11 = vsyncpa [#allocation6 + $0x1], 0 }
   0x6   :  { %12 = vsyncpa [#allocation4], 0 }
   0x7   :  { %14 = vsyncpa [#allocation4 + $0x1], 0  ;;  %s4064_s12 = smov 0   ;;  %s4066_s13 = smov 0  }
   0x8   :  { %s4068_s14 = smov 0   ;;  %s4070_s15 = smov 0  }
   0x9   :  { %s4072_s16 = smov 0   ;;  %s4074_s17 = smov 0  }
   0xa   :  { %s4076_s18 = smov 0   ;;  %s4078_s19 = smov 0  }
   0xb   :  { %s4080_s20 = smov 0   ;;  %s4082_s21 = smov 0  }
   0xc   :  { %s4084_s22 = smov 0  }
   0xd LB: > { %s29_s23 = sadd.s32 1, %s4027_s20  ;;  %s32_s24 = sadd.s32 1, %s4031_s21  ;;  %s4035_s22 = sphi %s4084_s22, %s20_s22   ;;  %s4031_s21 = sphi %s4082_s21, %s5521_s21   ;;  %s4027_s20 = sphi %s4080_s20, %s5520_s20   ;;  %s4023_s19 = sphi %s4078_s19, %s5519_s19   ;;  %s4019_s18 = sphi %s4076_s18, %s5518_s18   ;;  %s4015_s17 = sphi %s4074_s17, %s5517_s17   ;;  %s4011_s16 = sphi %s4072_s16, %s5516_s16   ;;  %s4007_s15 = sphi %s4070_s15, %s5515_s15   ;;  %s4003_s14 = sphi %s4068_s14, %s5514_s14   ;;  %s3999_s13 = sphi %s4066_s13, %s5513_s13   ;;  %s3995_s12 = sphi %s4064_s12, %s5512_s12  }
   0xe   : > { %p30_p0 = scmp.ge.s32.totalorder %s29_s23, 2  ;;  %s62_s25 = sadd.s32 1, %s4015_s17 }
   0xf   : > { %p69_p1 = scmp.ne.s32.totalorder %s4015_s17, %s4011_s16  ;;  %p5478_p2 = scmp.eq.s32.totalorder %s4035_s22, 0 }
  0x10   : > { %s5523_s23 = smov (%p30_p0, %s29_s23), 0  ;;  %s5525_s24 = smov (!%p30_p0, %s32_s24), %s4031_s21 }
  0x11   : > { %5484 = sst [smem:[#allocation13_spill]] %s5523_s23  ;;  %s58_s26 = ssub.s32 %s4027_s20, %s5523_s23 }
  0x12   : > { %p4132_p3 = por %p5478_p2, %p69_p1  ;;  %p34_p4 = scmp.ge.s32.totalorder %s5525_s24, 2 }
  0x13   : > { %p5475_p5 = scmp.lt.s32.totalorder %s4035_s22, 4  ;;  %s164_s28 = sand.u32 1, %s4035_s22  }
  0x14   : > { %s5527_s24 = smov (%p34_p4, %s5525_s24), 0  ;;  %s166_s4 = sand.u32 1, %s4015_s17  }
  0x15   : > { %5486 = sst [smem:[#allocation14_spill]] %s5527_s24  ;;  %s4142_s29 = ssub.s32 %s4031_s21, %s5527_s24 }
  0x16   : > { %s59_s30 = sor.u32 %s58_s26, %s4142_s29  ;;  %s2619_s5 = sshll.u32 %s166_s4, 13 }
  0x17   : > { %p60_p6 = scmp.eq.s32.totalorder %s59_s30, 0  ;;  %s2621_s6 = sshll.u32 %s4027_s20, 4 }
  0x18   : > { %s2640_s8 = sshll.u32 %s4031_s21, 11  ;;  %s168_s9 = scalar_lea.vmem [#allocation5], %s2619_s5 }
  0x19   : > { %s4148_s7 = scalar_select %p60_p6, %s4015_s17, %s62_s25  }
  0x1a   : > { %s178_s10 = sshll.u32 %s168_s9, 4  ;;  %s175_s11 = sadd.s32 %s2640_s8, %s2621_s6  ;;  %s4151_s10 = int_to_ptr.vmem [resolvable:$true] %s178_s10 }
  0x1b   : > { %s2623_s23 = sshll.u32 %s175_s11, 7  ;;  %p4157_p7 = pnand %p5475_p5, %p4132_p3 }
  0x1c   : > { %s4164_s25 = scalar_lea.hbm %s5469_s1, %s2623_s23  ;;  %s4166_s30 = scalar_lea.sflag [#allocation6], %s164_s28 }
  0x1d   : > { %s3817_s4 = scalar_lea.hbm %s4164_s25, 131072  ;;  %p3819_p9 = pneg %p4157_p7 }
  0x1e   : > { %p3818_p8 = scmp.ne.s32.totalorder %s4164_s25, %s3817_s4  ;;  %s3822_s5 = scalar_lea.hbm %s5469_s1, 524288 }
  0x1f   : > { %p3823_p12 = scmp.lt.u32.totalorder %s4164_s25, %s5469_s1  ;;  %p3824_p13 = scmp.lt.u32.totalorder %s3822_s5, %s3817_s4 }
  0x20   : > { %p3820_p10 = pnand %p3819_p9, %p3818_p8  ;;  %p3826_p1 = scmp.lt.u32.totalorder %s3817_s4, %s4164_s25 }
  0x21   : > { %p3825_p0 = por %p3824_p13, %p3823_p12 }
  0x22   : > { %p3821_p11 = pneg %p3820_p10 }
  0x23   : > { %p3827_p3 = por %p3826_p1, %p3825_p0 }
  0x25   : > { %p3828_p4 = pnand %p3827_p3, %p3821_p11 }
  0x27   : > { %3831 = shalt.err (!%p3828_p4)
}
  0x28   : > { %s3832_s28 = scalar_lea.vmem %s4151_s10, 131072  ;;  %s4037_s8 = smov [#allocation5]  }
  0x29   : > { %p3833_p6 = scmp.ne.s32.totalorder %s4151_s10, %s3832_s28  ;;  %s3837_s9 = sshll.u32 %s4037_s8, 4  ;;  %s3838_s9 = int_to_ptr.vmem [resolvable:$false] %s3837_s9 }
  0x2a   : > { %s3839_s11 = scalar_lea.vmem %s3838_s9, 262144  ;;  %p3840_p5 = scmp.lt.s32.totalorder %s4151_s10, %s3838_s9 }
  0x2b   : > { %p3835_p8 = pnand %p3833_p6, %p3819_p9  ;;  %p3841_p12 = scmp.lt.s32.totalorder %s3839_s11, %s3832_s28 }
  0x2d   : > { %p3836_p10 = pneg %p3835_p8  ;;  %p3842_p13 = por %p3841_p12, %p3840_p5 }
  0x2f   : > { %p3843_p0 = pnand %p3842_p13, %p3836_p10 }
  0x31   : > { %3846 = shalt.err (!%p3843_p0)
}
  0x32   : > { %s4038_s26 = smov 4096   ;;  %s5476_s4 = smov 2048  }
  0x33   : > { %s4040_s27 = smov 128   ;;  %s4197_s3 = sadd.s32 4294967295, %s4035_s22  }
  0x34   : > { %3713 = dma.hbm_to_vmem [thread:$0]  (!%p4157_p7), %s4164_s25, 131072, %s4151_s10, %s4166_s30, %s4038_s26, %s5476_s4, %s4040_s27  }
  0x35   : > { %p75_p5 = scmp.ne.s32.totalorder %s4011_s16, %s4007_s15  ;;  %p5477_p9 = scmp.eq.s32.totalorder %s4197_s3, 0 }
  0x36   : > { %p2616_p1 = scmp.ge.s32.totalorder %s4035_s22, 1  ;;  %p138_p4 = scmp.lt.s32.totalorder %s4035_s22, 5 }
  0x37   : > { %p4206_p3 = por %p5477_p9, %p75_p5  ;;  %s4041_s10 = smov [#allocation2]  }
  0x38   : > { %p4211_p6 = pnand %p2616_p1, %p138_p4  ;;  %s150_s25 = sshll.u32 %s4041_s10, 4  ;;  %s151_s25 = int_to_ptr.vmem [resolvable:$true] %s150_s25 }
  0x39   : > { %s5488_s5 = scalar_select %p4206_p3, 1, 0 }
  0x3a   : > { %s5489_s24 = scalar_select %p4211_p6, 1, 0 }
  0x3b   : > { %p3706_p7 = pneg %p4211_p6  ;;  %s2615_s23 = sadd.s32 4294967294, %s4035_s22  }
  0x3c   : > { %s5491_s0 = sld [smem:[#allocation15_spill]] }
  0x3d   : > { %p4219_p8 = pnand %p3706_p7, %p5477_p9 }
  0x3f   : > { %p3849_p13 = pneg %p4219_p8 }
  0x42   : > { %s3847_s8 = scalar_lea.hbm %s5491_s0, 4096 }
  0x43   : > { %p3848_p12 = scmp.ne.s32.totalorder %s5491_s0, %s3847_s8  ;;  %p3854_p1 = scmp.lt.u32.totalorder %s3847_s8, %s5491_s0 }
  0x45   : > { %p3850_p0 = pnand %p3849_p13, %p3848_p12 }
  0x47   : > { %p3851_p5 = pneg %p3850_p0 }
  0x49   : > { %p3856_p4 = pnand %p3854_p1, %p3851_p5 }
  0x4b   : > { %3859 = shalt.err (!%p3856_p4)
}
  0x4c   : > { %s3860_s4 = scalar_lea.vmem %s151_s25, 4096  ;;  %p3868_p2 = scmp.lt.s32.totalorder %s151_s25, %s151_s25 }
  0x4d   : > { %p3861_p7 = scmp.ne.s32.totalorder %s151_s25, %s3860_s4  ;;  %p3869_p10 = scmp.lt.s32.totalorder %s3860_s4, %s3860_s4 }
  0x4f   : > { %p3863_p9 = pnand %p3861_p7, %p3849_p13  ;;  %p3870_p3 = por %p3869_p10, %p3868_p2 }
  0x51   : > { %p3864_p11 = pneg %p3863_p9 }
  0x53   : > { %p3871_p6 = pnand %p3870_p3, %p3864_p11 }
  0x55   : > { %3874 = shalt.err (!%p3871_p6)
}
  0x56   : > { %s5492_s6 = smov 2048   ;;  %s88_s4 = sadd.s32 1, %s4003_s14 }
  0x57   : > { %3709 = dma.hbm_to_vmem [thread:$0]  (!%p4219_p8), %s5491_s0, 4096, %s151_s25, [#allocation3], %s5492_s6, %s5492_s6, %s4040_s27  }
  0x58   : > { %p95_p2 = scmp.ne.s32.totalorder %s4003_s14, %s3999_s13  ;;  %p5493_p9 = scmp.eq.s32.totalorder %s4142_s29, 0 }
  0x59   : > { %p5494_p11 = scmp.eq.s32.totalorder %s4035_s22, 0  ;;  %p101_p6 = scmp.ne.s32.totalorder %s3999_s13, %s3995_s12 }
  0x5a   : > { %s4250_s15 = scalar_select %p5493_p9, %s4003_s14, %s88_s4  }
  0x5b   : > { %p4254_p3 = por %p95_p2, %p5494_p11  ;;  %p5496_p10 = scmp.eq.s32.totalorder %s4197_s3, 3 }
  0x5c   : > { %p131_p13 = scmp.eq.s32.totalorder %s2615_s23, 3  ;;  %p5498_p8 = scmp.eq.s32.totalorder %s4197_s3, 0 }
  0x5d   : > { %p4262_p12 = por %p5496_p10, %p95_p2  ;;  %s190_s29 = sand.u32 1, %s4003_s14  }
  0x5e   : > { %p4268_p0 = por %p101_p6, %p5498_p8  ;;  %p4273_p5 = por %p131_p13, %p101_p6 }
  0x5f   : > { %s5497_s11 = scalar_select %p4262_p12, 1, 0 }
  0x60   : > { %s5500_s25 = scalar_select %p4273_p5, 1, 0 }
  0x61   : > { %s2624_s26 = sshll.u32 %s190_s29, 2  ;;  %s2641_s10 = sshll.u32 %s4031_s21, 6 }
  0x62   : > { %s4281_s9 = scalar_lea.hbm %s5470_s2, %s2641_s10  ;;  %s192_s23 = scalar_lea.vmem [#allocation7], %s2624_s26 }
  0x63   : > { %s200_s4 = sshll.u32 %s192_s23, 4  ;;  %p5501_p1 = scmp.lt.s32.totalorder %s4035_s22, 4  ;;  %s4283_s4 = int_to_ptr.vmem [resolvable:$true] %s200_s4 }
  0x64   : > { %s3875_s29 = scalar_lea.hbm %s4281_s9, 64  ;;  %s3880_s6 = scalar_lea.hbm %s5470_s2, 128 }
  0x65   : > { %p4289_p4 = pnand %p5501_p1, %p4254_p3  ;;  %p3876_p7 = scmp.ne.s32.totalorder %s4281_s9, %s3875_s29 }
  0x66   : > { %p3881_p3 = scmp.lt.u32.totalorder %s4281_s9, %s5470_s2  ;;  %p3882_p6 = scmp.lt.u32.totalorder %s3880_s6, %s3875_s29 }
  0x67   : > { %p3877_p2 = pneg %p4289_p4  ;;  %p3884_p13 = scmp.lt.u32.totalorder %s3875_s29, %s4281_s9 }
  0x68   : > { %p3883_p10 = por %p3882_p6, %p3881_p3 }
  0x69   : > { %p3878_p9 = pnand %p3877_p2, %p3876_p7 }
  0x6a   : > { %p3885_p8 = por %p3884_p13, %p3883_p10 }
  0x6b   : > { %p3879_p11 = pneg %p3878_p9 }
  0x6d   : > { %p3886_p1 = pnand %p3885_p8, %p3879_p11 }
  0x6f   : > { %3889 = shalt.err (!%p3886_p1)
}
  0x70   : > { %s3890_s23 = scalar_lea.vmem %s4283_s4, 64  ;;  %s4042_s26 = smov [#allocation7]  }
  0x71   : > { %p3891_p7 = scmp.ne.s32.totalorder %s4283_s4, %s3890_s23  ;;  %s3895_s10 = sshll.u32 %s4042_s26, 4  ;;  %s3896_s10 = int_to_ptr.vmem [resolvable:$false] %s3895_s10 }
  0x72   : > { %s3897_s8 = scalar_lea.vmem %s3896_s10, 128  ;;  %p3898_p12 = scmp.lt.s32.totalorder %s4283_s4, %s3896_s10 }
  0x73   : > { %p3893_p9 = pnand %p3891_p7, %p3877_p2  ;;  %p3899_p3 = scmp.lt.s32.totalorder %s3897_s8, %s3890_s23 }
  0x75   : > { %p3894_p5 = pneg %p3893_p9  ;;  %p3900_p6 = por %p3899_p3, %p3898_p12 }
  0x77   : > { %p3901_p10 = pnand %p3900_p6, %p3894_p5 }
  0x79   : > { %3904 = shalt.err (!%p3901_p10)
}
  0x7a   : > { %3716 = dma.hbm_to_vmem [thread:$0]  (!%p4289_p4), %s4281_s9, 64, %s4283_s4, %s4166_s30  }
  0x7b   : > { %p5503_p11 = scmp.ne.s32.totalorder %s5489_s24, 0 }
  0x7c   : > { %p5504_p2 = scmp.eq.s32.totalorder (!%p5503_p11), %s4197_s3, 0 }
  0x7d   : > { %209 = sbr.rel (%p5503_p11) target bundleno = 1412 (0x584), region = 32 }
  0x84   : > { %3978 = dma.done.wait (%p5504_p2), [#allocation3], 4096   ;;  %p5505_p13 = pmov %p5504_p2 }
  0x85   : > { %s215_s29 = sand.u32 1, %s4197_s3   ;;  %s217_s6 = sand.u32 1, %s4011_s16  }
  0x86   : > { %3980 = vsyncadd (%p5505_p13), [#allocation3], 4294963200  ;;  %s2629_s28 = sshll.u32 %s217_s6, 13  ;;  %s216_s0 = scalar_lea.sflag [#allocation6], %s215_s29 }
  0x87   : > { %s4327_s23 = scalar_lea.vmem [#allocation5], %s2629_s28  ;;  %p5506_p12 = scmp.ne.s32.totalorder %s5488_s5, 0 }
  0x89   : > { %3982 = dma.done.wait (%p5506_p12), %s216_s0, 131072  }
  0x8a   : > { %3984 = vsyncadd (%p5506_p12), %s216_s0, 4294836224  ;;  %s4334_s30 = sand.u32 1, %s3999_s13  }
  0x8b   : > { %s2630_s24 = sshll.u32 %s4334_s30, 2 }
  0x8c   : > { %s228_s9 = scalar_lea.vmem [#allocation7], %s2630_s24 }
  0x8d   : > { %3986 = dma.done.wait (%p4268_p0), %s216_s0, 64  }
  0x8e   : > { %3988 = vsyncadd (%p4268_p0), %s216_s0, 4294967232  ;;  %s2631_s3 = sshll.u32 %s4334_s30, 5  ;;  %p2632_p5 = scmp.ne.s32.totalorder %s4019_s18, 0 }
  0x8f   : > { %s4342_s4 = scalar_lea.vmem [#allocation8], %s2631_s3  ;;  %v266_v0 = vlaneseq (!%p2632_p5)  ;;  %v264_v2 = vld [vmem:[%s228_s9] sm:$0xf] (!%p2632_p5) }
  0x90   : > { %263 = sbr.rel (%p2632_p5) target bundleno = 153 (0x99), region = 48 }
  0x91   : > { %v267_v1 = vshrl.u32 (!%p2632_p5), %v266_v0, 7 }
  0x93   : > { %v268_v3 = vsub.s32 (!%p2632_p5), 0, %v267_v1  ;;  %v272_v4 = vsub.s32 (!%p2632_p5), 1, %v267_v1  ;;  %v276_v5 = vsub.s32 (!%p2632_p5), 2, %v267_v1  ;;  %v280_v6 = vsub.s32 (!%p2632_p5), 3, %v267_v1 }
  0x95   : > { %v269_v7 = vrot.slane (!%p2632_p5), %v264_v2, %v268_v3  ;;  %v273_v8 = vrot.slane (!%p2632_p5), %v264_v2, %v272_v4  ;;  %v277_v9 = vrot.slane (!%p2632_p5), %v264_v2, %v276_v5  ;;  %v281_v10 = vrot.slane (!%p2632_p5), %v264_v2, %v280_v6 }
  0x97   : > { %286 = vst [vmem:[%s4342_s4] sm:$0xff] %v269_v7  ;;  %287 = vst [vmem:[%s4342_s4 + $0x8] sm:$0xff] %v273_v8 }
  0x98   : > { %288 = vst [vmem:[%s4342_s4 + $0x10] sm:$0xff] %v277_v9  ;;  %289 = vst [vmem:[%s4342_s4 + $0x18] sm:$0xff] %v281_v10 }
  0x99 PF: > { %v314_v11 = vld [vmem:[%s4327_s23 + $0x8] sm:$0xff]  ;;  %v313_v16 = vld [vmem:[%s4327_s23] sm:$0xff]  ;;  %s2642_s5 = sshll.u32 %s4019_s18, 7  ;;  %s2643_s27 = sshll.u32 %s4023_s19, 9 }
  0x9a   : > { %v330_v12 = vld [vmem:[%s4327_s23 + $0x88] sm:$0xff]  ;;  %v329_v17 = vld [vmem:[%s4327_s23 + $0x80] sm:$0xff]  ;;  %s4402_s18 = scalar_lea.vmem [#allocation2], %s2642_s5  ;;  %s2496_s26 = sshll.u32 %s4342_s4, 4  ;;  %s5404_s26 = int_to_ptr.vmem [resolvable:$true] %s2496_s26 }
  0x9b   : > { %v826_v13 = vld [vmem:[%s4327_s23 + $0x1008] sm:$0xff]  ;;  %v2644_v14 = vpack.c.bf16 %v330_v12, %v314_v11  ;;  %v2646_v19 = vpack.c.bf16 %v329_v17, %v313_v16  ;;  %v825_v20 = vld [vmem:[%s4327_s23 + $0x1000] sm:$0xff]  ;;  %s5507_s29 = sld [smem:[#allocation16_spill]]  ;;  %s2482_s19 = scalar_lea.sflag [#allocation4], %s4334_s30 }
  0x9c   : > { %v842_v15 = vld [vmem:[%s4327_s23 + $0x1088] sm:$0xff]  ;;  %v841_v21 = vld [vmem:[%s4327_s23 + $0x1080] sm:$0xff]  ;;  %s3905_s28 = scalar_lea.vmem %s5404_s26, 512  ;;  %p5508_p4 = scmp.ne.s32.totalorder %s5497_s11, 0 }
  0x9d   : > { %v3156_v18 = vpack.c.bf16 %v842_v15, %v826_v13  ;;  %v346_v22 = vld [vmem:[%s4327_s23 + $0x108] sm:$0xff]  ;;  %2645 = vmatprep.subr.bf16.mxu0 %v2644_v14  ;;  %v3158_v23 = vpack.c.bf16 %v841_v21, %v825_v20  ;;  %v345_v29 = vld [vmem:[%s4327_s23 + $0x100] sm:$0xff]  ;;  %p3906_p0 = scmp.ne.s32.totalorder %s5404_s26, %s3905_s28  ;;  %s4043_s0 = smov [#allocation8]  }
  0x9e   : > { %v362_v24 = vld [vmem:[%s4327_s23 + $0x188] sm:$0xff]  ;;  %2647 = vmatpush1.bf16.xpose.msra.mxu0 %v2646_v19  ;;  %v361_v30 = vld [vmem:[%s4327_s23 + $0x180] sm:$0xff] }
  0x9f   : > { %v858_v25 = vld [vmem:[%s4327_s23 + $0x1108] sm:$0xff]  ;;  %3157 = vmatprep.subr.bf16.mxu1 %v3156_v18  ;;  %v2648_v27 = vpack.c.bf16 %v362_v24, %v346_v22  ;;  %v857_v31 = vld [vmem:[%s4327_s23 + $0x1100] sm:$0xff]  ;;  %v2650_v37 = vpack.c.bf16 %v361_v30, %v345_v29  ;;  %p3907_p8 = pnand %p3906_p0, %p5508_p4 }
  0xa0   : > { %v874_v26 = vld [vmem:[%s4327_s23 + $0x1188] sm:$0xff]  ;;  %3159 = vmatpush1.bf16.xpose.msra.mxu1 %v3158_v23  ;;  %v873_v32 = vld [vmem:[%s4327_s23 + $0x1180] sm:$0xff] }
  0xa1   : > { %v3160_v28 = vpack.c.bf16 %v874_v26, %v858_v25  ;;  %2649 = vmatprep.subr.bf16.mxu0 %v2648_v27  ;;  %v378_v33 = vld [vmem:[%s4327_s23 + $0x208] sm:$0xff]  ;;  %v3162_v38 = vpack.c.bf16 %v873_v32, %v857_v31  ;;  %v377_v41 = vld [vmem:[%s4327_s23 + $0x200] sm:$0xff]  ;;  %s5402_s6 = scalar_lea.hbm %s5507_s29, %s2643_s27  ;;  %p3908_p1 = pneg %p3907_p8 }
  0xa2   : > { %v394_v34 = vld [vmem:[%s4327_s23 + $0x288] sm:$0xff]  ;;  %v393_v42 = vld [vmem:[%s4327_s23 + $0x280] sm:$0xff] }
  0xa3   : > { %3161 = vmatprep.subr.bf16.mxu1 %v3160_v28  ;;  %v890_v35 = vld [vmem:[%s4327_s23 + $0x1208] sm:$0xff]  ;;  %v2652_v39 = vpack.c.bf16 %v394_v34, %v378_v33  ;;  %v889_v43 = vld [vmem:[%s4327_s23 + $0x1200] sm:$0xff]  ;;  %v2654_v49 = vpack.c.bf16 %v393_v42, %v377_v41 }
  0xa4   : > { %v906_v36 = vld [vmem:[%s4327_s23 + $0x1288] sm:$0xff]  ;;  %v905_v44 = vld [vmem:[%s4327_s23 + $0x1280] sm:$0xff] }
  0xa5   : > { %v3164_v40 = vpack.c.bf16 %v906_v36, %v890_v35  ;;  %v410_v45 = vld [vmem:[%s4327_s23 + $0x308] sm:$0xff]  ;;  %v3166_v50 = vpack.c.bf16 %v905_v44, %v889_v43  ;;  %v409_v53 = vld [vmem:[%s4327_s23 + $0x300] sm:$0xff] }
  0xa6   : > { %2651 = vmatpush1.bf16.xpose.msra.mxu0 %v2650_v37  ;;  %v426_v46 = vld [vmem:[%s4327_s23 + $0x388] sm:$0xff]  ;;  %v425_v54 = vld [vmem:[%s4327_s23 + $0x380] sm:$0xff] }
  0xa7   : > { %2653 = vmatprep.subr.bf16.mxu0 %v2652_v39  ;;  %v922_v47 = vld [vmem:[%s4327_s23 + $0x1308] sm:$0xff]  ;;  %v2656_v51 = vpack.c.bf16 %v426_v46, %v410_v45  ;;  %v921_v55 = vld [vmem:[%s4327_s23 + $0x1300] sm:$0xff]  ;;  %v2658_v61 = vpack.c.bf16 %v425_v54, %v409_v53 }
  0xa8   : > { %3163 = vmatpush1.bf16.xpose.msra.mxu1 %v3162_v38  ;;  %v938_v48 = vld [vmem:[%s4327_s23 + $0x1388] sm:$0xff]  ;;  %v937_v56 = vld [vmem:[%s4327_s23 + $0x1380] sm:$0xff] }
  0xa9   : > { %3165 = vmatprep.subr.bf16.mxu1 %v3164_v40  ;;  %v3168_v52 = vpack.c.bf16 %v938_v48, %v922_v47  ;;  %v442_v57 = vld [vmem:[%s4327_s23 + $0x408] sm:$0xff]  ;;  %v3170_v62 = vpack.c.bf16 %v937_v56, %v921_v55  ;;  %v441_v1 = vld [vmem:[%s4327_s23 + $0x400] sm:$0xff] }
  0xaa   : > { %v458_v58 = vld [vmem:[%s4327_s23 + $0x488] sm:$0xff]  ;;  %v457_v2 = vld [vmem:[%s4327_s23 + $0x480] sm:$0xff] }
  0xab   : > { %v954_v59 = vld [vmem:[%s4327_s23 + $0x1408] sm:$0xff]  ;;  %v2660_v63 = vpack.c.bf16 %v458_v58, %v442_v57  ;;  %v953_v3 = vld [vmem:[%s4327_s23 + $0x1400] sm:$0xff]  ;;  %v2662_v9 = vpack.c.bf16 %v457_v2, %v441_v1 }
  0xac   : > { %v970_v60 = vld [vmem:[%s4327_s23 + $0x1488] sm:$0xff]  ;;  %v969_v4 = vld [vmem:[%s4327_s23 + $0x1480] sm:$0xff] }
  0xad   : > { %v3172_v0 = vpack.c.bf16 %v970_v60, %v954_v59  ;;  %v474_v5 = vld [vmem:[%s4327_s23 + $0x508] sm:$0xff]  ;;  %v3174_v10 = vpack.c.bf16 %v969_v4, %v953_v3  ;;  %v473_v13 = vld [vmem:[%s4327_s23 + $0x500] sm:$0xff] }
  0xae   : > { %2655 = vmatpush1.bf16.xpose.msra.mxu0 %v2654_v49  ;;  %v490_v6 = vld [vmem:[%s4327_s23 + $0x588] sm:$0xff]  ;;  %v489_v14 = vld [vmem:[%s4327_s23 + $0x580] sm:$0xff] }
  0xaf   : > { %2657 = vmatprep.subr.bf16.mxu0 %v2656_v51  ;;  %v986_v7 = vld [vmem:[%s4327_s23 + $0x1508] sm:$0xff]  ;;  %v2664_v11 = vpack.c.bf16 %v490_v6, %v474_v5  ;;  %v985_v15 = vld [vmem:[%s4327_s23 + $0x1500] sm:$0xff]  ;;  %v2666_v21 = vpack.c.bf16 %v489_v14, %v473_v13 }
  0xb0   : > { %3167 = vmatpush1.bf16.xpose.msra.mxu1 %v3166_v50  ;;  %v1002_v8 = vld [vmem:[%s4327_s23 + $0x1588] sm:$0xff]  ;;  %v1001_v16 = vld [vmem:[%s4327_s23 + $0x1580] sm:$0xff] }
  0xb1   : > { %3169 = vmatprep.subr.bf16.mxu1 %v3168_v52  ;;  %v3176_v12 = vpack.c.bf16 %v1002_v8, %v986_v7  ;;  %v506_v17 = vld [vmem:[%s4327_s23 + $0x608] sm:$0xff]  ;;  %v3178_v22 = vpack.c.bf16 %v1001_v16, %v985_v15  ;;  %v505_v26 = vld [vmem:[%s4327_s23 + $0x600] sm:$0xff] }
  0xb2   : > { %v522_v18 = vld [vmem:[%s4327_s23 + $0x688] sm:$0xff]  ;;  %v521_v27 = vld [vmem:[%s4327_s23 + $0x680] sm:$0xff] }
  0xb3   : > { %v1018_v19 = vld [vmem:[%s4327_s23 + $0x1608] sm:$0xff]  ;;  %v2668_v23 = vpack.c.bf16 %v522_v18, %v506_v17  ;;  %v1017_v28 = vld [vmem:[%s4327_s23 + $0x1600] sm:$0xff]  ;;  %v2670_v34 = vpack.c.bf16 %v521_v27, %v505_v26 }
  0xb4   : > { %v1034_v20 = vld [vmem:[%s4327_s23 + $0x1688] sm:$0xff]  ;;  %v1033_v29 = vld [vmem:[%s4327_s23 + $0x1680] sm:$0xff] }
  0xb5   : > { %v3180_v24 = vpack.c.bf16 %v1034_v20, %v1018_v19  ;;  %v298_v25 = vld [vmem:[%s4402_s18 + $0x8] sm:$0xff]  ;;  %v3182_v35 = vpack.c.bf16 %v1033_v29, %v1017_v28  ;;  %v537_v38 = vld [vmem:[%s4327_s23 + $0x700] sm:$0xff] }
  0xb6   : > { %2659 = vmatpush1.bf16.xpose.msra.mxu0 %v2658_v61  ;;  %1401 = vmatprep.mubr.f32.mxu0 %v298_v25  ;;  %v538_v30 = vld [vmem:[%s4327_s23 + $0x708] sm:$0xff]  ;;  %v553_v39 = vld [vmem:[%s4327_s23 + $0x780] sm:$0xff] }
  0xb7   : > { %2661 = vmatprep.subr.bf16.mxu0 %v2660_v63  ;;  %1969 = vmatprep.mubr.f32.mxu1 %v298_v25  ;;  %v554_v31 = vld [vmem:[%s4327_s23 + $0x788] sm:$0xff]  ;;  %v1049_v40 = vld [vmem:[%s4327_s23 + $0x1700] sm:$0xff]  ;;  %v2674_v46 = vpack.c.bf16 %v553_v39, %v537_v38 }
  0xb8   : > { %3171 = vmatpush1.bf16.xpose.msra.mxu1 %v3170_v62  ;;  %v1050_v32 = vld [vmem:[%s4327_s23 + $0x1708] sm:$0xff]  ;;  %v2672_v36 = vpack.c.bf16 %v554_v31, %v538_v30  ;;  %v1065_v41 = vld [vmem:[%s4327_s23 + $0x1780] sm:$0xff] }
  0xb9   : > { %3173 = vmatprep.subr.bf16.mxu1 %v3172_v0  ;;  %v1066_v33 = vld [vmem:[%s4327_s23 + $0x1788] sm:$0xff]  ;;  %v3186_v47 = vpack.c.bf16 %v1065_v41, %v1049_v40  ;;  %v569_v50 = vld [vmem:[%s4327_s23 + $0x800] sm:$0xff] }
  0xba   : > { %v3184_v37 = vpack.c.bf16 %v1066_v33, %v1050_v32  ;;  %v570_v42 = vld [vmem:[%s4327_s23 + $0x808] sm:$0xff]  ;;  %v585_v51 = vld [vmem:[%s4327_s23 + $0x880] sm:$0xff] }
  0xbb   : > { %v586_v43 = vld [vmem:[%s4327_s23 + $0x888] sm:$0xff]  ;;  %v1081_v52 = vld [vmem:[%s4327_s23 + $0x1800] sm:$0xff]  ;;  %v2678_v58 = vpack.c.bf16 %v585_v51, %v569_v50 }
  0xbc   : > { %v1082_v44 = vld [vmem:[%s4327_s23 + $0x1808] sm:$0xff]  ;;  %v2676_v48 = vpack.c.bf16 %v586_v43, %v570_v42  ;;  %v1097_v53 = vld [vmem:[%s4327_s23 + $0x1880] sm:$0xff] }
  0xbd   : > { %v1098_v45 = vld [vmem:[%s4327_s23 + $0x1888] sm:$0xff]  ;;  %v3190_v59 = vpack.c.bf16 %v1097_v53, %v1081_v52  ;;  %v601_v62 = vld [vmem:[%s4327_s23 + $0x900] sm:$0xff] }
  0xbe   : > { %2663 = vmatpush1.bf16.xpose.msra.mxu0 %v2662_v9  ;;  %v3188_v49 = vpack.c.bf16 %v1098_v45, %v1082_v44  ;;  %v602_v54 = vld [vmem:[%s4327_s23 + $0x908] sm:$0xff]  ;;  %v617_v63 = vld [vmem:[%s4327_s23 + $0x980] sm:$0xff] }
  0xbf   : > { %2665 = vmatprep.subr.bf16.mxu0 %v2664_v11  ;;  %v618_v55 = vld [vmem:[%s4327_s23 + $0x988] sm:$0xff]  ;;  %v1113_v0 = vld [vmem:[%s4327_s23 + $0x1900] sm:$0xff]  ;;  %v2682_v6 = vpack.c.bf16 %v617_v63, %v601_v62 }
  0xc0   : > { %3175 = vmatpush1.bf16.xpose.msra.mxu1 %v3174_v10  ;;  %v1114_v56 = vld [vmem:[%s4327_s23 + $0x1908] sm:$0xff]  ;;  %v2680_v60 = vpack.c.bf16 %v618_v55, %v602_v54  ;;  %v1129_v1 = vld [vmem:[%s4327_s23 + $0x1980] sm:$0xff] }
  0xc1   : > { %3177 = vmatprep.subr.bf16.mxu1 %v3176_v12  ;;  %v1130_v57 = vld [vmem:[%s4327_s23 + $0x1988] sm:$0xff]  ;;  %v3194_v7 = vpack.c.bf16 %v1129_v1, %v1113_v0  ;;  %v633_v10 = vld [vmem:[%s4327_s23 + $0xa00] sm:$0xff] }
  0xc2   : > { %v3192_v61 = vpack.c.bf16 %v1130_v57, %v1114_v56  ;;  %v634_v2 = vld [vmem:[%s4327_s23 + $0xa08] sm:$0xff]  ;;  %v649_v11 = vld [vmem:[%s4327_s23 + $0xa80] sm:$0xff] }
  0xc3   : > { %v650_v3 = vld [vmem:[%s4327_s23 + $0xa88] sm:$0xff]  ;;  %v1145_v12 = vld [vmem:[%s4327_s23 + $0x1a00] sm:$0xff]  ;;  %v2686_v18 = vpack.c.bf16 %v649_v11, %v633_v10  ;;  %v316_v10 = vld [vmem:[%s4327_s23 + $0x18] sm:$0xff] }
  0xc4   : > { %v1146_v4 = vld [vmem:[%s4327_s23 + $0x1a08] sm:$0xff]  ;;  %v2684_v8 = vpack.c.bf16 %v650_v3, %v634_v2  ;;  %v1161_v13 = vld [vmem:[%s4327_s23 + $0x1a80] sm:$0xff]  ;;  %v332_v11 = vld [vmem:[%s4327_s23 + $0x98] sm:$0xff] }
  0xc5   : > { %v1162_v5 = vld [vmem:[%s4327_s23 + $0x1a88] sm:$0xff]  ;;  %v3198_v19 = vpack.c.bf16 %v1161_v13, %v1145_v12  ;;  %v1193_v25 = vld [vmem:[%s4327_s23 + $0x1b80] sm:$0xff]  ;;  %v828_v12 = vld [vmem:[%s4327_s23 + $0x1018] sm:$0xff] }
  0xc6   : > { %2667 = vmatpush1.bf16.xpose.msra.mxu0 %v2666_v21  ;;  %v3196_v9 = vpack.c.bf16 %v1162_v5, %v1146_v4  ;;  %v666_v14 = vld [vmem:[%s4327_s23 + $0xb08] sm:$0xff]  ;;  %v844_v13 = vld [vmem:[%s4327_s23 + $0x1098] sm:$0xff] }
  0xc7   : > { %2669 = vmatprep.subr.bf16.mxu0 %v2668_v23  ;;  %v682_v15 = vld [vmem:[%s4327_s23 + $0xb88] sm:$0xff]  ;;  %v681_v23 = vld [vmem:[%s4327_s23 + $0xb80] sm:$0xff] }
  0xc8   : > { %3179 = vmatpush1.bf16.xpose.msra.mxu1 %v3178_v22  ;;  %v1178_v16 = vld [vmem:[%s4327_s23 + $0x1b08] sm:$0xff]  ;;  %v2688_v20 = vpack.c.bf16 %v682_v15, %v666_v14  ;;  %v665_v22 = vld [vmem:[%s4327_s23 + $0xb00] sm:$0xff] }
  0xc9   : > { %3181 = vmatprep.subr.bf16.mxu1 %v3180_v24  ;;  %v1194_v17 = vld [vmem:[%s4327_s23 + $0x1b88] sm:$0xff]  ;;  %v1177_v24 = vld [vmem:[%s4327_s23 + $0x1b00] sm:$0xff]  ;;  %v2690_v30 = vpack.c.bf16 %v681_v23, %v665_v22  ;;  %v348_v22 = vld [vmem:[%s4327_s23 + $0x118] sm:$0xff] }
  0xca   : > { %v3200_v21 = vpack.c.bf16 %v1194_v17, %v1178_v16  ;;  %v698_v26 = vld [vmem:[%s4327_s23 + $0xc08] sm:$0xff]  ;;  %v3202_v31 = vpack.c.bf16 %v1193_v25, %v1177_v24  ;;  %v2708_v16 = vpack.c.bf16 %v332_v11, %v316_v10  ;;  %v3220_v17 = vpack.c.bf16 %v844_v13, %v828_v12  ;;  %v364_v23 = vld [vmem:[%s4327_s23 + $0x198] sm:$0xff] }
  0xcb   : > { %v714_v27 = vld [vmem:[%s4327_s23 + $0xc88] sm:$0xff]  ;;  %v860_v24 = vld [vmem:[%s4327_s23 + $0x1118] sm:$0xff] }
  0xcc   : > { %v1210_v28 = vld [vmem:[%s4327_s23 + $0x1c08] sm:$0xff]  ;;  %v2692_v32 = vpack.c.bf16 %v714_v27, %v698_v26  ;;  %v876_v25 = vld [vmem:[%s4327_s23 + $0x1198] sm:$0xff]  ;;  %v297_v26 = vld [vmem:[%s4402_s18] sm:$0xff] }
  0xcd   : > { %v1226_v29 = vld [vmem:[%s4327_s23 + $0x1c88] sm:$0xff]  ;;  %v988_v10 = vld [vmem:[%s4327_s23 + $0x1518] sm:$0xff] }
  0xce   : > { %2671 = vmatpush1.bf16.xpose.msra.mxu0 %v2670_v34  ;;  %v3204_v33 = vpack.c.bf16 %v1226_v29, %v1210_v28  ;;  %v697_v34 = vld [vmem:[%s4327_s23 + $0xc00] sm:$0xff]  ;;  %v730_v38 = vld [vmem:[%s4327_s23 + $0xd08] sm:$0xff]  ;;  %v2712_v29 = vpack.c.bf16 %v364_v23, %v348_v22  ;;  %v1004_v11 = vld [vmem:[%s4327_s23 + $0x1598] sm:$0xff] }
  0xcf   : > { %2673 = vmatprep.subr.bf16.mxu0 %v2672_v36  ;;  %v1209_v36 = vld [vmem:[%s4327_s23 + $0x1c00] sm:$0xff]  ;;  %v746_v39 = vld [vmem:[%s4327_s23 + $0xd88] sm:$0xff]  ;;  %v1020_v22 = vld [vmem:[%s4327_s23 + $0x1618] sm:$0xff] }
  0xd0   : > { %3183 = vmatpush1.bf16.xpose.msra.mxu1 %v3182_v35  ;;  %v713_v35 = vld [vmem:[%s4327_s23 + $0xc80] sm:$0xff]  ;;  %v1242_v40 = vld [vmem:[%s4327_s23 + $0x1d08] sm:$0xff]  ;;  %v2696_v44 = vpack.c.bf16 %v746_v39, %v730_v38  ;;  %v892_v38 = vld [vmem:[%s4327_s23 + $0x1218] sm:$0xff] }
  0xd1   : > { %3185 = vmatprep.subr.bf16.mxu1 %v3184_v37  ;;  %v1225_v37 = vld [vmem:[%s4327_s23 + $0x1c80] sm:$0xff]  ;;  %v1258_v41 = vld [vmem:[%s4327_s23 + $0x1d88] sm:$0xff]  ;;  %v2694_v42 = vpack.c.bf16 %v713_v35, %v697_v34  ;;  %v859_v34 = vld [vmem:[%s4327_s23 + $0x1110] sm:$0xff] }
  0xd2   : > { %v3206_v43 = vpack.c.bf16 %v1225_v37, %v1209_v36  ;;  %v3208_v45 = vpack.c.bf16 %v1258_v41, %v1242_v40  ;;  %v762_v50 = vld [vmem:[%s4327_s23 + $0xe08] sm:$0xff]  ;;  %v875_v35 = vld [vmem:[%s4327_s23 + $0x1190] sm:$0xff]  ;;  %v380_v36 = vld [vmem:[%s4327_s23 + $0x218] sm:$0xff] }
  0xd3   : > { %v778_v51 = vld [vmem:[%s4327_s23 + $0xe88] sm:$0xff]  ;;  %v396_v37 = vld [vmem:[%s4327_s23 + $0x298] sm:$0xff]  ;;  %v3226_v41 = vpack.c.bf16 %v875_v35, %v859_v34 }
  0xd4   : > { %v1274_v52 = vld [vmem:[%s4327_s23 + $0x1e08] sm:$0xff]  ;;  %v2700_v56 = vpack.c.bf16 %v778_v51, %v762_v50  ;;  %v908_v39 = vld [vmem:[%s4327_s23 + $0x1298] sm:$0xff] }
  0xd5   : > { %v1290_v53 = vld [vmem:[%s4327_s23 + $0x1e88] sm:$0xff]  ;;  %v924_v50 = vld [vmem:[%s4327_s23 + $0x1318] sm:$0xff] }
  0xd6   : > { %2675 = vmatpush1.bf16.xpose.msra.mxu0 %v2674_v46  ;;  %v729_v46 = vld [vmem:[%s4327_s23 + $0xd00] sm:$0xff]  ;;  %v3212_v57 = vpack.c.bf16 %v1290_v53, %v1274_v52  ;;  %v794_v62 = vld [vmem:[%s4327_s23 + $0xf08] sm:$0xff]  ;;  %v940_v51 = vld [vmem:[%s4327_s23 + $0x1398] sm:$0xff] }
  0xd7   : > { %2677 = vmatprep.subr.bf16.mxu0 %v2676_v48  ;;  %v1241_v48 = vld [vmem:[%s4327_s23 + $0x1d00] sm:$0xff]  ;;  %v810_v63 = vld [vmem:[%s4327_s23 + $0xf88] sm:$0xff]  ;;  %v1036_v23 = vld [vmem:[%s4327_s23 + $0x1698] sm:$0xff] }
  0xd8   : > { %3187 = vmatpush1.bf16.xpose.msra.mxu1 %v3186_v47  ;;  %v745_v47 = vld [vmem:[%s4327_s23 + $0xd80] sm:$0xff]  ;;  %v1306_v0 = vld [vmem:[%s4327_s23 + $0x1f08] sm:$0xff]  ;;  %v2704_v4 = vpack.c.bf16 %v810_v63, %v794_v62  ;;  %v956_v62 = vld [vmem:[%s4327_s23 + $0x1418] sm:$0xff] }
  0xd9   : > { %3189 = vmatprep.subr.bf16.mxu1 %v3188_v49  ;;  %v1257_v49 = vld [vmem:[%s4327_s23 + $0x1d80] sm:$0xff]  ;;  %v2698_v54 = vpack.c.bf16 %v745_v47, %v729_v46  ;;  %v1322_v1 = vld [vmem:[%s4327_s23 + $0x1f88] sm:$0xff]  ;;  %v891_v46 = vld [vmem:[%s4327_s23 + $0x1210] sm:$0xff] }
  0xda   : > { %v3210_v55 = vpack.c.bf16 %v1257_v49, %v1241_v48  ;;  %v3216_v5 = vpack.c.bf16 %v1322_v1, %v1306_v0  ;;  %v907_v47 = vld [vmem:[%s4327_s23 + $0x1290] sm:$0xff]  ;;  %v412_v48 = vld [vmem:[%s4327_s23 + $0x318] sm:$0xff] }
  0xdb   : > { %v428_v49 = vld [vmem:[%s4327_s23 + $0x398] sm:$0xff]  ;;  %v3230_v53 = vpack.c.bf16 %v907_v47, %v891_v46 }
  0xdc   : > { %v972_v63 = vld [vmem:[%s4327_s23 + $0x1498] sm:$0xff] }
  0xdd   : > { %v1052_v34 = vld [vmem:[%s4327_s23 + $0x1718] sm:$0xff] }
  0xde   : > { %2679 = vmatpush1.bf16.xpose.msra.mxu0 %v2678_v58  ;;  %v761_v58 = vld [vmem:[%s4327_s23 + $0xe00] sm:$0xff]  ;;  %v1068_v35 = vld [vmem:[%s4327_s23 + $0x1798] sm:$0xff] }
  0xdf   : > { %2681 = vmatprep.subr.bf16.mxu0 %v2680_v60  ;;  %v1273_v60 = vld [vmem:[%s4327_s23 + $0x1e00] sm:$0xff]  ;;  %v1084_v46 = vld [vmem:[%s4327_s23 + $0x1818] sm:$0xff] }
  0xe0   : > { %3191 = vmatpush1.bf16.xpose.msra.mxu1 %v3190_v59  ;;  %v777_v59 = vld [vmem:[%s4327_s23 + $0xe80] sm:$0xff]  ;;  %v1100_v47 = vld [vmem:[%s4327_s23 + $0x1898] sm:$0xff] }
  0xe1   : > { %3193 = vmatprep.subr.bf16.mxu1 %v3192_v61  ;;  %v1289_v61 = vld [vmem:[%s4327_s23 + $0x1e80] sm:$0xff]  ;;  %v2702_v2 = vpack.c.bf16 %v777_v59, %v761_v58  ;;  %v923_v58 = vld [vmem:[%s4327_s23 + $0x1310] sm:$0xff] }
  0xe2   : > { %v3214_v3 = vpack.c.bf16 %v1289_v61, %v1273_v60  ;;  %v939_v59 = vld [vmem:[%s4327_s23 + $0x1390] sm:$0xff]  ;;  %v444_v60 = vld [vmem:[%s4327_s23 + $0x418] sm:$0xff] }
  0xe3   : > { %v460_v61 = vld [vmem:[%s4327_s23 + $0x498] sm:$0xff]  ;;  %v3234_v1 = vpack.c.bf16 %v939_v59, %v923_v58 }
  0xe4   : > { %v1116_v58 = vld [vmem:[%s4327_s23 + $0x1918] sm:$0xff] }
  0xe5   : > { %v1132_v59 = vld [vmem:[%s4327_s23 + $0x1998] sm:$0xff] }
  0xe6   : > { %2683 = vmatpush1.bf16.xpose.msra.mxu0 %v2682_v6  ;;  %v793_v6 = vld [vmem:[%s4327_s23 + $0xf00] sm:$0xff] }
  0xe7   : > { %2685 = vmatprep.subr.bf16.mxu0 %v2684_v8  ;;  %v1305_v8 = vld [vmem:[%s4327_s23 + $0x1f00] sm:$0xff] }
  0xe8   : > { %3195 = vmatpush1.bf16.xpose.msra.mxu1 %v3194_v7  ;;  %v809_v7 = vld [vmem:[%s4327_s23 + $0xf80] sm:$0xff] }
  0xe9   : > { %3197 = vmatprep.subr.bf16.mxu1 %v3196_v9  ;;  %v1321_v9 = vld [vmem:[%s4327_s23 + $0x1f80] sm:$0xff]  ;;  %v2706_v14 = vpack.c.bf16 %v809_v7, %v793_v6  ;;  %v955_v6 = vld [vmem:[%s4327_s23 + $0x1410] sm:$0xff] }
  0xea   : > { %v3218_v15 = vpack.c.bf16 %v1321_v9, %v1305_v8  ;;  %v971_v7 = vld [vmem:[%s4327_s23 + $0x1490] sm:$0xff]  ;;  %v476_v8 = vld [vmem:[%s4327_s23 + $0x518] sm:$0xff] }
  0xeb   : > { %v492_v9 = vld [vmem:[%s4327_s23 + $0x598] sm:$0xff]  ;;  %v3238_v13 = vpack.c.bf16 %v971_v7, %v955_v6 }
  0xec   : > { %v1148_v6 = vld [vmem:[%s4327_s23 + $0x1a18] sm:$0xff] }
  0xed   : > { %v1164_v7 = vld [vmem:[%s4327_s23 + $0x1a98] sm:$0xff] }
  0xee   : > { %2687 = vmatpush1.bf16.xpose.msra.mxu0 %v2686_v18  ;;  %v315_v18 = vld [vmem:[%s4327_s23 + $0x10] sm:$0xff] }
  0xef   : > { %2689 = vmatprep.subr.bf16.mxu0 %v2688_v20  ;;  %v827_v20 = vld [vmem:[%s4327_s23 + $0x1010] sm:$0xff] }
  0xf0   : > { %3199 = vmatpush1.bf16.xpose.msra.mxu1 %v3198_v19  ;;  %v331_v19 = vld [vmem:[%s4327_s23 + $0x90] sm:$0xff] }
  0xf1   : > { %3201 = vmatprep.subr.bf16.mxu1 %v3200_v21  ;;  %v843_v21 = vld [vmem:[%s4327_s23 + $0x1090] sm:$0xff]  ;;  %v2710_v27 = vpack.c.bf16 %v331_v19, %v315_v18 }
  0xf2   : > { %v3222_v28 = vpack.c.bf16 %v843_v21, %v827_v20  ;;  %v987_v18 = vld [vmem:[%s4327_s23 + $0x1510] sm:$0xff]  ;;  %v508_v20 = vld [vmem:[%s4327_s23 + $0x618] sm:$0xff] }
  0xf3   : > { %v1003_v19 = vld [vmem:[%s4327_s23 + $0x1590] sm:$0xff]  ;;  %v524_v21 = vld [vmem:[%s4327_s23 + $0x698] sm:$0xff] }
  0xf6   : > { %2691 = vmatpush1.bf16.xpose.msra.mxu0 %v2690_v30  ;;  %v3224_v30 = vpack.c.bf16 %v876_v25, %v860_v24  ;;  %v3242_v25 = vpack.c.bf16 %v1003_v19, %v987_v18  ;;  %v1180_v18 = vld [vmem:[%s4327_s23 + $0x1b18] sm:$0xff] }
  0xf7   : > { %2693 = vmatprep.subr.bf16.mxu0 %v2692_v32  ;;  %v347_v32 = vld [vmem:[%s4327_s23 + $0x110] sm:$0xff]  ;;  %v1196_v19 = vld [vmem:[%s4327_s23 + $0x1b98] sm:$0xff] }
  0xf8   : > { %3203 = vmatpush1.bf16.xpose.msra.mxu1 %v3202_v31  ;;  %v300_v31 = vld [vmem:[%s4402_s18 + $0x18] sm:$0xff] }
  0xf9   : > { %3205 = vmatprep.subr.bf16.mxu1 %v3204_v33  ;;  %v363_v33 = vld [vmem:[%s4327_s23 + $0x190] sm:$0xff] }
  0xfa   : > { %v2714_v40 = vpack.c.bf16 %v363_v33, %v347_v32  ;;  %v540_v32 = vld [vmem:[%s4327_s23 + $0x718] sm:$0xff] }
  0xfb   : > { %v556_v33 = vld [vmem:[%s4327_s23 + $0x798] sm:$0xff] }
  0xfe   : > { %2695 = vmatpush1.bf16.xpose.msra.mxu0 %v2694_v42  ;;  %v2716_v42 = vpack.c.bf16 %v396_v37, %v380_v36 }
  0xff   : > { %2697 = vmatprep.subr.bf16.mxu0 %v2696_v44  ;;  %v379_v44 = vld [vmem:[%s4327_s23 + $0x210] sm:$0xff] }
 0x100   : > { %3207 = vmatpush1.bf16.xpose.msra.mxu1 %v3206_v43  ;;  %v3228_v43 = vpack.c.bf16 %v908_v39, %v892_v38  ;;  %v2736_v38 = vpack.c.bf16 %v556_v33, %v540_v32  ;;  %v3248_v39 = vpack.c.bf16 %v1068_v35, %v1052_v34 }
 0x101   : > { %3209 = vmatprep.subr.bf16.mxu1 %v3208_v45  ;;  %v395_v45 = vld [vmem:[%s4327_s23 + $0x290] sm:$0xff] }
 0x102   : > { %v2718_v52 = vpack.c.bf16 %v395_v45, %v379_v44  ;;  %v572_v44 = vld [vmem:[%s4327_s23 + $0x818] sm:$0xff] }
 0x103   : > { %v588_v45 = vld [vmem:[%s4327_s23 + $0x898] sm:$0xff] }
 0x106   : > { %2699 = vmatpush1.bf16.xpose.msra.mxu0 %v2698_v54  ;;  %v2720_v54 = vpack.c.bf16 %v428_v49, %v412_v48 }
 0x107   : > { %2701 = vmatprep.subr.bf16.mxu0 %v2700_v56  ;;  %v411_v56 = vld [vmem:[%s4327_s23 + $0x310] sm:$0xff] }
 0x108   : > { %3211 = vmatpush1.bf16.xpose.msra.mxu1 %v3210_v55  ;;  %v3232_v55 = vpack.c.bf16 %v940_v51, %v924_v50  ;;  %v2740_v50 = vpack.c.bf16 %v588_v45, %v572_v44  ;;  %v3252_v51 = vpack.c.bf16 %v1100_v47, %v1084_v46 }
 0x109   : > { %3213 = vmatprep.subr.bf16.mxu1 %v3212_v57  ;;  %v427_v57 = vld [vmem:[%s4327_s23 + $0x390] sm:$0xff] }
 0x10a   : > { %v2722_v0 = vpack.c.bf16 %v427_v57, %v411_v56  ;;  %v604_v56 = vld [vmem:[%s4327_s23 + $0x918] sm:$0xff] }
 0x10b   : > { %v620_v57 = vld [vmem:[%s4327_s23 + $0x998] sm:$0xff] }
 0x10e   : > { %2703 = vmatpush1.bf16.xpose.msra.mxu0 %v2702_v2  ;;  %v2724_v2 = vpack.c.bf16 %v460_v61, %v444_v60 }
 0x10f   : > { %2705 = vmatprep.subr.bf16.mxu0 %v2704_v4  ;;  %v443_v4 = vld [vmem:[%s4327_s23 + $0x410] sm:$0xff] }
 0x110   : > { %3215 = vmatpush1.bf16.xpose.msra.mxu1 %v3214_v3  ;;  %v3236_v3 = vpack.c.bf16 %v972_v63, %v956_v62  ;;  %v2744_v62 = vpack.c.bf16 %v620_v57, %v604_v56  ;;  %v3256_v63 = vpack.c.bf16 %v1132_v59, %v1116_v58 }
 0x111   : > { %3217 = vmatprep.subr.bf16.mxu1 %v3216_v5  ;;  %v459_v5 = vld [vmem:[%s4327_s23 + $0x490] sm:$0xff] }
 0x112   : > { %v2726_v12 = vpack.c.bf16 %v459_v5, %v443_v4  ;;  %v636_v4 = vld [vmem:[%s4327_s23 + $0xa18] sm:$0xff] }
 0x113   : > { %v652_v5 = vld [vmem:[%s4327_s23 + $0xa98] sm:$0xff] }
 0x116   : > { %2707 = vmatpush1.bf16.xpose.msra.mxu0 %v2706_v14  ;;  %v2728_v14 = vpack.c.bf16 %v492_v9, %v476_v8 }
 0x117   : > { %2709 = vmatprep.subr.bf16.mxu0 %v2708_v16  ;;  %v475_v16 = vld [vmem:[%s4327_s23 + $0x510] sm:$0xff] }
 0x118   : > { %3219 = vmatpush1.bf16.xpose.msra.mxu1 %v3218_v15  ;;  %v3240_v15 = vpack.c.bf16 %v1004_v11, %v988_v10  ;;  %v2748_v10 = vpack.c.bf16 %v652_v5, %v636_v4  ;;  %v3260_v11 = vpack.c.bf16 %v1164_v7, %v1148_v6 }
 0x119   : > { %3221 = vmatprep.subr.bf16.mxu1 %v3220_v17  ;;  %v491_v17 = vld [vmem:[%s4327_s23 + $0x590] sm:$0xff] }
 0x11a   : > { %v2730_v24 = vpack.c.bf16 %v491_v17, %v475_v16  ;;  %v668_v16 = vld [vmem:[%s4327_s23 + $0xb18] sm:$0xff] }
 0x11b   : > { %v684_v17 = vld [vmem:[%s4327_s23 + $0xb98] sm:$0xff] }
 0x11d   : > { %1402 = vmatmul.mubr.f32.vlgmr.msra.gmra.mrb[0].mxu0 %v297_v26 }
 0x11e   : > { %2711 = vmatpush1.bf16.xpose.msra.mxu0 %v2710_v27  ;;  %1472 = vmatprep.mubr.f32.mxu0 %v300_v31  ;;  %v3244_v27 = vpack.c.bf16 %v1036_v23, %v1020_v22  ;;  %v2752_v22 = vpack.c.bf16 %v684_v17, %v668_v16  ;;  %v3264_v23 = vpack.c.bf16 %v1196_v19, %v1180_v18 }
 0x11f   : > { %1970 = vmatmul.mubr.f32.vlgmr.msra.gmra.mrb[0].mxu1 %v297_v26  ;;  %2713 = vmatprep.subr.bf16.mxu0 %v2712_v29  ;;  %v2732_v26 = vpack.c.bf16 %v524_v21, %v508_v20  ;;  %v523_v29 = vld [vmem:[%s4327_s23 + $0x690] sm:$0xff] }
 0x120   : > { %3223 = vmatpush1.bf16.xpose.msra.mxu1 %v3222_v28  ;;  %2040 = vmatprep.mubr.f32.mxu1 %v300_v31  ;;  %v507_v28 = vld [vmem:[%s4327_s23 + $0x610] sm:$0xff] }
 0x121   : > { %3225 = vmatprep.subr.bf16.mxu1 %v3224_v30  ;;  %v1019_v30 = vld [vmem:[%s4327_s23 + $0x1610] sm:$0xff]  ;;  %v2734_v36 = vpack.c.bf16 %v523_v29, %v507_v28  ;;  %v700_v28 = vld [vmem:[%s4327_s23 + $0xc18] sm:$0xff] }
 0x122   : > { %v1035_v31 = vld [vmem:[%s4327_s23 + $0x1690] sm:$0xff]  ;;  %v716_v29 = vld [vmem:[%s4327_s23 + $0xc98] sm:$0xff] }
 0x123   : > { %v3246_v37 = vpack.c.bf16 %v1035_v31, %v1019_v30  ;;  %v1212_v30 = vld [vmem:[%s4327_s23 + $0x1c18] sm:$0xff]  ;;  %v2756_v34 = vpack.c.bf16 %v716_v29, %v700_v28  ;;  %v299_v28 = vld [vmem:[%s4402_s18 + $0x10] sm:$0xff] }
 0x124   : > { %v1228_v31 = vld [vmem:[%s4327_s23 + $0x1c98] sm:$0xff] }
 0x125   : > { %v3268_v35 = vpack.c.bf16 %v1228_v31, %v1212_v30 }
 0x126   : > { %2715 = vmatpush1.bf16.xpose.msra.mxu0 %v2714_v40  ;;  %v539_v40 = vld [vmem:[%s4327_s23 + $0x710] sm:$0xff] }
 0x127   : > { %2717 = vmatprep.subr.bf16.mxu0 %v2716_v42  ;;  %v1051_v42 = vld [vmem:[%s4327_s23 + $0x1710] sm:$0xff] }
 0x128   : > { %3227 = vmatpush1.bf16.xpose.msra.mxu1 %v3226_v41  ;;  %v555_v41 = vld [vmem:[%s4327_s23 + $0x790] sm:$0xff] }
 0x129   : > { %3229 = vmatprep.subr.bf16.mxu1 %v3228_v43  ;;  %v1067_v43 = vld [vmem:[%s4327_s23 + $0x1790] sm:$0xff]  ;;  %v2738_v48 = vpack.c.bf16 %v555_v41, %v539_v40  ;;  %v732_v40 = vld [vmem:[%s4327_s23 + $0xd18] sm:$0xff] }
 0x12a   : > { %v3250_v49 = vpack.c.bf16 %v1067_v43, %v1051_v42  ;;  %v748_v41 = vld [vmem:[%s4327_s23 + $0xd98] sm:$0xff] }
 0x12b   : > { %v1244_v42 = vld [vmem:[%s4327_s23 + $0x1d18] sm:$0xff]  ;;  %v2760_v46 = vpack.c.bf16 %v748_v41, %v732_v40  ;;  %v894_v40 = vld [vmem:[%s4327_s23 + $0x1228] sm:$0xff] }
 0x12c   : > { %v1260_v43 = vld [vmem:[%s4327_s23 + $0x1d98] sm:$0xff]  ;;  %v910_v41 = vld [vmem:[%s4327_s23 + $0x12a8] sm:$0xff] }
 0x12d   : > { %v3272_v47 = vpack.c.bf16 %v1260_v43, %v1244_v42 }
 0x12e   : > { %2719 = vmatpush1.bf16.xpose.msra.mxu0 %v2718_v52  ;;  %v571_v52 = vld [vmem:[%s4327_s23 + $0x810] sm:$0xff] }
 0x12f   : > { %2721 = vmatprep.subr.bf16.mxu0 %v2720_v54  ;;  %v1083_v54 = vld [vmem:[%s4327_s23 + $0x1810] sm:$0xff] }
 0x130   : > { %3231 = vmatpush1.bf16.xpose.msra.mxu1 %v3230_v53  ;;  %v587_v53 = vld [vmem:[%s4327_s23 + $0x890] sm:$0xff] }
 0x131   : > { %3233 = vmatprep.subr.bf16.mxu1 %v3232_v55  ;;  %v1099_v55 = vld [vmem:[%s4327_s23 + $0x1890] sm:$0xff]  ;;  %v2742_v60 = vpack.c.bf16 %v587_v53, %v571_v52  ;;  %v764_v52 = vld [vmem:[%s4327_s23 + $0xe18] sm:$0xff] }
 0x132   : > { %v3254_v61 = vpack.c.bf16 %v1099_v55, %v1083_v54  ;;  %v780_v53 = vld [vmem:[%s4327_s23 + $0xe98] sm:$0xff] }
 0x133   : > { %v1276_v54 = vld [vmem:[%s4327_s23 + $0x1e18] sm:$0xff]  ;;  %v2764_v58 = vpack.c.bf16 %v780_v53, %v764_v52  ;;  %v926_v52 = vld [vmem:[%s4327_s23 + $0x1328] sm:$0xff] }
 0x134   : > { %v1292_v55 = vld [vmem:[%s4327_s23 + $0x1e98] sm:$0xff]  ;;  %v942_v53 = vld [vmem:[%s4327_s23 + $0x13a8] sm:$0xff] }
 0x135   : > { %v3276_v59 = vpack.c.bf16 %v1292_v55, %v1276_v54 }
 0x136   : > { %2723 = vmatpush1.bf16.xpose.msra.mxu0 %v2722_v0  ;;  %v603_v0 = vld [vmem:[%s4327_s23 + $0x910] sm:$0xff] }
 0x137   : > { %2725 = vmatprep.subr.bf16.mxu0 %v2724_v2  ;;  %v1115_v2 = vld [vmem:[%s4327_s23 + $0x1910] sm:$0xff] }
 0x138   : > { %3235 = vmatpush1.bf16.xpose.msra.mxu1 %v3234_v1  ;;  %v619_v1 = vld [vmem:[%s4327_s23 + $0x990] sm:$0xff] }
 0x139   : > { %3237 = vmatprep.subr.bf16.mxu1 %v3236_v3  ;;  %v1131_v3 = vld [vmem:[%s4327_s23 + $0x1990] sm:$0xff]  ;;  %v2746_v8 = vpack.c.bf16 %v619_v1, %v603_v0  ;;  %v796_v0 = vld [vmem:[%s4327_s23 + $0xf18] sm:$0xff] }
 0x13a   : > { %v3258_v9 = vpack.c.bf16 %v1131_v3, %v1115_v2  ;;  %v812_v1 = vld [vmem:[%s4327_s23 + $0xf98] sm:$0xff] }
 0x13b   : > { %v1308_v2 = vld [vmem:[%s4327_s23 + $0x1f18] sm:$0xff]  ;;  %v2768_v6 = vpack.c.bf16 %v812_v1, %v796_v0  ;;  %v958_v0 = vld [vmem:[%s4327_s23 + $0x1428] sm:$0xff] }
 0x13c   : > { %v1324_v3 = vld [vmem:[%s4327_s23 + $0x1f98] sm:$0xff]  ;;  %v974_v1 = vld [vmem:[%s4327_s23 + $0x14a8] sm:$0xff] }
 0x13d   : > { %v3280_v7 = vpack.c.bf16 %v1324_v3, %v1308_v2 }
 0x13e   : > { %2727 = vmatpush1.bf16.xpose.msra.mxu0 %v2726_v12  ;;  %v635_v12 = vld [vmem:[%s4327_s23 + $0xa10] sm:$0xff] }
 0x13f   : > { %2729 = vmatprep.subr.bf16.mxu0 %v2728_v14  ;;  %v1147_v14 = vld [vmem:[%s4327_s23 + $0x1a10] sm:$0xff] }
 0x140   : > { %3239 = vmatpush1.bf16.xpose.msra.mxu1 %v3238_v13  ;;  %v651_v13 = vld [vmem:[%s4327_s23 + $0xa90] sm:$0xff] }
 0x141   : > { %3241 = vmatprep.subr.bf16.mxu1 %v3240_v15  ;;  %v1163_v15 = vld [vmem:[%s4327_s23 + $0x1a90] sm:$0xff]  ;;  %v2750_v20 = vpack.c.bf16 %v651_v13, %v635_v12  ;;  %v318_v12 = vld [vmem:[%s4327_s23 + $0x28] sm:$0xff] }
 0x142   : > { %v3262_v21 = vpack.c.bf16 %v1163_v15, %v1147_v14  ;;  %v334_v13 = vld [vmem:[%s4327_s23 + $0xa8] sm:$0xff] }
 0x143   : > { %v830_v14 = vld [vmem:[%s4327_s23 + $0x1028] sm:$0xff]  ;;  %v2772_v18 = vpack.c.bf16 %v334_v13, %v318_v12 }
 0x144   : > { %v846_v15 = vld [vmem:[%s4327_s23 + $0x10a8] sm:$0xff] }
 0x145   : > { %v3284_v19 = vpack.c.bf16 %v846_v15, %v830_v14  ;;  %v990_v12 = vld [vmem:[%s4327_s23 + $0x1528] sm:$0xff] }
 0x146   : > { %2731 = vmatpush1.bf16.xpose.msra.mxu0 %v2730_v24  ;;  %v667_v24 = vld [vmem:[%s4327_s23 + $0xb10] sm:$0xff]  ;;  %v1006_v13 = vld [vmem:[%s4327_s23 + $0x15a8] sm:$0xff] }
 0x147   : > { %2733 = vmatprep.subr.bf16.mxu0 %v2732_v26  ;;  %v1179_v26 = vld [vmem:[%s4327_s23 + $0x1b10] sm:$0xff] }
 0x148   : > { %3243 = vmatpush1.bf16.xpose.msra.mxu1 %v3242_v25  ;;  %v683_v25 = vld [vmem:[%s4327_s23 + $0xb90] sm:$0xff] }
 0x149   : > { %3245 = vmatprep.subr.bf16.mxu1 %v3244_v27  ;;  %v1195_v27 = vld [vmem:[%s4327_s23 + $0x1b90] sm:$0xff]  ;;  %v2754_v32 = vpack.c.bf16 %v683_v25, %v667_v24  ;;  %v350_v24 = vld [vmem:[%s4327_s23 + $0x128] sm:$0xff] }
 0x14a   : > { %v3266_v33 = vpack.c.bf16 %v1195_v27, %v1179_v26  ;;  %v366_v25 = vld [vmem:[%s4327_s23 + $0x1a8] sm:$0xff] }
 0x14b   : > { %v862_v26 = vld [vmem:[%s4327_s23 + $0x1128] sm:$0xff]  ;;  %v2776_v31 = vpack.c.bf16 %v366_v25, %v350_v24 }
 0x14c   : > { %v878_v27 = vld [vmem:[%s4327_s23 + $0x11a8] sm:$0xff] }
 0x14d   : > { %v1022_v24 = vld [vmem:[%s4327_s23 + $0x1628] sm:$0xff] }
 0x14e   : > { %2735 = vmatpush1.bf16.xpose.msra.mxu0 %v2734_v36  ;;  %v699_v36 = vld [vmem:[%s4327_s23 + $0xc10] sm:$0xff]  ;;  %v1038_v25 = vld [vmem:[%s4327_s23 + $0x16a8] sm:$0xff] }
 0x14f   : > { %2737 = vmatprep.subr.bf16.mxu0 %v2736_v38  ;;  %v1211_v38 = vld [vmem:[%s4327_s23 + $0x1c10] sm:$0xff] }
 0x150   : > { %3247 = vmatpush1.bf16.xpose.msra.mxu1 %v3246_v37  ;;  %v715_v37 = vld [vmem:[%s4327_s23 + $0xc90] sm:$0xff] }
 0x151   : > { %3249 = vmatprep.subr.bf16.mxu1 %v3248_v39  ;;  %v1227_v39 = vld [vmem:[%s4327_s23 + $0x1c90] sm:$0xff]  ;;  %v2758_v44 = vpack.c.bf16 %v715_v37, %v699_v36  ;;  %v861_v36 = vld [vmem:[%s4327_s23 + $0x1120] sm:$0xff] }
 0x152   : > { %v3270_v45 = vpack.c.bf16 %v1227_v39, %v1211_v38  ;;  %v877_v37 = vld [vmem:[%s4327_s23 + $0x11a0] sm:$0xff]  ;;  %v382_v38 = vld [vmem:[%s4327_s23 + $0x228] sm:$0xff] }
 0x153   : > { %v398_v39 = vld [vmem:[%s4327_s23 + $0x2a8] sm:$0xff]  ;;  %v3290_v43 = vpack.c.bf16 %v877_v37, %v861_v36 }
 0x154   : > { %v1054_v36 = vld [vmem:[%s4327_s23 + $0x1728] sm:$0xff] }
 0x155   : > { %v1070_v37 = vld [vmem:[%s4327_s23 + $0x17a8] sm:$0xff] }
 0x156   : > { %2739 = vmatpush1.bf16.xpose.msra.mxu0 %v2738_v48  ;;  %v731_v48 = vld [vmem:[%s4327_s23 + $0xd10] sm:$0xff] }
 0x157   : > { %2741 = vmatprep.subr.bf16.mxu0 %v2740_v50  ;;  %v1243_v50 = vld [vmem:[%s4327_s23 + $0x1d10] sm:$0xff] }
 0x158   : > { %3251 = vmatpush1.bf16.xpose.msra.mxu1 %v3250_v49  ;;  %v747_v49 = vld [vmem:[%s4327_s23 + $0xd90] sm:$0xff] }
 0x159   : > { %3253 = vmatprep.subr.bf16.mxu1 %v3252_v51  ;;  %v1259_v51 = vld [vmem:[%s4327_s23 + $0x1d90] sm:$0xff]  ;;  %v2762_v56 = vpack.c.bf16 %v747_v49, %v731_v48  ;;  %v893_v48 = vld [vmem:[%s4327_s23 + $0x1220] sm:$0xff] }
 0x15a   : > { %v3274_v57 = vpack.c.bf16 %v1259_v51, %v1243_v50  ;;  %v909_v49 = vld [vmem:[%s4327_s23 + $0x12a0] sm:$0xff]  ;;  %v414_v50 = vld [vmem:[%s4327_s23 + $0x328] sm:$0xff] }
 0x15b   : > { %v430_v51 = vld [vmem:[%s4327_s23 + $0x3a8] sm:$0xff]  ;;  %v3294_v55 = vpack.c.bf16 %v909_v49, %v893_v48 }
 0x15c   : > { %v1086_v48 = vld [vmem:[%s4327_s23 + $0x1828] sm:$0xff] }
 0x15d   : > { %v1102_v49 = vld [vmem:[%s4327_s23 + $0x18a8] sm:$0xff] }
 0x15e   : > { %2743 = vmatpush1.bf16.xpose.msra.mxu0 %v2742_v60  ;;  %v763_v60 = vld [vmem:[%s4327_s23 + $0xe10] sm:$0xff] }
 0x15f   : > { %2745 = vmatprep.subr.bf16.mxu0 %v2744_v62  ;;  %v1275_v62 = vld [vmem:[%s4327_s23 + $0x1e10] sm:$0xff] }
 0x160   : > { %3255 = vmatpush1.bf16.xpose.msra.mxu1 %v3254_v61  ;;  %v779_v61 = vld [vmem:[%s4327_s23 + $0xe90] sm:$0xff] }
 0x161   : > { %3257 = vmatprep.subr.bf16.mxu1 %v3256_v63  ;;  %v1291_v63 = vld [vmem:[%s4327_s23 + $0x1e90] sm:$0xff]  ;;  %v2766_v4 = vpack.c.bf16 %v779_v61, %v763_v60  ;;  %v925_v60 = vld [vmem:[%s4327_s23 + $0x1320] sm:$0xff] }
 0x162   : > { %v3278_v5 = vpack.c.bf16 %v1291_v63, %v1275_v62  ;;  %v941_v61 = vld [vmem:[%s4327_s23 + $0x13a0] sm:$0xff]  ;;  %v446_v62 = vld [vmem:[%s4327_s23 + $0x428] sm:$0xff] }
 0x163   : > { %v462_v63 = vld [vmem:[%s4327_s23 + $0x4a8] sm:$0xff]  ;;  %v3298_v3 = vpack.c.bf16 %v941_v61, %v925_v60 }
 0x164   : > { %v1118_v60 = vld [vmem:[%s4327_s23 + $0x1928] sm:$0xff] }
 0x165   : > { %v1134_v61 = vld [vmem:[%s4327_s23 + $0x19a8] sm:$0xff] }
 0x166   : > { %2747 = vmatpush1.bf16.xpose.msra.mxu0 %v2746_v8  ;;  %v795_v8 = vld [vmem:[%s4327_s23 + $0xf10] sm:$0xff] }
 0x167   : > { %2749 = vmatprep.subr.bf16.mxu0 %v2748_v10  ;;  %v1307_v10 = vld [vmem:[%s4327_s23 + $0x1f10] sm:$0xff] }
 0x168   : > { %3259 = vmatpush1.bf16.xpose.msra.mxu1 %v3258_v9  ;;  %v811_v9 = vld [vmem:[%s4327_s23 + $0xf90] sm:$0xff] }
 0x169   : > { %3261 = vmatprep.subr.bf16.mxu1 %v3260_v11  ;;  %v1323_v11 = vld [vmem:[%s4327_s23 + $0x1f90] sm:$0xff]  ;;  %v2770_v16 = vpack.c.bf16 %v811_v9, %v795_v8  ;;  %v957_v8 = vld [vmem:[%s4327_s23 + $0x1420] sm:$0xff] }
 0x16a   : > { %v3282_v17 = vpack.c.bf16 %v1323_v11, %v1307_v10  ;;  %v973_v9 = vld [vmem:[%s4327_s23 + $0x14a0] sm:$0xff]  ;;  %v478_v10 = vld [vmem:[%s4327_s23 + $0x528] sm:$0xff] }
 0x16b   : > { %v494_v11 = vld [vmem:[%s4327_s23 + $0x5a8] sm:$0xff]  ;;  %v3302_v15 = vpack.c.bf16 %v973_v9, %v957_v8 }
 0x16c   : > { %v1150_v8 = vld [vmem:[%s4327_s23 + $0x1a28] sm:$0xff] }
 0x16d   : > { %v1166_v9 = vld [vmem:[%s4327_s23 + $0x1aa8] sm:$0xff] }
 0x16e   : > { %2751 = vmatpush1.bf16.xpose.msra.mxu0 %v2750_v20  ;;  %v317_v20 = vld [vmem:[%s4327_s23 + $0x20] sm:$0xff] }
 0x16f   : > { %2753 = vmatprep.subr.bf16.mxu0 %v2752_v22  ;;  %v829_v22 = vld [vmem:[%s4327_s23 + $0x1020] sm:$0xff] }
 0x170   : > { %3263 = vmatpush1.bf16.xpose.msra.mxu1 %v3262_v21  ;;  %v333_v21 = vld [vmem:[%s4327_s23 + $0xa0] sm:$0xff] }
 0x171   : > { %3265 = vmatprep.subr.bf16.mxu1 %v3264_v23  ;;  %v845_v23 = vld [vmem:[%s4327_s23 + $0x10a0] sm:$0xff]  ;;  %v2774_v29 = vpack.c.bf16 %v333_v21, %v317_v20 }
 0x172   : > { %v3286_v30 = vpack.c.bf16 %v845_v23, %v829_v22  ;;  %v989_v20 = vld [vmem:[%s4327_s23 + $0x1520] sm:$0xff]  ;;  %v510_v22 = vld [vmem:[%s4327_s23 + $0x628] sm:$0xff] }
 0x173   : > { %v1005_v21 = vld [vmem:[%s4327_s23 + $0x15a0] sm:$0xff]  ;;  %v526_v23 = vld [vmem:[%s4327_s23 + $0x6a8] sm:$0xff] }
 0x176   : > { %2755 = vmatpush1.bf16.xpose.msra.mxu0 %v2754_v32  ;;  %v3288_v32 = vpack.c.bf16 %v878_v27, %v862_v26  ;;  %v3306_v27 = vpack.c.bf16 %v1005_v21, %v989_v20  ;;  %v1182_v20 = vld [vmem:[%s4327_s23 + $0x1b28] sm:$0xff] }
 0x177   : > { %2757 = vmatprep.subr.bf16.mxu0 %v2756_v34  ;;  %v349_v34 = vld [vmem:[%s4327_s23 + $0x120] sm:$0xff]  ;;  %v1198_v21 = vld [vmem:[%s4327_s23 + $0x1ba8] sm:$0xff] }
 0x178   : > { %3267 = vmatpush1.bf16.xpose.msra.mxu1 %v3266_v33  ;;  %v302_v33 = vld [vmem:[%s4402_s18 + $0x28] sm:$0xff] }
 0x179   : > { %3269 = vmatprep.subr.bf16.mxu1 %v3268_v35  ;;  %v365_v35 = vld [vmem:[%s4327_s23 + $0x1a0] sm:$0xff] }
 0x17a   : > { %v2778_v42 = vpack.c.bf16 %v365_v35, %v349_v34  ;;  %v542_v34 = vld [vmem:[%s4327_s23 + $0x728] sm:$0xff] }
 0x17b   : > { %v558_v35 = vld [vmem:[%s4327_s23 + $0x7a8] sm:$0xff] }
 0x17e   : > { %2759 = vmatpush1.bf16.xpose.msra.mxu0 %v2758_v44  ;;  %v2780_v44 = vpack.c.bf16 %v398_v39, %v382_v38 }
 0x17f   : > { %2761 = vmatprep.subr.bf16.mxu0 %v2760_v46  ;;  %v381_v46 = vld [vmem:[%s4327_s23 + $0x220] sm:$0xff] }
 0x180   : > { %3271 = vmatpush1.bf16.xpose.msra.mxu1 %v3270_v45  ;;  %v3292_v45 = vpack.c.bf16 %v910_v41, %v894_v40  ;;  %v2800_v40 = vpack.c.bf16 %v558_v35, %v542_v34  ;;  %v3312_v41 = vpack.c.bf16 %v1070_v37, %v1054_v36 }
 0x181   : > { %3273 = vmatprep.subr.bf16.mxu1 %v3272_v47  ;;  %v397_v47 = vld [vmem:[%s4327_s23 + $0x2a0] sm:$0xff] }
 0x182   : > { %v2782_v54 = vpack.c.bf16 %v397_v47, %v381_v46  ;;  %v574_v46 = vld [vmem:[%s4327_s23 + $0x828] sm:$0xff] }
 0x183   : > { %v590_v47 = vld [vmem:[%s4327_s23 + $0x8a8] sm:$0xff] }
 0x186   : > { %2763 = vmatpush1.bf16.xpose.msra.mxu0 %v2762_v56  ;;  %v2784_v56 = vpack.c.bf16 %v430_v51, %v414_v50 }
 0x187   : > { %2765 = vmatprep.subr.bf16.mxu0 %v2764_v58  ;;  %v413_v58 = vld [vmem:[%s4327_s23 + $0x320] sm:$0xff] }
 0x188   : > { %3275 = vmatpush1.bf16.xpose.msra.mxu1 %v3274_v57  ;;  %v3296_v57 = vpack.c.bf16 %v942_v53, %v926_v52  ;;  %v2804_v52 = vpack.c.bf16 %v590_v47, %v574_v46  ;;  %v3316_v53 = vpack.c.bf16 %v1102_v49, %v1086_v48 }
 0x189   : > { %3277 = vmatprep.subr.bf16.mxu1 %v3276_v59  ;;  %v429_v59 = vld [vmem:[%s4327_s23 + $0x3a0] sm:$0xff] }
 0x18a   : > { %v2786_v2 = vpack.c.bf16 %v429_v59, %v413_v58  ;;  %v606_v58 = vld [vmem:[%s4327_s23 + $0x928] sm:$0xff] }
 0x18b   : > { %v622_v59 = vld [vmem:[%s4327_s23 + $0x9a8] sm:$0xff] }
 0x18e   : > { %2767 = vmatpush1.bf16.xpose.msra.mxu0 %v2766_v4  ;;  %v2788_v4 = vpack.c.bf16 %v462_v63, %v446_v62 }
 0x18f   : > { %2769 = vmatprep.subr.bf16.mxu0 %v2768_v6  ;;  %v445_v6 = vld [vmem:[%s4327_s23 + $0x420] sm:$0xff] }
 0x190   : > { %3279 = vmatpush1.bf16.xpose.msra.mxu1 %v3278_v5  ;;  %v3300_v5 = vpack.c.bf16 %v974_v1, %v958_v0  ;;  %v2808_v0 = vpack.c.bf16 %v622_v59, %v606_v58  ;;  %v3320_v1 = vpack.c.bf16 %v1134_v61, %v1118_v60 }
 0x191   : > { %3281 = vmatprep.subr.bf16.mxu1 %v3280_v7  ;;  %v461_v7 = vld [vmem:[%s4327_s23 + $0x4a0] sm:$0xff] }
 0x192   : > { %v2790_v14 = vpack.c.bf16 %v461_v7, %v445_v6  ;;  %v638_v6 = vld [vmem:[%s4327_s23 + $0xa28] sm:$0xff] }
 0x193   : > { %v654_v7 = vld [vmem:[%s4327_s23 + $0xaa8] sm:$0xff] }
 0x196   : > { %2771 = vmatpush1.bf16.xpose.msra.mxu0 %v2770_v16  ;;  %v2792_v16 = vpack.c.bf16 %v494_v11, %v478_v10 }
 0x197   : > { %2773 = vmatprep.subr.bf16.mxu0 %v2772_v18  ;;  %v477_v18 = vld [vmem:[%s4327_s23 + $0x520] sm:$0xff] }
 0x198   : > { %3283 = vmatpush1.bf16.xpose.msra.mxu1 %v3282_v17  ;;  %v3304_v17 = vpack.c.bf16 %v1006_v13, %v990_v12  ;;  %v2812_v12 = vpack.c.bf16 %v654_v7, %v638_v6  ;;  %v3324_v13 = vpack.c.bf16 %v1166_v9, %v1150_v8 }
 0x199   : > { %3285 = vmatprep.subr.bf16.mxu1 %v3284_v19  ;;  %v493_v19 = vld [vmem:[%s4327_s23 + $0x5a0] sm:$0xff] }
 0x19a   : > { %v2794_v26 = vpack.c.bf16 %v493_v19, %v477_v18  ;;  %v670_v18 = vld [vmem:[%s4327_s23 + $0xb28] sm:$0xff] }
 0x19b   : > { %v686_v19 = vld [vmem:[%s4327_s23 + $0xba8] sm:$0xff] }
 0x19d   : > { %1473 = vmatmul.mubr.f32.vlgmr.msra.gmra.mrb[0].mxu0 %v299_v28 }
 0x19e   : > { %2775 = vmatpush1.bf16.xpose.msra.mxu0 %v2774_v29  ;;  %1543 = vmatprep.mubr.f32.mxu0 %v302_v33  ;;  %v3308_v29 = vpack.c.bf16 %v1038_v25, %v1022_v24  ;;  %v2816_v24 = vpack.c.bf16 %v686_v19, %v670_v18  ;;  %v3328_v25 = vpack.c.bf16 %v1198_v21, %v1182_v20 }
 0x19f   : > { %2041 = vmatmul.mubr.f32.vlgmr.msra.gmra.mrb[0].mxu1 %v299_v28  ;;  %2777 = vmatprep.subr.bf16.mxu0 %v2776_v31  ;;  %v2796_v28 = vpack.c.bf16 %v526_v23, %v510_v22  ;;  %v525_v31 = vld [vmem:[%s4327_s23 + $0x6a0] sm:$0xff] }
 0x1a0   : > { %3287 = vmatpush1.bf16.xpose.msra.mxu1 %v3286_v30  ;;  %2111 = vmatprep.mubr.f32.mxu1 %v302_v33  ;;  %v509_v30 = vld [vmem:[%s4327_s23 + $0x620] sm:$0xff] }
 0x1a1   : > { %3289 = vmatprep.subr.bf16.mxu1 %v3288_v32  ;;  %v1021_v32 = vld [vmem:[%s4327_s23 + $0x1620] sm:$0xff]  ;;  %v2798_v38 = vpack.c.bf16 %v525_v31, %v509_v30  ;;  %v702_v30 = vld [vmem:[%s4327_s23 + $0xc28] sm:$0xff] }
 0x1a2   : > { %v1037_v33 = vld [vmem:[%s4327_s23 + $0x16a0] sm:$0xff]  ;;  %v718_v31 = vld [vmem:[%s4327_s23 + $0xca8] sm:$0xff] }
 0x1a3   : > { %v3310_v39 = vpack.c.bf16 %v1037_v33, %v1021_v32  ;;  %v1214_v32 = vld [vmem:[%s4327_s23 + $0x1c28] sm:$0xff]  ;;  %v2820_v36 = vpack.c.bf16 %v718_v31, %v702_v30  ;;  %v301_v30 = vld [vmem:[%s4402_s18 + $0x20] sm:$0xff] }
 0x1a4   : > { %v1230_v33 = vld [vmem:[%s4327_s23 + $0x1ca8] sm:$0xff] }
 0x1a5   : > { %v3332_v37 = vpack.c.bf16 %v1230_v33, %v1214_v32 }
 0x1a6   : > { %2779 = vmatpush1.bf16.xpose.msra.mxu0 %v2778_v42  ;;  %v541_v42 = vld [vmem:[%s4327_s23 + $0x720] sm:$0xff] }
 0x1a7   : > { %2781 = vmatprep.subr.bf16.mxu0 %v2780_v44  ;;  %v1053_v44 = vld [vmem:[%s4327_s23 + $0x1720] sm:$0xff] }
 0x1a8   : > { %3291 = vmatpush1.bf16.xpose.msra.mxu1 %v3290_v43  ;;  %v557_v43 = vld [vmem:[%s4327_s23 + $0x7a0] sm:$0xff] }
 0x1a9   : > { %3293 = vmatprep.subr.bf16.mxu1 %v3292_v45  ;;  %v1069_v45 = vld [vmem:[%s4327_s23 + $0x17a0] sm:$0xff]  ;;  %v2802_v50 = vpack.c.bf16 %v557_v43, %v541_v42  ;;  %v734_v42 = vld [vmem:[%s4327_s23 + $0xd28] sm:$0xff] }
 0x1aa   : > { %v3314_v51 = vpack.c.bf16 %v1069_v45, %v1053_v44  ;;  %v750_v43 = vld [vmem:[%s4327_s23 + $0xda8] sm:$0xff] }
 0x1ab   : > { %v1246_v44 = vld [vmem:[%s4327_s23 + $0x1d28] sm:$0xff]  ;;  %v2824_v48 = vpack.c.bf16 %v750_v43, %v734_v42  ;;  %v896_v42 = vld [vmem:[%s4327_s23 + $0x1238] sm:$0xff] }
 0x1ac   : > { %v1262_v45 = vld [vmem:[%s4327_s23 + $0x1da8] sm:$0xff]  ;;  %v912_v43 = vld [vmem:[%s4327_s23 + $0x12b8] sm:$0xff] }
 0x1ad   : > { %v3336_v49 = vpack.c.bf16 %v1262_v45, %v1246_v44 }
 0x1ae   : > { %2783 = vmatpush1.bf16.xpose.msra.mxu0 %v2782_v54  ;;  %v573_v54 = vld [vmem:[%s4327_s23 + $0x820] sm:$0xff] }
 0x1af   : > { %2785 = vmatprep.subr.bf16.mxu0 %v2784_v56  ;;  %v1085_v56 = vld [vmem:[%s4327_s23 + $0x1820] sm:$0xff] }
 0x1b0   : > { %3295 = vmatpush1.bf16.xpose.msra.mxu1 %v3294_v55  ;;  %v589_v55 = vld [vmem:[%s4327_s23 + $0x8a0] sm:$0xff] }
 0x1b1   : > { %3297 = vmatprep.subr.bf16.mxu1 %v3296_v57  ;;  %v1101_v57 = vld [vmem:[%s4327_s23 + $0x18a0] sm:$0xff]  ;;  %v2806_v62 = vpack.c.bf16 %v589_v55, %v573_v54  ;;  %v766_v54 = vld [vmem:[%s4327_s23 + $0xe28] sm:$0xff] }
 0x1b2   : > { %v3318_v63 = vpack.c.bf16 %v1101_v57, %v1085_v56  ;;  %v782_v55 = vld [vmem:[%s4327_s23 + $0xea8] sm:$0xff] }
 0x1b3   : > { %v1278_v56 = vld [vmem:[%s4327_s23 + $0x1e28] sm:$0xff]  ;;  %v2828_v60 = vpack.c.bf16 %v782_v55, %v766_v54  ;;  %v928_v54 = vld [vmem:[%s4327_s23 + $0x1338] sm:$0xff] }
 0x1b4   : > { %v1294_v57 = vld [vmem:[%s4327_s23 + $0x1ea8] sm:$0xff]  ;;  %v944_v55 = vld [vmem:[%s4327_s23 + $0x13b8] sm:$0xff] }
 0x1b5   : > { %v3340_v61 = vpack.c.bf16 %v1294_v57, %v1278_v56 }
 0x1b6   : > { %2787 = vmatpush1.bf16.xpose.msra.mxu0 %v2786_v2  ;;  %v605_v2 = vld [vmem:[%s4327_s23 + $0x920] sm:$0xff] }
 0x1b7   : > { %2789 = vmatprep.subr.bf16.mxu0 %v2788_v4  ;;  %v1117_v4 = vld [vmem:[%s4327_s23 + $0x1920] sm:$0xff] }
 0x1b8   : > { %3299 = vmatpush1.bf16.xpose.msra.mxu1 %v3298_v3  ;;  %v621_v3 = vld [vmem:[%s4327_s23 + $0x9a0] sm:$0xff] }
 0x1b9   : > { %3301 = vmatprep.subr.bf16.mxu1 %v3300_v5  ;;  %v1133_v5 = vld [vmem:[%s4327_s23 + $0x19a0] sm:$0xff]  ;;  %v2810_v10 = vpack.c.bf16 %v621_v3, %v605_v2  ;;  %v798_v2 = vld [vmem:[%s4327_s23 + $0xf28] sm:$0xff] }
 0x1ba   : > { %v3322_v11 = vpack.c.bf16 %v1133_v5, %v1117_v4  ;;  %v814_v3 = vld [vmem:[%s4327_s23 + $0xfa8] sm:$0xff] }
 0x1bb   : > { %v1310_v4 = vld [vmem:[%s4327_s23 + $0x1f28] sm:$0xff]  ;;  %v2832_v8 = vpack.c.bf16 %v814_v3, %v798_v2  ;;  %v960_v2 = vld [vmem:[%s4327_s23 + $0x1438] sm:$0xff] }
 0x1bc   : > { %v1326_v5 = vld [vmem:[%s4327_s23 + $0x1fa8] sm:$0xff]  ;;  %v976_v3 = vld [vmem:[%s4327_s23 + $0x14b8] sm:$0xff] }
 0x1bd   : > { %v3344_v9 = vpack.c.bf16 %v1326_v5, %v1310_v4 }
 0x1be   : > { %2791 = vmatpush1.bf16.xpose.msra.mxu0 %v2790_v14  ;;  %v637_v14 = vld [vmem:[%s4327_s23 + $0xa20] sm:$0xff] }
 0x1bf   : > { %2793 = vmatprep.subr.bf16.mxu0 %v2792_v16  ;;  %v1149_v16 = vld [vmem:[%s4327_s23 + $0x1a20] sm:$0xff] }
 0x1c0   : > { %3303 = vmatpush1.bf16.xpose.msra.mxu1 %v3302_v15  ;;  %v653_v15 = vld [vmem:[%s4327_s23 + $0xaa0] sm:$0xff] }
 0x1c1   : > { %3305 = vmatprep.subr.bf16.mxu1 %v3304_v17  ;;  %v1165_v17 = vld [vmem:[%s4327_s23 + $0x1aa0] sm:$0xff]  ;;  %v2814_v22 = vpack.c.bf16 %v653_v15, %v637_v14  ;;  %v320_v14 = vld [vmem:[%s4327_s23 + $0x38] sm:$0xff] }
 0x1c2   : > { %v3326_v23 = vpack.c.bf16 %v1165_v17, %v1149_v16  ;;  %v336_v15 = vld [vmem:[%s4327_s23 + $0xb8] sm:$0xff] }
 0x1c3   : > { %v832_v16 = vld [vmem:[%s4327_s23 + $0x1038] sm:$0xff]  ;;  %v2836_v20 = vpack.c.bf16 %v336_v15, %v320_v14 }
 0x1c4   : > { %v848_v17 = vld [vmem:[%s4327_s23 + $0x10b8] sm:$0xff] }
 0x1c5   : > { %v3348_v21 = vpack.c.bf16 %v848_v17, %v832_v16  ;;  %v992_v14 = vld [vmem:[%s4327_s23 + $0x1538] sm:$0xff] }
 0x1c6   : > { %2795 = vmatpush1.bf16.xpose.msra.mxu0 %v2794_v26  ;;  %v669_v26 = vld [vmem:[%s4327_s23 + $0xb20] sm:$0xff]  ;;  %v1008_v15 = vld [vmem:[%s4327_s23 + $0x15b8] sm:$0xff] }
 0x1c7   : > { %2797 = vmatprep.subr.bf16.mxu0 %v2796_v28  ;;  %v1181_v28 = vld [vmem:[%s4327_s23 + $0x1b20] sm:$0xff] }
 0x1c8   : > { %3307 = vmatpush1.bf16.xpose.msra.mxu1 %v3306_v27  ;;  %v685_v27 = vld [vmem:[%s4327_s23 + $0xba0] sm:$0xff] }
 0x1c9   : > { %3309 = vmatprep.subr.bf16.mxu1 %v3308_v29  ;;  %v1197_v29 = vld [vmem:[%s4327_s23 + $0x1ba0] sm:$0xff]  ;;  %v2818_v34 = vpack.c.bf16 %v685_v27, %v669_v26  ;;  %v352_v26 = vld [vmem:[%s4327_s23 + $0x138] sm:$0xff] }
 0x1ca   : > { %v3330_v35 = vpack.c.bf16 %v1197_v29, %v1181_v28  ;;  %v368_v27 = vld [vmem:[%s4327_s23 + $0x1b8] sm:$0xff] }
 0x1cb   : > { %v864_v28 = vld [vmem:[%s4327_s23 + $0x1138] sm:$0xff]  ;;  %v2840_v33 = vpack.c.bf16 %v368_v27, %v352_v26 }
 0x1cc   : > { %v880_v29 = vld [vmem:[%s4327_s23 + $0x11b8] sm:$0xff] }
 0x1cd   : > { %v1024_v26 = vld [vmem:[%s4327_s23 + $0x1638] sm:$0xff] }
 0x1ce   : > { %2799 = vmatpush1.bf16.xpose.msra.mxu0 %v2798_v38  ;;  %v701_v38 = vld [vmem:[%s4327_s23 + $0xc20] sm:$0xff]  ;;  %v1040_v27 = vld [vmem:[%s4327_s23 + $0x16b8] sm:$0xff] }
 0x1cf   : > { %2801 = vmatprep.subr.bf16.mxu0 %v2800_v40  ;;  %v1213_v40 = vld [vmem:[%s4327_s23 + $0x1c20] sm:$0xff] }
 0x1d0   : > { %3311 = vmatpush1.bf16.xpose.msra.mxu1 %v3310_v39  ;;  %v717_v39 = vld [vmem:[%s4327_s23 + $0xca0] sm:$0xff] }
 0x1d1   : > { %3313 = vmatprep.subr.bf16.mxu1 %v3312_v41  ;;  %v1229_v41 = vld [vmem:[%s4327_s23 + $0x1ca0] sm:$0xff]  ;;  %v2822_v46 = vpack.c.bf16 %v717_v39, %v701_v38  ;;  %v863_v38 = vld [vmem:[%s4327_s23 + $0x1130] sm:$0xff] }
 0x1d2   : > { %v3334_v47 = vpack.c.bf16 %v1229_v41, %v1213_v40  ;;  %v879_v39 = vld [vmem:[%s4327_s23 + $0x11b0] sm:$0xff]  ;;  %v384_v40 = vld [vmem:[%s4327_s23 + $0x238] sm:$0xff] }
 0x1d3   : > { %v400_v41 = vld [vmem:[%s4327_s23 + $0x2b8] sm:$0xff]  ;;  %v3354_v45 = vpack.c.bf16 %v879_v39, %v863_v38 }
 0x1d4   : > { %v1056_v38 = vld [vmem:[%s4327_s23 + $0x1738] sm:$0xff] }
 0x1d5   : > { %v1072_v39 = vld [vmem:[%s4327_s23 + $0x17b8] sm:$0xff] }
 0x1d6   : > { %2803 = vmatpush1.bf16.xpose.msra.mxu0 %v2802_v50  ;;  %v733_v50 = vld [vmem:[%s4327_s23 + $0xd20] sm:$0xff] }
 0x1d7   : > { %2805 = vmatprep.subr.bf16.mxu0 %v2804_v52  ;;  %v1245_v52 = vld [vmem:[%s4327_s23 + $0x1d20] sm:$0xff] }
 0x1d8   : > { %3315 = vmatpush1.bf16.xpose.msra.mxu1 %v3314_v51  ;;  %v749_v51 = vld [vmem:[%s4327_s23 + $0xda0] sm:$0xff] }
 0x1d9   : > { %3317 = vmatprep.subr.bf16.mxu1 %v3316_v53  ;;  %v1261_v53 = vld [vmem:[%s4327_s23 + $0x1da0] sm:$0xff]  ;;  %v2826_v58 = vpack.c.bf16 %v749_v51, %v733_v50  ;;  %v895_v50 = vld [vmem:[%s4327_s23 + $0x1230] sm:$0xff] }
 0x1da   : > { %v3338_v59 = vpack.c.bf16 %v1261_v53, %v1245_v52  ;;  %v911_v51 = vld [vmem:[%s4327_s23 + $0x12b0] sm:$0xff]  ;;  %v416_v52 = vld [vmem:[%s4327_s23 + $0x338] sm:$0xff] }
 0x1db   : > { %v432_v53 = vld [vmem:[%s4327_s23 + $0x3b8] sm:$0xff]  ;;  %v3358_v57 = vpack.c.bf16 %v911_v51, %v895_v50 }
 0x1dc   : > { %v1088_v50 = vld [vmem:[%s4327_s23 + $0x1838] sm:$0xff] }
 0x1dd   : > { %v1104_v51 = vld [vmem:[%s4327_s23 + $0x18b8] sm:$0xff] }
 0x1de   : > { %2807 = vmatpush1.bf16.xpose.msra.mxu0 %v2806_v62  ;;  %v765_v62 = vld [vmem:[%s4327_s23 + $0xe20] sm:$0xff] }
 0x1df   : > { %2809 = vmatprep.subr.bf16.mxu0 %v2808_v0  ;;  %v1277_v0 = vld [vmem:[%s4327_s23 + $0x1e20] sm:$0xff] }
 0x1e0   : > { %3319 = vmatpush1.bf16.xpose.msra.mxu1 %v3318_v63  ;;  %v781_v63 = vld [vmem:[%s4327_s23 + $0xea0] sm:$0xff] }
 0x1e1   : > { %3321 = vmatprep.subr.bf16.mxu1 %v3320_v1  ;;  %v1293_v1 = vld [vmem:[%s4327_s23 + $0x1ea0] sm:$0xff]  ;;  %v2830_v6 = vpack.c.bf16 %v781_v63, %v765_v62  ;;  %v927_v62 = vld [vmem:[%s4327_s23 + $0x1330] sm:$0xff] }
 0x1e2   : > { %v3342_v7 = vpack.c.bf16 %v1293_v1, %v1277_v0  ;;  %v943_v63 = vld [vmem:[%s4327_s23 + $0x13b0] sm:$0xff]  ;;  %v448_v0 = vld [vmem:[%s4327_s23 + $0x438] sm:$0xff] }
 0x1e3   : > { %v464_v1 = vld [vmem:[%s4327_s23 + $0x4b8] sm:$0xff]  ;;  %v3362_v5 = vpack.c.bf16 %v943_v63, %v927_v62 }
 0x1e4   : > { %v1120_v62 = vld [vmem:[%s4327_s23 + $0x1938] sm:$0xff] }
 0x1e5   : > { %v1136_v63 = vld [vmem:[%s4327_s23 + $0x19b8] sm:$0xff] }
 0x1e6   : > { %2811 = vmatpush1.bf16.xpose.msra.mxu0 %v2810_v10  ;;  %v797_v10 = vld [vmem:[%s4327_s23 + $0xf20] sm:$0xff] }
 0x1e7   : > { %2813 = vmatprep.subr.bf16.mxu0 %v2812_v12  ;;  %v1309_v12 = vld [vmem:[%s4327_s23 + $0x1f20] sm:$0xff] }
 0x1e8   : > { %3323 = vmatpush1.bf16.xpose.msra.mxu1 %v3322_v11  ;;  %v813_v11 = vld [vmem:[%s4327_s23 + $0xfa0] sm:$0xff] }
 0x1e9   : > { %3325 = vmatprep.subr.bf16.mxu1 %v3324_v13  ;;  %v1325_v13 = vld [vmem:[%s4327_s23 + $0x1fa0] sm:$0xff]  ;;  %v2834_v18 = vpack.c.bf16 %v813_v11, %v797_v10  ;;  %v959_v10 = vld [vmem:[%s4327_s23 + $0x1430] sm:$0xff] }
 0x1ea   : > { %v3346_v19 = vpack.c.bf16 %v1325_v13, %v1309_v12  ;;  %v975_v11 = vld [vmem:[%s4327_s23 + $0x14b0] sm:$0xff]  ;;  %v480_v12 = vld [vmem:[%s4327_s23 + $0x538] sm:$0xff] }
 0x1eb   : > { %v496_v13 = vld [vmem:[%s4327_s23 + $0x5b8] sm:$0xff]  ;;  %v3366_v17 = vpack.c.bf16 %v975_v11, %v959_v10 }
 0x1ec   : > { %v1152_v10 = vld [vmem:[%s4327_s23 + $0x1a38] sm:$0xff] }
 0x1ed   : > { %v1168_v11 = vld [vmem:[%s4327_s23 + $0x1ab8] sm:$0xff] }
 0x1ee   : > { %2815 = vmatpush1.bf16.xpose.msra.mxu0 %v2814_v22  ;;  %v319_v22 = vld [vmem:[%s4327_s23 + $0x30] sm:$0xff] }
 0x1ef   : > { %2817 = vmatprep.subr.bf16.mxu0 %v2816_v24  ;;  %v831_v24 = vld [vmem:[%s4327_s23 + $0x1030] sm:$0xff] }
 0x1f0   : > { %3327 = vmatpush1.bf16.xpose.msra.mxu1 %v3326_v23  ;;  %v335_v23 = vld [vmem:[%s4327_s23 + $0xb0] sm:$0xff] }
 0x1f1   : > { %3329 = vmatprep.subr.bf16.mxu1 %v3328_v25  ;;  %v847_v25 = vld [vmem:[%s4327_s23 + $0x10b0] sm:$0xff]  ;;  %v2838_v31 = vpack.c.bf16 %v335_v23, %v319_v22 }
 0x1f2   : > { %v3350_v32 = vpack.c.bf16 %v847_v25, %v831_v24  ;;  %v991_v22 = vld [vmem:[%s4327_s23 + $0x1530] sm:$0xff]  ;;  %v512_v24 = vld [vmem:[%s4327_s23 + $0x638] sm:$0xff] }
 0x1f3   : > { %v1007_v23 = vld [vmem:[%s4327_s23 + $0x15b0] sm:$0xff]  ;;  %v528_v25 = vld [vmem:[%s4327_s23 + $0x6b8] sm:$0xff] }
 0x1f6   : > { %2819 = vmatpush1.bf16.xpose.msra.mxu0 %v2818_v34  ;;  %v3352_v34 = vpack.c.bf16 %v880_v29, %v864_v28  ;;  %v3370_v29 = vpack.c.bf16 %v1007_v23, %v991_v22  ;;  %v1184_v22 = vld [vmem:[%s4327_s23 + $0x1b38] sm:$0xff] }
 0x1f7   : > { %2821 = vmatprep.subr.bf16.mxu0 %v2820_v36  ;;  %v351_v36 = vld [vmem:[%s4327_s23 + $0x130] sm:$0xff]  ;;  %v1200_v23 = vld [vmem:[%s4327_s23 + $0x1bb8] sm:$0xff] }
 0x1f8   : > { %3331 = vmatpush1.bf16.xpose.msra.mxu1 %v3330_v35  ;;  %v304_v35 = vld [vmem:[%s4402_s18 + $0x38] sm:$0xff] }
 0x1f9   : > { %3333 = vmatprep.subr.bf16.mxu1 %v3332_v37  ;;  %v367_v37 = vld [vmem:[%s4327_s23 + $0x1b0] sm:$0xff] }
 0x1fa   : > { %v2842_v44 = vpack.c.bf16 %v367_v37, %v351_v36  ;;  %v544_v36 = vld [vmem:[%s4327_s23 + $0x738] sm:$0xff] }
 0x1fb   : > { %v560_v37 = vld [vmem:[%s4327_s23 + $0x7b8] sm:$0xff] }
 0x1fe   : > { %2823 = vmatpush1.bf16.xpose.msra.mxu0 %v2822_v46  ;;  %v2844_v46 = vpack.c.bf16 %v400_v41, %v384_v40 }
 0x1ff   : > { %2825 = vmatprep.subr.bf16.mxu0 %v2824_v48  ;;  %v383_v48 = vld [vmem:[%s4327_s23 + $0x230] sm:$0xff] }
 0x200   : > { %3335 = vmatpush1.bf16.xpose.msra.mxu1 %v3334_v47  ;;  %v3356_v47 = vpack.c.bf16 %v912_v43, %v896_v42  ;;  %v2864_v42 = vpack.c.bf16 %v560_v37, %v544_v36  ;;  %v3376_v43 = vpack.c.bf16 %v1072_v39, %v1056_v38 }
 0x201   : > { %3337 = vmatprep.subr.bf16.mxu1 %v3336_v49  ;;  %v399_v49 = vld [vmem:[%s4327_s23 + $0x2b0] sm:$0xff] }
 0x202   : > { %v2846_v56 = vpack.c.bf16 %v399_v49, %v383_v48  ;;  %v576_v48 = vld [vmem:[%s4327_s23 + $0x838] sm:$0xff] }
 0x203   : > { %v592_v49 = vld [vmem:[%s4327_s23 + $0x8b8] sm:$0xff] }
 0x206   : > { %2827 = vmatpush1.bf16.xpose.msra.mxu0 %v2826_v58  ;;  %v2848_v58 = vpack.c.bf16 %v432_v53, %v416_v52 }
 0x207   : > { %2829 = vmatprep.subr.bf16.mxu0 %v2828_v60  ;;  %v415_v60 = vld [vmem:[%s4327_s23 + $0x330] sm:$0xff] }
 0x208   : > { %3339 = vmatpush1.bf16.xpose.msra.mxu1 %v3338_v59  ;;  %v3360_v59 = vpack.c.bf16 %v944_v55, %v928_v54  ;;  %v2868_v54 = vpack.c.bf16 %v592_v49, %v576_v48  ;;  %v3380_v55 = vpack.c.bf16 %v1104_v51, %v1088_v50 }
 0x209   : > { %3341 = vmatprep.subr.bf16.mxu1 %v3340_v61  ;;  %v431_v61 = vld [vmem:[%s4327_s23 + $0x3b0] sm:$0xff] }
 0x20a   : > { %v2850_v4 = vpack.c.bf16 %v431_v61, %v415_v60  ;;  %v608_v60 = vld [vmem:[%s4327_s23 + $0x938] sm:$0xff] }
 0x20b   : > { %v624_v61 = vld [vmem:[%s4327_s23 + $0x9b8] sm:$0xff] }
 0x20e   : > { %2831 = vmatpush1.bf16.xpose.msra.mxu0 %v2830_v6  ;;  %v2852_v6 = vpack.c.bf16 %v464_v1, %v448_v0 }
 0x20f   : > { %2833 = vmatprep.subr.bf16.mxu0 %v2832_v8  ;;  %v447_v8 = vld [vmem:[%s4327_s23 + $0x430] sm:$0xff] }
 0x210   : > { %3343 = vmatpush1.bf16.xpose.msra.mxu1 %v3342_v7  ;;  %v3364_v7 = vpack.c.bf16 %v976_v3, %v960_v2  ;;  %v2872_v2 = vpack.c.bf16 %v624_v61, %v608_v60  ;;  %v3384_v3 = vpack.c.bf16 %v1136_v63, %v1120_v62 }
 0x211   : > { %3345 = vmatprep.subr.bf16.mxu1 %v3344_v9  ;;  %v463_v9 = vld [vmem:[%s4327_s23 + $0x4b0] sm:$0xff] }
 0x212   : > { %v2854_v16 = vpack.c.bf16 %v463_v9, %v447_v8  ;;  %v640_v8 = vld [vmem:[%s4327_s23 + $0xa38] sm:$0xff] }
 0x213   : > { %v656_v9 = vld [vmem:[%s4327_s23 + $0xab8] sm:$0xff] }
 0x216   : > { %2835 = vmatpush1.bf16.xpose.msra.mxu0 %v2834_v18  ;;  %v2856_v18 = vpack.c.bf16 %v496_v13, %v480_v12 }
 0x217   : > { %2837 = vmatprep.subr.bf16.mxu0 %v2836_v20  ;;  %v479_v20 = vld [vmem:[%s4327_s23 + $0x530] sm:$0xff] }
 0x218   : > { %3347 = vmatpush1.bf16.xpose.msra.mxu1 %v3346_v19  ;;  %v3368_v19 = vpack.c.bf16 %v1008_v15, %v992_v14  ;;  %v2876_v14 = vpack.c.bf16 %v656_v9, %v640_v8  ;;  %v3388_v15 = vpack.c.bf16 %v1168_v11, %v1152_v10 }
 0x219   : > { %3349 = vmatprep.subr.bf16.mxu1 %v3348_v21  ;;  %v495_v21 = vld [vmem:[%s4327_s23 + $0x5b0] sm:$0xff] }
 0x21a   : > { %v2858_v28 = vpack.c.bf16 %v495_v21, %v479_v20  ;;  %v672_v20 = vld [vmem:[%s4327_s23 + $0xb38] sm:$0xff] }
 0x21b   : > { %v688_v21 = vld [vmem:[%s4327_s23 + $0xbb8] sm:$0xff] }
 0x21d   : > { %1544 = vmatmul.mubr.f32.vlgmr.msra.gmra.mrb[0].mxu0 %v301_v30 }
 0x21e   : > { %2839 = vmatpush1.bf16.xpose.msra.mxu0 %v2838_v31  ;;  %1614 = vmatprep.mubr.f32.mxu0 %v304_v35  ;;  %v3372_v31 = vpack.c.bf16 %v1040_v27, %v1024_v26  ;;  %v2880_v26 = vpack.c.bf16 %v688_v21, %v672_v20  ;;  %v3392_v27 = vpack.c.bf16 %v1200_v23, %v1184_v22 }
 0x21f   : > { %2112 = vmatmul.mubr.f32.vlgmr.msra.gmra.mrb[0].mxu1 %v301_v30  ;;  %2841 = vmatprep.subr.bf16.mxu0 %v2840_v33  ;;  %v2860_v30 = vpack.c.bf16 %v528_v25, %v512_v24  ;;  %v527_v33 = vld [vmem:[%s4327_s23 + $0x6b0] sm:$0xff] }
 0x220   : > { %3351 = vmatpush1.bf16.xpose.msra.mxu1 %v3350_v32  ;;  %2182 = vmatprep.mubr.f32.mxu1 %v304_v35  ;;  %v511_v32 = vld [vmem:[%s4327_s23 + $0x630] sm:$0xff] }
 0x221   : > { %3353 = vmatprep.subr.bf16.mxu1 %v3352_v34  ;;  %v1023_v34 = vld [vmem:[%s4327_s23 + $0x1630] sm:$0xff]  ;;  %v2862_v40 = vpack.c.bf16 %v527_v33, %v511_v32  ;;  %v704_v32 = vld [vmem:[%s4327_s23 + $0xc38] sm:$0xff] }
 0x222   : > { %v1039_v35 = vld [vmem:[%s4327_s23 + $0x16b0] sm:$0xff]  ;;  %v720_v33 = vld [vmem:[%s4327_s23 + $0xcb8] sm:$0xff] }
 0x223   : > { %v3374_v41 = vpack.c.bf16 %v1039_v35, %v1023_v34  ;;  %v1216_v34 = vld [vmem:[%s4327_s23 + $0x1c38] sm:$0xff]  ;;  %v2884_v38 = vpack.c.bf16 %v720_v33, %v704_v32  ;;  %v303_v32 = vld [vmem:[%s4402_s18 + $0x30] sm:$0xff] }
 0x224   : > { %v1232_v35 = vld [vmem:[%s4327_s23 + $0x1cb8] sm:$0xff] }
 0x225   : > { %v3396_v39 = vpack.c.bf16 %v1232_v35, %v1216_v34 }
 0x226   : > { %2843 = vmatpush1.bf16.xpose.msra.mxu0 %v2842_v44  ;;  %v543_v44 = vld [vmem:[%s4327_s23 + $0x730] sm:$0xff] }
 0x227   : > { %2845 = vmatprep.subr.bf16.mxu0 %v2844_v46  ;;  %v1055_v46 = vld [vmem:[%s4327_s23 + $0x1730] sm:$0xff] }
 0x228   : > { %3355 = vmatpush1.bf16.xpose.msra.mxu1 %v3354_v45  ;;  %v559_v45 = vld [vmem:[%s4327_s23 + $0x7b0] sm:$0xff] }
 0x229   : > { %3357 = vmatprep.subr.bf16.mxu1 %v3356_v47  ;;  %v1071_v47 = vld [vmem:[%s4327_s23 + $0x17b0] sm:$0xff]  ;;  %v2866_v52 = vpack.c.bf16 %v559_v45, %v543_v44  ;;  %v736_v44 = vld [vmem:[%s4327_s23 + $0xd38] sm:$0xff] }
 0x22a   : > { %v3378_v53 = vpack.c.bf16 %v1071_v47, %v1055_v46  ;;  %v752_v45 = vld [vmem:[%s4327_s23 + $0xdb8] sm:$0xff] }
 0x22b   : > { %v1248_v46 = vld [vmem:[%s4327_s23 + $0x1d38] sm:$0xff]  ;;  %v2888_v50 = vpack.c.bf16 %v752_v45, %v736_v44  ;;  %v898_v44 = vld [vmem:[%s4327_s23 + $0x1248] sm:$0xff] }
 0x22c   : > { %v1264_v47 = vld [vmem:[%s4327_s23 + $0x1db8] sm:$0xff]  ;;  %v914_v45 = vld [vmem:[%s4327_s23 + $0x12c8] sm:$0xff] }
 0x22d   : > { %v3400_v51 = vpack.c.bf16 %v1264_v47, %v1248_v46 }
 0x22e   : > { %2847 = vmatpush1.bf16.xpose.msra.mxu0 %v2846_v56  ;;  %v575_v56 = vld [vmem:[%s4327_s23 + $0x830] sm:$0xff] }
 0x22f   : > { %2849 = vmatprep.subr.bf16.mxu0 %v2848_v58  ;;  %v1087_v58 = vld [vmem:[%s4327_s23 + $0x1830] sm:$0xff] }
 0x230   : > { %3359 = vmatpush1.bf16.xpose.msra.mxu1 %v3358_v57  ;;  %v591_v57 = vld [vmem:[%s4327_s23 + $0x8b0] sm:$0xff] }
 0x231   : > { %3361 = vmatprep.subr.bf16.mxu1 %v3360_v59  ;;  %v1103_v59 = vld [vmem:[%s4327_s23 + $0x18b0] sm:$0xff]  ;;  %v2870_v0 = vpack.c.bf16 %v591_v57, %v575_v56  ;;  %v768_v56 = vld [vmem:[%s4327_s23 + $0xe38] sm:$0xff] }
 0x232   : > { %v3382_v1 = vpack.c.bf16 %v1103_v59, %v1087_v58  ;;  %v784_v57 = vld [vmem:[%s4327_s23 + $0xeb8] sm:$0xff] }
 0x233   : > { %v1280_v58 = vld [vmem:[%s4327_s23 + $0x1e38] sm:$0xff]  ;;  %v2892_v62 = vpack.c.bf16 %v784_v57, %v768_v56  ;;  %v930_v56 = vld [vmem:[%s4327_s23 + $0x1348] sm:$0xff] }
 0x234   : > { %v1296_v59 = vld [vmem:[%s4327_s23 + $0x1eb8] sm:$0xff]  ;;  %v946_v57 = vld [vmem:[%s4327_s23 + $0x13c8] sm:$0xff] }
 0x235   : > { %v3404_v63 = vpack.c.bf16 %v1296_v59, %v1280_v58 }
 0x236   : > { %2851 = vmatpush1.bf16.xpose.msra.mxu0 %v2850_v4  ;;  %v607_v4 = vld [vmem:[%s4327_s23 + $0x930] sm:$0xff] }
 0x237   : > { %2853 = vmatprep.subr.bf16.mxu0 %v2852_v6  ;;  %v1119_v6 = vld [vmem:[%s4327_s23 + $0x1930] sm:$0xff] }
 0x238   : > { %3363 = vmatpush1.bf16.xpose.msra.mxu1 %v3362_v5  ;;  %v623_v5 = vld [vmem:[%s4327_s23 + $0x9b0] sm:$0xff] }
 0x239   : > { %3365 = vmatprep.subr.bf16.mxu1 %v3364_v7  ;;  %v1135_v7 = vld [vmem:[%s4327_s23 + $0x19b0] sm:$0xff]  ;;  %v2874_v12 = vpack.c.bf16 %v623_v5, %v607_v4  ;;  %v800_v4 = vld [vmem:[%s4327_s23 + $0xf38] sm:$0xff] }
 0x23a   : > { %v3386_v13 = vpack.c.bf16 %v1135_v7, %v1119_v6  ;;  %v816_v5 = vld [vmem:[%s4327_s23 + $0xfb8] sm:$0xff] }
 0x23b   : > { %v1312_v6 = vld [vmem:[%s4327_s23 + $0x1f38] sm:$0xff]  ;;  %v2896_v10 = vpack.c.bf16 %v816_v5, %v800_v4  ;;  %v962_v4 = vld [vmem:[%s4327_s23 + $0x1448] sm:$0xff] }
 0x23c   : > { %v1328_v7 = vld [vmem:[%s4327_s23 + $0x1fb8] sm:$0xff]  ;;  %v978_v5 = vld [vmem:[%s4327_s23 + $0x14c8] sm:$0xff] }
 0x23d   : > { %v3408_v11 = vpack.c.bf16 %v1328_v7, %v1312_v6 }
 0x23e   : > { %2855 = vmatpush1.bf16.xpose.msra.mxu0 %v2854_v16  ;;  %v639_v16 = vld [vmem:[%s4327_s23 + $0xa30] sm:$0xff] }
 0x23f   : > { %2857 = vmatprep.subr.bf16.mxu0 %v2856_v18  ;;  %v1151_v18 = vld [vmem:[%s4327_s23 + $0x1a30] sm:$0xff] }
 0x240   : > { %3367 = vmatpush1.bf16.xpose.msra.mxu1 %v3366_v17  ;;  %v655_v17 = vld [vmem:[%s4327_s23 + $0xab0] sm:$0xff] }
 0x241   : > { %3369 = vmatprep.subr.bf16.mxu1 %v3368_v19  ;;  %v1167_v19 = vld [vmem:[%s4327_s23 + $0x1ab0] sm:$0xff]  ;;  %v2878_v24 = vpack.c.bf16 %v655_v17, %v639_v16  ;;  %v322_v16 = vld [vmem:[%s4327_s23 + $0x48] sm:$0xff] }
 0x242   : > { %v3390_v25 = vpack.c.bf16 %v1167_v19, %v1151_v18  ;;  %v338_v17 = vld [vmem:[%s4327_s23 + $0xc8] sm:$0xff] }
 0x243   : > { %v834_v18 = vld [vmem:[%s4327_s23 + $0x1048] sm:$0xff]  ;;  %v2900_v22 = vpack.c.bf16 %v338_v17, %v322_v16 }
 0x244   : > { %v850_v19 = vld [vmem:[%s4327_s23 + $0x10c8] sm:$0xff] }
 0x245   : > { %v3412_v23 = vpack.c.bf16 %v850_v19, %v834_v18  ;;  %v994_v16 = vld [vmem:[%s4327_s23 + $0x1548] sm:$0xff] }
 0x246   : > { %2859 = vmatpush1.bf16.xpose.msra.mxu0 %v2858_v28  ;;  %v671_v28 = vld [vmem:[%s4327_s23 + $0xb30] sm:$0xff]  ;;  %v1010_v17 = vld [vmem:[%s4327_s23 + $0x15c8] sm:$0xff] }
 0x247   : > { %2861 = vmatprep.subr.bf16.mxu0 %v2860_v30  ;;  %v1183_v30 = vld [vmem:[%s4327_s23 + $0x1b30] sm:$0xff] }
 0x248   : > { %3371 = vmatpush1.bf16.xpose.msra.mxu1 %v3370_v29  ;;  %v687_v29 = vld [vmem:[%s4327_s23 + $0xbb0] sm:$0xff] }
 0x249   : > { %3373 = vmatprep.subr.bf16.mxu1 %v3372_v31  ;;  %v1199_v31 = vld [vmem:[%s4327_s23 + $0x1bb0] sm:$0xff]  ;;  %v2882_v36 = vpack.c.bf16 %v687_v29, %v671_v28  ;;  %v354_v28 = vld [vmem:[%s4327_s23 + $0x148] sm:$0xff] }
 0x24a   : > { %v3394_v37 = vpack.c.bf16 %v1199_v31, %v1183_v30  ;;  %v370_v29 = vld [vmem:[%s4327_s23 + $0x1c8] sm:$0xff] }
 0x24b   : > { %v866_v30 = vld [vmem:[%s4327_s23 + $0x1148] sm:$0xff]  ;;  %v2904_v35 = vpack.c.bf16 %v370_v29, %v354_v28 }
 0x24c   : > { %v882_v31 = vld [vmem:[%s4327_s23 + $0x11c8] sm:$0xff] }
 0x24d   : > { %v1026_v28 = vld [vmem:[%s4327_s23 + $0x1648] sm:$0xff] }
 0x24e   : > { %2863 = vmatpush1.bf16.xpose.msra.mxu0 %v2862_v40  ;;  %v703_v40 = vld [vmem:[%s4327_s23 + $0xc30] sm:$0xff]  ;;  %v1042_v29 = vld [vmem:[%s4327_s23 + $0x16c8] sm:$0xff] }
 0x24f   : > { %2865 = vmatprep.subr.bf16.mxu0 %v2864_v42  ;;  %v1215_v42 = vld [vmem:[%s4327_s23 + $0x1c30] sm:$0xff] }
 0x250   : > { %3375 = vmatpush1.bf16.xpose.msra.mxu1 %v3374_v41  ;;  %v719_v41 = vld [vmem:[%s4327_s23 + $0xcb0] sm:$0xff] }
 0x251   : > { %3377 = vmatprep.subr.bf16.mxu1 %v3376_v43  ;;  %v1231_v43 = vld [vmem:[%s4327_s23 + $0x1cb0] sm:$0xff]  ;;  %v2886_v48 = vpack.c.bf16 %v719_v41, %v703_v40  ;;  %v865_v40 = vld [vmem:[%s4327_s23 + $0x1140] sm:$0xff] }
 0x252   : > { %v3398_v49 = vpack.c.bf16 %v1231_v43, %v1215_v42  ;;  %v881_v41 = vld [vmem:[%s4327_s23 + $0x11c0] sm:$0xff]  ;;  %v386_v42 = vld [vmem:[%s4327_s23 + $0x248] sm:$0xff] }
 0x253   : > { %v402_v43 = vld [vmem:[%s4327_s23 + $0x2c8] sm:$0xff]  ;;  %v3418_v47 = vpack.c.bf16 %v881_v41, %v865_v40 }
 0x254   : > { %v1058_v40 = vld [vmem:[%s4327_s23 + $0x1748] sm:$0xff] }
 0x255   : > { %v1074_v41 = vld [vmem:[%s4327_s23 + $0x17c8] sm:$0xff] }
 0x256   : > { %2867 = vmatpush1.bf16.xpose.msra.mxu0 %v2866_v52  ;;  %v735_v52 = vld [vmem:[%s4327_s23 + $0xd30] sm:$0xff] }
 0x257   : > { %2869 = vmatprep.subr.bf16.mxu0 %v2868_v54  ;;  %v1247_v54 = vld [vmem:[%s4327_s23 + $0x1d30] sm:$0xff] }
 0x258   : > { %3379 = vmatpush1.bf16.xpose.msra.mxu1 %v3378_v53  ;;  %v751_v53 = vld [vmem:[%s4327_s23 + $0xdb0] sm:$0xff] }
 0x259   : > { %3381 = vmatprep.subr.bf16.mxu1 %v3380_v55  ;;  %v1263_v55 = vld [vmem:[%s4327_s23 + $0x1db0] sm:$0xff]  ;;  %v2890_v60 = vpack.c.bf16 %v751_v53, %v735_v52  ;;  %v897_v52 = vld [vmem:[%s4327_s23 + $0x1240] sm:$0xff] }
 0x25a   : > { %v3402_v61 = vpack.c.bf16 %v1263_v55, %v1247_v54  ;;  %v913_v53 = vld [vmem:[%s4327_s23 + $0x12c0] sm:$0xff]  ;;  %v418_v54 = vld [vmem:[%s4327_s23 + $0x348] sm:$0xff] }
 0x25b   : > { %v434_v55 = vld [vmem:[%s4327_s23 + $0x3c8] sm:$0xff]  ;;  %v3422_v59 = vpack.c.bf16 %v913_v53, %v897_v52 }
 0x25c   : > { %v1090_v52 = vld [vmem:[%s4327_s23 + $0x1848] sm:$0xff] }
 0x25d   : > { %v1106_v53 = vld [vmem:[%s4327_s23 + $0x18c8] sm:$0xff] }
 0x25e   : > { %2871 = vmatpush1.bf16.xpose.msra.mxu0 %v2870_v0  ;;  %v767_v0 = vld [vmem:[%s4327_s23 + $0xe30] sm:$0xff] }
 0x25f   : > { %2873 = vmatprep.subr.bf16.mxu0 %v2872_v2  ;;  %v1279_v2 = vld [vmem:[%s4327_s23 + $0x1e30] sm:$0xff] }
 0x260   : > { %3383 = vmatpush1.bf16.xpose.msra.mxu1 %v3382_v1  ;;  %v783_v1 = vld [vmem:[%s4327_s23 + $0xeb0] sm:$0xff] }
 0x261   : > { %3385 = vmatprep.subr.bf16.mxu1 %v3384_v3  ;;  %v1295_v3 = vld [vmem:[%s4327_s23 + $0x1eb0] sm:$0xff]  ;;  %v2894_v8 = vpack.c.bf16 %v783_v1, %v767_v0  ;;  %v929_v0 = vld [vmem:[%s4327_s23 + $0x1340] sm:$0xff] }
 0x262   : > { %v3406_v9 = vpack.c.bf16 %v1295_v3, %v1279_v2  ;;  %v945_v1 = vld [vmem:[%s4327_s23 + $0x13c0] sm:$0xff]  ;;  %v450_v2 = vld [vmem:[%s4327_s23 + $0x448] sm:$0xff] }
 0x263   : > { %v466_v3 = vld [vmem:[%s4327_s23 + $0x4c8] sm:$0xff]  ;;  %v3426_v7 = vpack.c.bf16 %v945_v1, %v929_v0 }
 0x264   : > { %v1122_v0 = vld [vmem:[%s4327_s23 + $0x1948] sm:$0xff] }
 0x265   : > { %v1138_v1 = vld [vmem:[%s4327_s23 + $0x19c8] sm:$0xff] }
 0x266   : > { %2875 = vmatpush1.bf16.xpose.msra.mxu0 %v2874_v12  ;;  %v799_v12 = vld [vmem:[%s4327_s23 + $0xf30] sm:$0xff] }
 0x267   : > { %2877 = vmatprep.subr.bf16.mxu0 %v2876_v14  ;;  %v1311_v14 = vld [vmem:[%s4327_s23 + $0x1f30] sm:$0xff] }
 0x268   : > { %3387 = vmatpush1.bf16.xpose.msra.mxu1 %v3386_v13  ;;  %v815_v13 = vld [vmem:[%s4327_s23 + $0xfb0] sm:$0xff] }
 0x269   : > { %3389 = vmatprep.subr.bf16.mxu1 %v3388_v15  ;;  %v1327_v15 = vld [vmem:[%s4327_s23 + $0x1fb0] sm:$0xff]  ;;  %v2898_v20 = vpack.c.bf16 %v815_v13, %v799_v12  ;;  %v961_v12 = vld [vmem:[%s4327_s23 + $0x1440] sm:$0xff] }
 0x26a   : > { %v3410_v21 = vpack.c.bf16 %v1327_v15, %v1311_v14  ;;  %v977_v13 = vld [vmem:[%s4327_s23 + $0x14c0] sm:$0xff]  ;;  %v482_v14 = vld [vmem:[%s4327_s23 + $0x548] sm:$0xff] }
 0x26b   : > { %v498_v15 = vld [vmem:[%s4327_s23 + $0x5c8] sm:$0xff]  ;;  %v3430_v19 = vpack.c.bf16 %v977_v13, %v961_v12 }
 0x26c   : > { %v1154_v12 = vld [vmem:[%s4327_s23 + $0x1a48] sm:$0xff] }
 0x26d   : > { %v1170_v13 = vld [vmem:[%s4327_s23 + $0x1ac8] sm:$0xff] }
 0x26e   : > { %2879 = vmatpush1.bf16.xpose.msra.mxu0 %v2878_v24  ;;  %v321_v24 = vld [vmem:[%s4327_s23 + $0x40] sm:$0xff] }
 0x26f   : > { %2881 = vmatprep.subr.bf16.mxu0 %v2880_v26  ;;  %v833_v26 = vld [vmem:[%s4327_s23 + $0x1040] sm:$0xff] }
 0x270   : > { %3391 = vmatpush1.bf16.xpose.msra.mxu1 %v3390_v25  ;;  %v337_v25 = vld [vmem:[%s4327_s23 + $0xc0] sm:$0xff] }
 0x271   : > { %3393 = vmatprep.subr.bf16.mxu1 %v3392_v27  ;;  %v849_v27 = vld [vmem:[%s4327_s23 + $0x10c0] sm:$0xff]  ;;  %v2902_v33 = vpack.c.bf16 %v337_v25, %v321_v24 }
 0x272   : > { %v3414_v34 = vpack.c.bf16 %v849_v27, %v833_v26  ;;  %v993_v24 = vld [vmem:[%s4327_s23 + $0x1540] sm:$0xff]  ;;  %v514_v26 = vld [vmem:[%s4327_s23 + $0x648] sm:$0xff] }
 0x273   : > { %v1009_v25 = vld [vmem:[%s4327_s23 + $0x15c0] sm:$0xff]  ;;  %v530_v27 = vld [vmem:[%s4327_s23 + $0x6c8] sm:$0xff] }
 0x276   : > { %2883 = vmatpush1.bf16.xpose.msra.mxu0 %v2882_v36  ;;  %v3416_v36 = vpack.c.bf16 %v882_v31, %v866_v30  ;;  %v3434_v31 = vpack.c.bf16 %v1009_v25, %v993_v24  ;;  %v1186_v24 = vld [vmem:[%s4327_s23 + $0x1b48] sm:$0xff] }
 0x277   : > { %2885 = vmatprep.subr.bf16.mxu0 %v2884_v38  ;;  %v353_v38 = vld [vmem:[%s4327_s23 + $0x140] sm:$0xff]  ;;  %v1202_v25 = vld [vmem:[%s4327_s23 + $0x1bc8] sm:$0xff] }
 0x278   : > { %3395 = vmatpush1.bf16.xpose.msra.mxu1 %v3394_v37  ;;  %v306_v37 = vld [vmem:[%s4402_s18 + $0x48] sm:$0xff] }
 0x279   : > { %3397 = vmatprep.subr.bf16.mxu1 %v3396_v39  ;;  %v369_v39 = vld [vmem:[%s4327_s23 + $0x1c0] sm:$0xff] }
 0x27a   : > { %v2906_v46 = vpack.c.bf16 %v369_v39, %v353_v38  ;;  %v546_v38 = vld [vmem:[%s4327_s23 + $0x748] sm:$0xff] }
 0x27b   : > { %v562_v39 = vld [vmem:[%s4327_s23 + $0x7c8] sm:$0xff] }
 0x27e   : > { %2887 = vmatpush1.bf16.xpose.msra.mxu0 %v2886_v48  ;;  %v2908_v48 = vpack.c.bf16 %v402_v43, %v386_v42 }
 0x27f   : > { %2889 = vmatprep.subr.bf16.mxu0 %v2888_v50  ;;  %v385_v50 = vld [vmem:[%s4327_s23 + $0x240] sm:$0xff] }
 0x280   : > { %3399 = vmatpush1.bf16.xpose.msra.mxu1 %v3398_v49  ;;  %v3420_v49 = vpack.c.bf16 %v914_v45, %v898_v44  ;;  %v2928_v44 = vpack.c.bf16 %v562_v39, %v546_v38  ;;  %v3440_v45 = vpack.c.bf16 %v1074_v41, %v1058_v40 }
 0x281   : > { %3401 = vmatprep.subr.bf16.mxu1 %v3400_v51  ;;  %v401_v51 = vld [vmem:[%s4327_s23 + $0x2c0] sm:$0xff] }
 0x282   : > { %v2910_v58 = vpack.c.bf16 %v401_v51, %v385_v50  ;;  %v578_v50 = vld [vmem:[%s4327_s23 + $0x848] sm:$0xff] }
 0x283   : > { %v594_v51 = vld [vmem:[%s4327_s23 + $0x8c8] sm:$0xff] }
 0x286   : > { %2891 = vmatpush1.bf16.xpose.msra.mxu0 %v2890_v60  ;;  %v2912_v60 = vpack.c.bf16 %v434_v55, %v418_v54 }
 0x287   : > { %2893 = vmatprep.subr.bf16.mxu0 %v2892_v62  ;;  %v417_v62 = vld [vmem:[%s4327_s23 + $0x340] sm:$0xff] }
 0x288   : > { %3403 = vmatpush1.bf16.xpose.msra.mxu1 %v3402_v61  ;;  %v3424_v61 = vpack.c.bf16 %v946_v57, %v930_v56  ;;  %v2932_v56 = vpack.c.bf16 %v594_v51, %v578_v50  ;;  %v3444_v57 = vpack.c.bf16 %v1106_v53, %v1090_v52 }
 0x289   : > { %3405 = vmatprep.subr.bf16.mxu1 %v3404_v63  ;;  %v433_v63 = vld [vmem:[%s4327_s23 + $0x3c0] sm:$0xff] }
 0x28a   : > { %v2914_v6 = vpack.c.bf16 %v433_v63, %v417_v62  ;;  %v610_v62 = vld [vmem:[%s4327_s23 + $0x948] sm:$0xff] }
 0x28b   : > { %v626_v63 = vld [vmem:[%s4327_s23 + $0x9c8] sm:$0xff] }
 0x28e   : > { %2895 = vmatpush1.bf16.xpose.msra.mxu0 %v2894_v8  ;;  %v2916_v8 = vpack.c.bf16 %v466_v3, %v450_v2 }
 0x28f   : > { %2897 = vmatprep.subr.bf16.mxu0 %v2896_v10  ;;  %v449_v10 = vld [vmem:[%s4327_s23 + $0x440] sm:$0xff] }
 0x290   : > { %3407 = vmatpush1.bf16.xpose.msra.mxu1 %v3406_v9  ;;  %v3428_v9 = vpack.c.bf16 %v978_v5, %v962_v4  ;;  %v2936_v4 = vpack.c.bf16 %v626_v63, %v610_v62  ;;  %v3448_v5 = vpack.c.bf16 %v1138_v1, %v1122_v0 }
 0x291   : > { %3409 = vmatprep.subr.bf16.mxu1 %v3408_v11  ;;  %v465_v11 = vld [vmem:[%s4327_s23 + $0x4c0] sm:$0xff] }
 0x292   : > { %v2918_v18 = vpack.c.bf16 %v465_v11, %v449_v10  ;;  %v642_v10 = vld [vmem:[%s4327_s23 + $0xa48] sm:$0xff] }
 0x293   : > { %v658_v11 = vld [vmem:[%s4327_s23 + $0xac8] sm:$0xff] }
 0x296   : > { %2899 = vmatpush1.bf16.xpose.msra.mxu0 %v2898_v20  ;;  %v2920_v20 = vpack.c.bf16 %v498_v15, %v482_v14 }
 0x297   : > { %2901 = vmatprep.subr.bf16.mxu0 %v2900_v22  ;;  %v481_v22 = vld [vmem:[%s4327_s23 + $0x540] sm:$0xff] }
 0x298   : > { %3411 = vmatpush1.bf16.xpose.msra.mxu1 %v3410_v21  ;;  %v3432_v21 = vpack.c.bf16 %v1010_v17, %v994_v16  ;;  %v2940_v16 = vpack.c.bf16 %v658_v11, %v642_v10  ;;  %v3452_v17 = vpack.c.bf16 %v1170_v13, %v1154_v12 }
 0x299   : > { %3413 = vmatprep.subr.bf16.mxu1 %v3412_v23  ;;  %v497_v23 = vld [vmem:[%s4327_s23 + $0x5c0] sm:$0xff] }
 0x29a   : > { %v2922_v30 = vpack.c.bf16 %v497_v23, %v481_v22  ;;  %v674_v22 = vld [vmem:[%s4327_s23 + $0xb48] sm:$0xff] }
 0x29b   : > { %v690_v23 = vld [vmem:[%s4327_s23 + $0xbc8] sm:$0xff] }
 0x29d   : > { %1615 = vmatmul.mubr.f32.vlgmr.msra.gmra.mrb[0].mxu0 %v303_v32 }
 0x29e   : > { %2903 = vmatpush1.bf16.xpose.msra.mxu0 %v2902_v33  ;;  %1685 = vmatprep.mubr.f32.mxu0 %v306_v37  ;;  %v3436_v33 = vpack.c.bf16 %v1042_v29, %v1026_v28  ;;  %v2944_v28 = vpack.c.bf16 %v690_v23, %v674_v22  ;;  %v3456_v29 = vpack.c.bf16 %v1202_v25, %v1186_v24 }
 0x29f   : > { %2183 = vmatmul.mubr.f32.vlgmr.msra.gmra.mrb[0].mxu1 %v303_v32  ;;  %2905 = vmatprep.subr.bf16.mxu0 %v2904_v35  ;;  %v2924_v32 = vpack.c.bf16 %v530_v27, %v514_v26  ;;  %v529_v35 = vld [vmem:[%s4327_s23 + $0x6c0] sm:$0xff] }
 0x2a0   : > { %3415 = vmatpush1.bf16.xpose.msra.mxu1 %v3414_v34  ;;  %2253 = vmatprep.mubr.f32.mxu1 %v306_v37  ;;  %v513_v34 = vld [vmem:[%s4327_s23 + $0x640] sm:$0xff] }
 0x2a1   : > { %3417 = vmatprep.subr.bf16.mxu1 %v3416_v36  ;;  %v1025_v36 = vld [vmem:[%s4327_s23 + $0x1640] sm:$0xff]  ;;  %v2926_v42 = vpack.c.bf16 %v529_v35, %v513_v34  ;;  %v706_v34 = vld [vmem:[%s4327_s23 + $0xc48] sm:$0xff] }
 0x2a2   : > { %v1041_v37 = vld [vmem:[%s4327_s23 + $0x16c0] sm:$0xff]  ;;  %v722_v35 = vld [vmem:[%s4327_s23 + $0xcc8] sm:$0xff] }
 0x2a3   : > { %v3438_v43 = vpack.c.bf16 %v1041_v37, %v1025_v36  ;;  %v1218_v36 = vld [vmem:[%s4327_s23 + $0x1c48] sm:$0xff]  ;;  %v2948_v40 = vpack.c.bf16 %v722_v35, %v706_v34  ;;  %v305_v34 = vld [vmem:[%s4402_s18 + $0x40] sm:$0xff] }
 0x2a4   : > { %v1234_v37 = vld [vmem:[%s4327_s23 + $0x1cc8] sm:$0xff] }
 0x2a5   : > { %v3460_v41 = vpack.c.bf16 %v1234_v37, %v1218_v36 }
 0x2a6   : > { %2907 = vmatpush1.bf16.xpose.msra.mxu0 %v2906_v46  ;;  %v545_v46 = vld [vmem:[%s4327_s23 + $0x740] sm:$0xff] }
 0x2a7   : > { %2909 = vmatprep.subr.bf16.mxu0 %v2908_v48  ;;  %v1057_v48 = vld [vmem:[%s4327_s23 + $0x1740] sm:$0xff] }
 0x2a8   : > { %3419 = vmatpush1.bf16.xpose.msra.mxu1 %v3418_v47  ;;  %v561_v47 = vld [vmem:[%s4327_s23 + $0x7c0] sm:$0xff] }
 0x2a9   : > { %3421 = vmatprep.subr.bf16.mxu1 %v3420_v49  ;;  %v1073_v49 = vld [vmem:[%s4327_s23 + $0x17c0] sm:$0xff]  ;;  %v2930_v54 = vpack.c.bf16 %v561_v47, %v545_v46  ;;  %v738_v46 = vld [vmem:[%s4327_s23 + $0xd48] sm:$0xff] }
 0x2aa   : > { %v3442_v55 = vpack.c.bf16 %v1073_v49, %v1057_v48  ;;  %v754_v47 = vld [vmem:[%s4327_s23 + $0xdc8] sm:$0xff] }
 0x2ab   : > { %v1250_v48 = vld [vmem:[%s4327_s23 + $0x1d48] sm:$0xff]  ;;  %v2952_v52 = vpack.c.bf16 %v754_v47, %v738_v46  ;;  %v900_v46 = vld [vmem:[%s4327_s23 + $0x1258] sm:$0xff] }
 0x2ac   : > { %v1266_v49 = vld [vmem:[%s4327_s23 + $0x1dc8] sm:$0xff]  ;;  %v916_v47 = vld [vmem:[%s4327_s23 + $0x12d8] sm:$0xff] }
 0x2ad   : > { %v3464_v53 = vpack.c.bf16 %v1266_v49, %v1250_v48 }
 0x2ae   : > { %2911 = vmatpush1.bf16.xpose.msra.mxu0 %v2910_v58  ;;  %v577_v58 = vld [vmem:[%s4327_s23 + $0x840] sm:$0xff] }
 0x2af   : > { %2913 = vmatprep.subr.bf16.mxu0 %v2912_v60  ;;  %v1089_v60 = vld [vmem:[%s4327_s23 + $0x1840] sm:$0xff] }
 0x2b0   : > { %3423 = vmatpush1.bf16.xpose.msra.mxu1 %v3422_v59  ;;  %v593_v59 = vld [vmem:[%s4327_s23 + $0x8c0] sm:$0xff] }
 0x2b1   : > { %3425 = vmatprep.subr.bf16.mxu1 %v3424_v61  ;;  %v1105_v61 = vld [vmem:[%s4327_s23 + $0x18c0] sm:$0xff]  ;;  %v2934_v2 = vpack.c.bf16 %v593_v59, %v577_v58  ;;  %v770_v58 = vld [vmem:[%s4327_s23 + $0xe48] sm:$0xff] }
 0x2b2   : > { %v3446_v3 = vpack.c.bf16 %v1105_v61, %v1089_v60  ;;  %v786_v59 = vld [vmem:[%s4327_s23 + $0xec8] sm:$0xff] }
 0x2b3   : > { %v1282_v60 = vld [vmem:[%s4327_s23 + $0x1e48] sm:$0xff]  ;;  %v2956_v0 = vpack.c.bf16 %v786_v59, %v770_v58  ;;  %v932_v58 = vld [vmem:[%s4327_s23 + $0x1358] sm:$0xff] }
 0x2b4   : > { %v1298_v61 = vld [vmem:[%s4327_s23 + $0x1ec8] sm:$0xff]  ;;  %v948_v59 = vld [vmem:[%s4327_s23 + $0x13d8] sm:$0xff] }
 0x2b5   : > { %v3468_v1 = vpack.c.bf16 %v1298_v61, %v1282_v60 }
 0x2b6   : > { %2915 = vmatpush1.bf16.xpose.msra.mxu0 %v2914_v6  ;;  %v609_v6 = vld [vmem:[%s4327_s23 + $0x940] sm:$0xff] }
 0x2b7   : > { %2917 = vmatprep.subr.bf16.mxu0 %v2916_v8  ;;  %v1121_v8 = vld [vmem:[%s4327_s23 + $0x1940] sm:$0xff] }
 0x2b8   : > { %3427 = vmatpush1.bf16.xpose.msra.mxu1 %v3426_v7  ;;  %v625_v7 = vld [vmem:[%s4327_s23 + $0x9c0] sm:$0xff] }
 0x2b9   : > { %3429 = vmatprep.subr.bf16.mxu1 %v3428_v9  ;;  %v1137_v9 = vld [vmem:[%s4327_s23 + $0x19c0] sm:$0xff]  ;;  %v2938_v14 = vpack.c.bf16 %v625_v7, %v609_v6  ;;  %v802_v6 = vld [vmem:[%s4327_s23 + $0xf48] sm:$0xff] }
 0x2ba   : > { %v3450_v15 = vpack.c.bf16 %v1137_v9, %v1121_v8  ;;  %v818_v7 = vld [vmem:[%s4327_s23 + $0xfc8] sm:$0xff] }
 0x2bb   : > { %v1314_v8 = vld [vmem:[%s4327_s23 + $0x1f48] sm:$0xff]  ;;  %v2960_v12 = vpack.c.bf16 %v818_v7, %v802_v6  ;;  %v964_v6 = vld [vmem:[%s4327_s23 + $0x1458] sm:$0xff] }
 0x2bc   : > { %v1330_v9 = vld [vmem:[%s4327_s23 + $0x1fc8] sm:$0xff]  ;;  %v980_v7 = vld [vmem:[%s4327_s23 + $0x14d8] sm:$0xff] }
 0x2bd   : > { %v3472_v13 = vpack.c.bf16 %v1330_v9, %v1314_v8 }
 0x2be   : > { %2919 = vmatpush1.bf16.xpose.msra.mxu0 %v2918_v18  ;;  %v641_v18 = vld [vmem:[%s4327_s23 + $0xa40] sm:$0xff] }
 0x2bf   : > { %2921 = vmatprep.subr.bf16.mxu0 %v2920_v20  ;;  %v1153_v20 = vld [vmem:[%s4327_s23 + $0x1a40] sm:$0xff] }
 0x2c0   : > { %3431 = vmatpush1.bf16.xpose.msra.mxu1 %v3430_v19  ;;  %v657_v19 = vld [vmem:[%s4327_s23 + $0xac0] sm:$0xff] }
 0x2c1   : > { %3433 = vmatprep.subr.bf16.mxu1 %v3432_v21  ;;  %v1169_v21 = vld [vmem:[%s4327_s23 + $0x1ac0] sm:$0xff]  ;;  %v2942_v26 = vpack.c.bf16 %v657_v19, %v641_v18  ;;  %v324_v18 = vld [vmem:[%s4327_s23 + $0x58] sm:$0xff] }
 0x2c2   : > { %v3454_v27 = vpack.c.bf16 %v1169_v21, %v1153_v20  ;;  %v340_v19 = vld [vmem:[%s4327_s23 + $0xd8] sm:$0xff] }
 0x2c3   : > { %v836_v20 = vld [vmem:[%s4327_s23 + $0x1058] sm:$0xff]  ;;  %v2964_v24 = vpack.c.bf16 %v340_v19, %v324_v18 }
 0x2c4   : > { %v852_v21 = vld [vmem:[%s4327_s23 + $0x10d8] sm:$0xff] }
 0x2c5   : > { %v3476_v25 = vpack.c.bf16 %v852_v21, %v836_v20  ;;  %v996_v18 = vld [vmem:[%s4327_s23 + $0x1558] sm:$0xff] }
 0x2c6   : > { %2923 = vmatpush1.bf16.xpose.msra.mxu0 %v2922_v30  ;;  %v673_v30 = vld [vmem:[%s4327_s23 + $0xb40] sm:$0xff]  ;;  %v1012_v19 = vld [vmem:[%s4327_s23 + $0x15d8] sm:$0xff] }
 0x2c7   : > { %2925 = vmatprep.subr.bf16.mxu0 %v2924_v32  ;;  %v1185_v32 = vld [vmem:[%s4327_s23 + $0x1b40] sm:$0xff] }
 0x2c8   : > { %3435 = vmatpush1.bf16.xpose.msra.mxu1 %v3434_v31  ;;  %v689_v31 = vld [vmem:[%s4327_s23 + $0xbc0] sm:$0xff] }
 0x2c9   : > { %3437 = vmatprep.subr.bf16.mxu1 %v3436_v33  ;;  %v1201_v33 = vld [vmem:[%s4327_s23 + $0x1bc0] sm:$0xff]  ;;  %v2946_v38 = vpack.c.bf16 %v689_v31, %v673_v30  ;;  %v356_v30 = vld [vmem:[%s4327_s23 + $0x158] sm:$0xff] }
 0x2ca   : > { %v3458_v39 = vpack.c.bf16 %v1201_v33, %v1185_v32  ;;  %v372_v31 = vld [vmem:[%s4327_s23 + $0x1d8] sm:$0xff] }
 0x2cb   : > { %v868_v32 = vld [vmem:[%s4327_s23 + $0x1158] sm:$0xff]  ;;  %v2968_v37 = vpack.c.bf16 %v372_v31, %v356_v30 }
 0x2cc   : > { %v884_v33 = vld [vmem:[%s4327_s23 + $0x11d8] sm:$0xff] }
 0x2cd   : > { %v1028_v30 = vld [vmem:[%s4327_s23 + $0x1658] sm:$0xff] }
 0x2ce   : > { %2927 = vmatpush1.bf16.xpose.msra.mxu0 %v2926_v42  ;;  %v705_v42 = vld [vmem:[%s4327_s23 + $0xc40] sm:$0xff]  ;;  %v1044_v31 = vld [vmem:[%s4327_s23 + $0x16d8] sm:$0xff] }
 0x2cf   : > { %2929 = vmatprep.subr.bf16.mxu0 %v2928_v44  ;;  %v1217_v44 = vld [vmem:[%s4327_s23 + $0x1c40] sm:$0xff] }
 0x2d0   : > { %3439 = vmatpush1.bf16.xpose.msra.mxu1 %v3438_v43  ;;  %v721_v43 = vld [vmem:[%s4327_s23 + $0xcc0] sm:$0xff] }
 0x2d1   : > { %3441 = vmatprep.subr.bf16.mxu1 %v3440_v45  ;;  %v1233_v45 = vld [vmem:[%s4327_s23 + $0x1cc0] sm:$0xff]  ;;  %v2950_v50 = vpack.c.bf16 %v721_v43, %v705_v42  ;;  %v867_v42 = vld [vmem:[%s4327_s23 + $0x1150] sm:$0xff] }
 0x2d2   : > { %v3462_v51 = vpack.c.bf16 %v1233_v45, %v1217_v44  ;;  %v883_v43 = vld [vmem:[%s4327_s23 + $0x11d0] sm:$0xff]  ;;  %v388_v44 = vld [vmem:[%s4327_s23 + $0x258] sm:$0xff] }
 0x2d3   : > { %v404_v45 = vld [vmem:[%s4327_s23 + $0x2d8] sm:$0xff]  ;;  %v3482_v49 = vpack.c.bf16 %v883_v43, %v867_v42 }
 0x2d4   : > { %v1060_v42 = vld [vmem:[%s4327_s23 + $0x1758] sm:$0xff] }
 0x2d5   : > { %v1076_v43 = vld [vmem:[%s4327_s23 + $0x17d8] sm:$0xff] }
 0x2d6   : > { %2931 = vmatpush1.bf16.xpose.msra.mxu0 %v2930_v54  ;;  %v737_v54 = vld [vmem:[%s4327_s23 + $0xd40] sm:$0xff] }
 0x2d7   : > { %2933 = vmatprep.subr.bf16.mxu0 %v2932_v56  ;;  %v1249_v56 = vld [vmem:[%s4327_s23 + $0x1d40] sm:$0xff] }
 0x2d8   : > { %3443 = vmatpush1.bf16.xpose.msra.mxu1 %v3442_v55  ;;  %v753_v55 = vld [vmem:[%s4327_s23 + $0xdc0] sm:$0xff] }
 0x2d9   : > { %3445 = vmatprep.subr.bf16.mxu1 %v3444_v57  ;;  %v1265_v57 = vld [vmem:[%s4327_s23 + $0x1dc0] sm:$0xff]  ;;  %v2954_v62 = vpack.c.bf16 %v753_v55, %v737_v54  ;;  %v899_v54 = vld [vmem:[%s4327_s23 + $0x1250] sm:$0xff] }
 0x2da   : > { %v3466_v63 = vpack.c.bf16 %v1265_v57, %v1249_v56  ;;  %v915_v55 = vld [vmem:[%s4327_s23 + $0x12d0] sm:$0xff]  ;;  %v420_v56 = vld [vmem:[%s4327_s23 + $0x358] sm:$0xff] }
 0x2db   : > { %v436_v57 = vld [vmem:[%s4327_s23 + $0x3d8] sm:$0xff]  ;;  %v3486_v61 = vpack.c.bf16 %v915_v55, %v899_v54 }
 0x2dc   : > { %v1092_v54 = vld [vmem:[%s4327_s23 + $0x1858] sm:$0xff] }
 0x2dd   : > { %v1108_v55 = vld [vmem:[%s4327_s23 + $0x18d8] sm:$0xff] }
 0x2de   : > { %2935 = vmatpush1.bf16.xpose.msra.mxu0 %v2934_v2  ;;  %v769_v2 = vld [vmem:[%s4327_s23 + $0xe40] sm:$0xff] }
 0x2df   : > { %2937 = vmatprep.subr.bf16.mxu0 %v2936_v4  ;;  %v1281_v4 = vld [vmem:[%s4327_s23 + $0x1e40] sm:$0xff] }
 0x2e0   : > { %3447 = vmatpush1.bf16.xpose.msra.mxu1 %v3446_v3  ;;  %v785_v3 = vld [vmem:[%s4327_s23 + $0xec0] sm:$0xff] }
 0x2e1   : > { %3449 = vmatprep.subr.bf16.mxu1 %v3448_v5  ;;  %v1297_v5 = vld [vmem:[%s4327_s23 + $0x1ec0] sm:$0xff]  ;;  %v2958_v10 = vpack.c.bf16 %v785_v3, %v769_v2  ;;  %v931_v2 = vld [vmem:[%s4327_s23 + $0x1350] sm:$0xff] }
 0x2e2   : > { %v3470_v11 = vpack.c.bf16 %v1297_v5, %v1281_v4  ;;  %v947_v3 = vld [vmem:[%s4327_s23 + $0x13d0] sm:$0xff]  ;;  %v452_v4 = vld [vmem:[%s4327_s23 + $0x458] sm:$0xff] }
 0x2e3   : > { %v468_v5 = vld [vmem:[%s4327_s23 + $0x4d8] sm:$0xff]  ;;  %v3490_v9 = vpack.c.bf16 %v947_v3, %v931_v2 }
 0x2e4   : > { %v1124_v2 = vld [vmem:[%s4327_s23 + $0x1958] sm:$0xff] }
 0x2e5   : > { %v1140_v3 = vld [vmem:[%s4327_s23 + $0x19d8] sm:$0xff] }
 0x2e6   : > { %2939 = vmatpush1.bf16.xpose.msra.mxu0 %v2938_v14  ;;  %v801_v14 = vld [vmem:[%s4327_s23 + $0xf40] sm:$0xff] }
 0x2e7   : > { %2941 = vmatprep.subr.bf16.mxu0 %v2940_v16  ;;  %v1313_v16 = vld [vmem:[%s4327_s23 + $0x1f40] sm:$0xff] }
 0x2e8   : > { %3451 = vmatpush1.bf16.xpose.msra.mxu1 %v3450_v15  ;;  %v817_v15 = vld [vmem:[%s4327_s23 + $0xfc0] sm:$0xff] }
 0x2e9   : > { %3453 = vmatprep.subr.bf16.mxu1 %v3452_v17  ;;  %v1329_v17 = vld [vmem:[%s4327_s23 + $0x1fc0] sm:$0xff]  ;;  %v2962_v22 = vpack.c.bf16 %v817_v15, %v801_v14  ;;  %v963_v14 = vld [vmem:[%s4327_s23 + $0x1450] sm:$0xff] }
 0x2ea   : > { %v3474_v23 = vpack.c.bf16 %v1329_v17, %v1313_v16  ;;  %v979_v15 = vld [vmem:[%s4327_s23 + $0x14d0] sm:$0xff]  ;;  %v484_v16 = vld [vmem:[%s4327_s23 + $0x558] sm:$0xff] }
 0x2eb   : > { %v500_v17 = vld [vmem:[%s4327_s23 + $0x5d8] sm:$0xff]  ;;  %v3494_v21 = vpack.c.bf16 %v979_v15, %v963_v14 }
 0x2ec   : > { %v1156_v14 = vld [vmem:[%s4327_s23 + $0x1a58] sm:$0xff] }
 0x2ed   : > { %v1172_v15 = vld [vmem:[%s4327_s23 + $0x1ad8] sm:$0xff] }
 0x2ee   : > { %2943 = vmatpush1.bf16.xpose.msra.mxu0 %v2942_v26  ;;  %v323_v26 = vld [vmem:[%s4327_s23 + $0x50] sm:$0xff] }
 0x2ef   : > { %2945 = vmatprep.subr.bf16.mxu0 %v2944_v28  ;;  %v835_v28 = vld [vmem:[%s4327_s23 + $0x1050] sm:$0xff] }
 0x2f0   : > { %3455 = vmatpush1.bf16.xpose.msra.mxu1 %v3454_v27  ;;  %v339_v27 = vld [vmem:[%s4327_s23 + $0xd0] sm:$0xff] }
 0x2f1   : > { %3457 = vmatprep.subr.bf16.mxu1 %v3456_v29  ;;  %v851_v29 = vld [vmem:[%s4327_s23 + $0x10d0] sm:$0xff]  ;;  %v2966_v35 = vpack.c.bf16 %v339_v27, %v323_v26 }
 0x2f2   : > { %v3478_v36 = vpack.c.bf16 %v851_v29, %v835_v28  ;;  %v995_v26 = vld [vmem:[%s4327_s23 + $0x1550] sm:$0xff]  ;;  %v516_v28 = vld [vmem:[%s4327_s23 + $0x658] sm:$0xff] }
 0x2f3   : > { %v1011_v27 = vld [vmem:[%s4327_s23 + $0x15d0] sm:$0xff]  ;;  %v532_v29 = vld [vmem:[%s4327_s23 + $0x6d8] sm:$0xff] }
 0x2f6   : > { %2947 = vmatpush1.bf16.xpose.msra.mxu0 %v2946_v38  ;;  %v3480_v38 = vpack.c.bf16 %v884_v33, %v868_v32  ;;  %v3498_v33 = vpack.c.bf16 %v1011_v27, %v995_v26  ;;  %v1188_v26 = vld [vmem:[%s4327_s23 + $0x1b58] sm:$0xff] }
 0x2f7   : > { %2949 = vmatprep.subr.bf16.mxu0 %v2948_v40  ;;  %v355_v40 = vld [vmem:[%s4327_s23 + $0x150] sm:$0xff]  ;;  %v1204_v27 = vld [vmem:[%s4327_s23 + $0x1bd8] sm:$0xff] }
 0x2f8   : > { %3459 = vmatpush1.bf16.xpose.msra.mxu1 %v3458_v39  ;;  %v308_v39 = vld [vmem:[%s4402_s18 + $0x58] sm:$0xff] }
 0x2f9   : > { %3461 = vmatprep.subr.bf16.mxu1 %v3460_v41  ;;  %v371_v41 = vld [vmem:[%s4327_s23 + $0x1d0] sm:$0xff] }
 0x2fa   : > { %v2970_v48 = vpack.c.bf16 %v371_v41, %v355_v40  ;;  %v548_v40 = vld [vmem:[%s4327_s23 + $0x758] sm:$0xff] }
 0x2fb   : > { %v564_v41 = vld [vmem:[%s4327_s23 + $0x7d8] sm:$0xff] }
 0x2fe   : > { %2951 = vmatpush1.bf16.xpose.msra.mxu0 %v2950_v50  ;;  %v2972_v50 = vpack.c.bf16 %v404_v45, %v388_v44 }
 0x2ff   : > { %2953 = vmatprep.subr.bf16.mxu0 %v2952_v52  ;;  %v387_v52 = vld [vmem:[%s4327_s23 + $0x250] sm:$0xff] }
 0x300   : > { %3463 = vmatpush1.bf16.xpose.msra.mxu1 %v3462_v51  ;;  %v3484_v51 = vpack.c.bf16 %v916_v47, %v900_v46  ;;  %v2992_v46 = vpack.c.bf16 %v564_v41, %v548_v40  ;;  %v3504_v47 = vpack.c.bf16 %v1076_v43, %v1060_v42 }
 0x301   : > { %3465 = vmatprep.subr.bf16.mxu1 %v3464_v53  ;;  %v403_v53 = vld [vmem:[%s4327_s23 + $0x2d0] sm:$0xff] }
 0x302   : > { %v2974_v60 = vpack.c.bf16 %v403_v53, %v387_v52  ;;  %v580_v52 = vld [vmem:[%s4327_s23 + $0x858] sm:$0xff] }
 0x303   : > { %v596_v53 = vld [vmem:[%s4327_s23 + $0x8d8] sm:$0xff] }
 0x306   : > { %2955 = vmatpush1.bf16.xpose.msra.mxu0 %v2954_v62  ;;  %v2976_v62 = vpack.c.bf16 %v436_v57, %v420_v56 }
 0x307   : > { %2957 = vmatprep.subr.bf16.mxu0 %v2956_v0  ;;  %v419_v0 = vld [vmem:[%s4327_s23 + $0x350] sm:$0xff] }
 0x308   : > { %3467 = vmatpush1.bf16.xpose.msra.mxu1 %v3466_v63  ;;  %v3488_v63 = vpack.c.bf16 %v948_v59, %v932_v58  ;;  %v2996_v58 = vpack.c.bf16 %v596_v53, %v580_v52  ;;  %v3508_v59 = vpack.c.bf16 %v1108_v55, %v1092_v54 }
 0x309   : > { %3469 = vmatprep.subr.bf16.mxu1 %v3468_v1  ;;  %v435_v1 = vld [vmem:[%s4327_s23 + $0x3d0] sm:$0xff] }
 0x30a   : > { %v2978_v8 = vpack.c.bf16 %v435_v1, %v419_v0  ;;  %v612_v0 = vld [vmem:[%s4327_s23 + $0x958] sm:$0xff] }
 0x30b   : > { %v628_v1 = vld [vmem:[%s4327_s23 + $0x9d8] sm:$0xff] }
 0x30e   : > { %2959 = vmatpush1.bf16.xpose.msra.mxu0 %v2958_v10  ;;  %v2980_v10 = vpack.c.bf16 %v468_v5, %v452_v4 }
 0x30f   : > { %2961 = vmatprep.subr.bf16.mxu0 %v2960_v12  ;;  %v451_v12 = vld [vmem:[%s4327_s23 + $0x450] sm:$0xff] }
 0x310   : > { %3471 = vmatpush1.bf16.xpose.msra.mxu1 %v3470_v11  ;;  %v3492_v11 = vpack.c.bf16 %v980_v7, %v964_v6  ;;  %v3000_v6 = vpack.c.bf16 %v628_v1, %v612_v0  ;;  %v3512_v7 = vpack.c.bf16 %v1140_v3, %v1124_v2 }
 0x311   : > { %3473 = vmatprep.subr.bf16.mxu1 %v3472_v13  ;;  %v467_v13 = vld [vmem:[%s4327_s23 + $0x4d0] sm:$0xff] }
 0x312   : > { %v2982_v20 = vpack.c.bf16 %v467_v13, %v451_v12  ;;  %v644_v12 = vld [vmem:[%s4327_s23 + $0xa58] sm:$0xff] }
 0x313   : > { %v660_v13 = vld [vmem:[%s4327_s23 + $0xad8] sm:$0xff] }
 0x316   : > { %2963 = vmatpush1.bf16.xpose.msra.mxu0 %v2962_v22  ;;  %v2984_v22 = vpack.c.bf16 %v500_v17, %v484_v16 }
 0x317   : > { %2965 = vmatprep.subr.bf16.mxu0 %v2964_v24  ;;  %v483_v24 = vld [vmem:[%s4327_s23 + $0x550] sm:$0xff] }
 0x318   : > { %3475 = vmatpush1.bf16.xpose.msra.mxu1 %v3474_v23  ;;  %v3496_v23 = vpack.c.bf16 %v1012_v19, %v996_v18  ;;  %v3004_v18 = vpack.c.bf16 %v660_v13, %v644_v12  ;;  %v3516_v19 = vpack.c.bf16 %v1172_v15, %v1156_v14 }
 0x319   : > { %3477 = vmatprep.subr.bf16.mxu1 %v3476_v25  ;;  %v499_v25 = vld [vmem:[%s4327_s23 + $0x5d0] sm:$0xff] }
 0x31a   : > { %v2986_v32 = vpack.c.bf16 %v499_v25, %v483_v24  ;;  %v676_v24 = vld [vmem:[%s4327_s23 + $0xb58] sm:$0xff] }
 0x31b   : > { %v692_v25 = vld [vmem:[%s4327_s23 + $0xbd8] sm:$0xff] }
 0x31d   : > { %1686 = vmatmul.mubr.f32.vlgmr.msra.gmra.mrb[0].mxu0 %v305_v34 }
 0x31e   : > { %2967 = vmatpush1.bf16.xpose.msra.mxu0 %v2966_v35  ;;  %1756 = vmatprep.mubr.f32.mxu0 %v308_v39  ;;  %v3500_v35 = vpack.c.bf16 %v1044_v31, %v1028_v30  ;;  %v3008_v30 = vpack.c.bf16 %v692_v25, %v676_v24  ;;  %v3520_v31 = vpack.c.bf16 %v1204_v27, %v1188_v26 }
 0x31f   : > { %2254 = vmatmul.mubr.f32.vlgmr.msra.gmra.mrb[0].mxu1 %v305_v34  ;;  %2969 = vmatprep.subr.bf16.mxu0 %v2968_v37  ;;  %v2988_v34 = vpack.c.bf16 %v532_v29, %v516_v28  ;;  %v531_v37 = vld [vmem:[%s4327_s23 + $0x6d0] sm:$0xff] }
 0x320   : > { %3479 = vmatpush1.bf16.xpose.msra.mxu1 %v3478_v36  ;;  %2324 = vmatprep.mubr.f32.mxu1 %v308_v39  ;;  %v515_v36 = vld [vmem:[%s4327_s23 + $0x650] sm:$0xff] }
 0x321   : > { %3481 = vmatprep.subr.bf16.mxu1 %v3480_v38  ;;  %v1027_v38 = vld [vmem:[%s4327_s23 + $0x1650] sm:$0xff]  ;;  %v2990_v44 = vpack.c.bf16 %v531_v37, %v515_v36  ;;  %v708_v36 = vld [vmem:[%s4327_s23 + $0xc58] sm:$0xff] }
 0x322   : > { %v1043_v39 = vld [vmem:[%s4327_s23 + $0x16d0] sm:$0xff]  ;;  %v724_v37 = vld [vmem:[%s4327_s23 + $0xcd8] sm:$0xff] }
 0x323   : > { %v3502_v45 = vpack.c.bf16 %v1043_v39, %v1027_v38  ;;  %v1220_v38 = vld [vmem:[%s4327_s23 + $0x1c58] sm:$0xff]  ;;  %v3012_v42 = vpack.c.bf16 %v724_v37, %v708_v36  ;;  %v307_v36 = vld [vmem:[%s4402_s18 + $0x50] sm:$0xff] }
 0x324   : > { %v1236_v39 = vld [vmem:[%s4327_s23 + $0x1cd8] sm:$0xff] }
 0x325   : > { %v3524_v43 = vpack.c.bf16 %v1236_v39, %v1220_v38 }
 0x326   : > { %2971 = vmatpush1.bf16.xpose.msra.mxu0 %v2970_v48  ;;  %v547_v48 = vld [vmem:[%s4327_s23 + $0x750] sm:$0xff] }
 0x327   : > { %2973 = vmatprep.subr.bf16.mxu0 %v2972_v50  ;;  %v1059_v50 = vld [vmem:[%s4327_s23 + $0x1750] sm:$0xff] }
 0x328   : > { %3483 = vmatpush1.bf16.xpose.msra.mxu1 %v3482_v49  ;;  %v563_v49 = vld [vmem:[%s4327_s23 + $0x7d0] sm:$0xff] }
 0x329   : > { %3485 = vmatprep.subr.bf16.mxu1 %v3484_v51  ;;  %v1075_v51 = vld [vmem:[%s4327_s23 + $0x17d0] sm:$0xff]  ;;  %v2994_v56 = vpack.c.bf16 %v563_v49, %v547_v48  ;;  %v740_v48 = vld [vmem:[%s4327_s23 + $0xd58] sm:$0xff] }
 0x32a   : > { %v3506_v57 = vpack.c.bf16 %v1075_v51, %v1059_v50  ;;  %v756_v49 = vld [vmem:[%s4327_s23 + $0xdd8] sm:$0xff] }
 0x32b   : > { %v1252_v50 = vld [vmem:[%s4327_s23 + $0x1d58] sm:$0xff]  ;;  %v3016_v54 = vpack.c.bf16 %v756_v49, %v740_v48  ;;  %v902_v48 = vld [vmem:[%s4327_s23 + $0x1268] sm:$0xff] }
 0x32c   : > { %v1268_v51 = vld [vmem:[%s4327_s23 + $0x1dd8] sm:$0xff]  ;;  %v918_v49 = vld [vmem:[%s4327_s23 + $0x12e8] sm:$0xff] }
 0x32d   : > { %v3528_v55 = vpack.c.bf16 %v1268_v51, %v1252_v50 }
 0x32e   : > { %2975 = vmatpush1.bf16.xpose.msra.mxu0 %v2974_v60  ;;  %v579_v60 = vld [vmem:[%s4327_s23 + $0x850] sm:$0xff] }
 0x32f   : > { %2977 = vmatprep.subr.bf16.mxu0 %v2976_v62  ;;  %v1091_v62 = vld [vmem:[%s4327_s23 + $0x1850] sm:$0xff] }
 0x330   : > { %3487 = vmatpush1.bf16.xpose.msra.mxu1 %v3486_v61  ;;  %v595_v61 = vld [vmem:[%s4327_s23 + $0x8d0] sm:$0xff] }
 0x331   : > { %3489 = vmatprep.subr.bf16.mxu1 %v3488_v63  ;;  %v1107_v63 = vld [vmem:[%s4327_s23 + $0x18d0] sm:$0xff]  ;;  %v2998_v4 = vpack.c.bf16 %v595_v61, %v579_v60  ;;  %v772_v60 = vld [vmem:[%s4327_s23 + $0xe58] sm:$0xff] }
 0x332   : > { %v3510_v5 = vpack.c.bf16 %v1107_v63, %v1091_v62  ;;  %v788_v61 = vld [vmem:[%s4327_s23 + $0xed8] sm:$0xff] }
 0x333   : > { %v1284_v62 = vld [vmem:[%s4327_s23 + $0x1e58] sm:$0xff]  ;;  %v3020_v2 = vpack.c.bf16 %v788_v61, %v772_v60  ;;  %v934_v60 = vld [vmem:[%s4327_s23 + $0x1368] sm:$0xff] }
 0x334   : > { %v1300_v63 = vld [vmem:[%s4327_s23 + $0x1ed8] sm:$0xff]  ;;  %v950_v61 = vld [vmem:[%s4327_s23 + $0x13e8] sm:$0xff] }
 0x335   : > { %v3532_v3 = vpack.c.bf16 %v1300_v63, %v1284_v62 }
 0x336   : > { %2979 = vmatpush1.bf16.xpose.msra.mxu0 %v2978_v8  ;;  %v611_v8 = vld [vmem:[%s4327_s23 + $0x950] sm:$0xff] }
 0x337   : > { %2981 = vmatprep.subr.bf16.mxu0 %v2980_v10  ;;  %v1123_v10 = vld [vmem:[%s4327_s23 + $0x1950] sm:$0xff] }
 0x338   : > { %3491 = vmatpush1.bf16.xpose.msra.mxu1 %v3490_v9  ;;  %v627_v9 = vld [vmem:[%s4327_s23 + $0x9d0] sm:$0xff] }
 0x339   : > { %3493 = vmatprep.subr.bf16.mxu1 %v3492_v11  ;;  %v1139_v11 = vld [vmem:[%s4327_s23 + $0x19d0] sm:$0xff]  ;;  %v3002_v16 = vpack.c.bf16 %v627_v9, %v611_v8  ;;  %v804_v8 = vld [vmem:[%s4327_s23 + $0xf58] sm:$0xff] }
 0x33a   : > { %v3514_v17 = vpack.c.bf16 %v1139_v11, %v1123_v10  ;;  %v820_v9 = vld [vmem:[%s4327_s23 + $0xfd8] sm:$0xff] }
 0x33b   : > { %v1316_v10 = vld [vmem:[%s4327_s23 + $0x1f58] sm:$0xff]  ;;  %v3024_v14 = vpack.c.bf16 %v820_v9, %v804_v8  ;;  %v966_v8 = vld [vmem:[%s4327_s23 + $0x1468] sm:$0xff] }
 0x33c   : > { %v1332_v11 = vld [vmem:[%s4327_s23 + $0x1fd8] sm:$0xff]  ;;  %v982_v9 = vld [vmem:[%s4327_s23 + $0x14e8] sm:$0xff] }
 0x33d   : > { %v3536_v15 = vpack.c.bf16 %v1332_v11, %v1316_v10 }
 0x33e   : > { %2983 = vmatpush1.bf16.xpose.msra.mxu0 %v2982_v20  ;;  %v643_v20 = vld [vmem:[%s4327_s23 + $0xa50] sm:$0xff] }
 0x33f   : > { %2985 = vmatprep.subr.bf16.mxu0 %v2984_v22  ;;  %v1155_v22 = vld [vmem:[%s4327_s23 + $0x1a50] sm:$0xff] }
 0x340   : > { %3495 = vmatpush1.bf16.xpose.msra.mxu1 %v3494_v21  ;;  %v659_v21 = vld [vmem:[%s4327_s23 + $0xad0] sm:$0xff] }
 0x341   : > { %3497 = vmatprep.subr.bf16.mxu1 %v3496_v23  ;;  %v1171_v23 = vld [vmem:[%s4327_s23 + $0x1ad0] sm:$0xff]  ;;  %v3006_v28 = vpack.c.bf16 %v659_v21, %v643_v20  ;;  %v326_v20 = vld [vmem:[%s4327_s23 + $0x68] sm:$0xff] }
 0x342   : > { %v3518_v29 = vpack.c.bf16 %v1171_v23, %v1155_v22  ;;  %v342_v21 = vld [vmem:[%s4327_s23 + $0xe8] sm:$0xff] }
 0x343   : > { %v838_v22 = vld [vmem:[%s4327_s23 + $0x1068] sm:$0xff]  ;;  %v3028_v26 = vpack.c.bf16 %v342_v21, %v326_v20 }
 0x344   : > { %v854_v23 = vld [vmem:[%s4327_s23 + $0x10e8] sm:$0xff] }
 0x345   : > { %v3540_v27 = vpack.c.bf16 %v854_v23, %v838_v22  ;;  %v998_v20 = vld [vmem:[%s4327_s23 + $0x1568] sm:$0xff] }
 0x346   : > { %2987 = vmatpush1.bf16.xpose.msra.mxu0 %v2986_v32  ;;  %v675_v32 = vld [vmem:[%s4327_s23 + $0xb50] sm:$0xff]  ;;  %v1014_v21 = vld [vmem:[%s4327_s23 + $0x15e8] sm:$0xff] }
 0x347   : > { %2989 = vmatprep.subr.bf16.mxu0 %v2988_v34  ;;  %v1187_v34 = vld [vmem:[%s4327_s23 + $0x1b50] sm:$0xff] }
 0x348   : > { %3499 = vmatpush1.bf16.xpose.msra.mxu1 %v3498_v33  ;;  %v691_v33 = vld [vmem:[%s4327_s23 + $0xbd0] sm:$0xff] }
 0x349   : > { %3501 = vmatprep.subr.bf16.mxu1 %v3500_v35  ;;  %v1203_v35 = vld [vmem:[%s4327_s23 + $0x1bd0] sm:$0xff]  ;;  %v3010_v40 = vpack.c.bf16 %v691_v33, %v675_v32  ;;  %v358_v32 = vld [vmem:[%s4327_s23 + $0x168] sm:$0xff] }
 0x34a   : > { %v3522_v41 = vpack.c.bf16 %v1203_v35, %v1187_v34  ;;  %v374_v33 = vld [vmem:[%s4327_s23 + $0x1e8] sm:$0xff] }
 0x34b   : > { %v870_v34 = vld [vmem:[%s4327_s23 + $0x1168] sm:$0xff]  ;;  %v3032_v39 = vpack.c.bf16 %v374_v33, %v358_v32 }
 0x34c   : > { %v886_v35 = vld [vmem:[%s4327_s23 + $0x11e8] sm:$0xff] }
 0x34d   : > { %v1030_v32 = vld [vmem:[%s4327_s23 + $0x1668] sm:$0xff] }
 0x34e   : > { %2991 = vmatpush1.bf16.xpose.msra.mxu0 %v2990_v44  ;;  %v707_v44 = vld [vmem:[%s4327_s23 + $0xc50] sm:$0xff]  ;;  %v1046_v33 = vld [vmem:[%s4327_s23 + $0x16e8] sm:$0xff] }
 0x34f   : > { %2993 = vmatprep.subr.bf16.mxu0 %v2992_v46  ;;  %v1219_v46 = vld [vmem:[%s4327_s23 + $0x1c50] sm:$0xff] }
 0x350   : > { %3503 = vmatpush1.bf16.xpose.msra.mxu1 %v3502_v45  ;;  %v723_v45 = vld [vmem:[%s4327_s23 + $0xcd0] sm:$0xff] }
 0x351   : > { %3505 = vmatprep.subr.bf16.mxu1 %v3504_v47  ;;  %v1235_v47 = vld [vmem:[%s4327_s23 + $0x1cd0] sm:$0xff]  ;;  %v3014_v52 = vpack.c.bf16 %v723_v45, %v707_v44  ;;  %v869_v44 = vld [vmem:[%s4327_s23 + $0x1160] sm:$0xff] }
 0x352   : > { %v3526_v53 = vpack.c.bf16 %v1235_v47, %v1219_v46  ;;  %v885_v45 = vld [vmem:[%s4327_s23 + $0x11e0] sm:$0xff]  ;;  %v390_v46 = vld [vmem:[%s4327_s23 + $0x268] sm:$0xff] }
 0x353   : > { %v406_v47 = vld [vmem:[%s4327_s23 + $0x2e8] sm:$0xff]  ;;  %v3546_v51 = vpack.c.bf16 %v885_v45, %v869_v44 }
 0x354   : > { %v1062_v44 = vld [vmem:[%s4327_s23 + $0x1768] sm:$0xff] }
 0x355   : > { %v1078_v45 = vld [vmem:[%s4327_s23 + $0x17e8] sm:$0xff] }
 0x356   : > { %2995 = vmatpush1.bf16.xpose.msra.mxu0 %v2994_v56  ;;  %v739_v56 = vld [vmem:[%s4327_s23 + $0xd50] sm:$0xff] }
 0x357   : > { %2997 = vmatprep.subr.bf16.mxu0 %v2996_v58  ;;  %v1251_v58 = vld [vmem:[%s4327_s23 + $0x1d50] sm:$0xff] }
 0x358   : > { %3507 = vmatpush1.bf16.xpose.msra.mxu1 %v3506_v57  ;;  %v755_v57 = vld [vmem:[%s4327_s23 + $0xdd0] sm:$0xff] }
 0x359   : > { %3509 = vmatprep.subr.bf16.mxu1 %v3508_v59  ;;  %v1267_v59 = vld [vmem:[%s4327_s23 + $0x1dd0] sm:$0xff]  ;;  %v3018_v0 = vpack.c.bf16 %v755_v57, %v739_v56  ;;  %v901_v56 = vld [vmem:[%s4327_s23 + $0x1260] sm:$0xff] }
 0x35a   : > { %v3530_v1 = vpack.c.bf16 %v1267_v59, %v1251_v58  ;;  %v917_v57 = vld [vmem:[%s4327_s23 + $0x12e0] sm:$0xff]  ;;  %v422_v58 = vld [vmem:[%s4327_s23 + $0x368] sm:$0xff] }
 0x35b   : > { %v438_v59 = vld [vmem:[%s4327_s23 + $0x3e8] sm:$0xff]  ;;  %v3550_v63 = vpack.c.bf16 %v917_v57, %v901_v56 }
 0x35c   : > { %v1094_v56 = vld [vmem:[%s4327_s23 + $0x1868] sm:$0xff] }
 0x35d   : > { %v1110_v57 = vld [vmem:[%s4327_s23 + $0x18e8] sm:$0xff] }
 0x35e   : > { %2999 = vmatpush1.bf16.xpose.msra.mxu0 %v2998_v4  ;;  %v771_v4 = vld [vmem:[%s4327_s23 + $0xe50] sm:$0xff] }
 0x35f   : > { %3001 = vmatprep.subr.bf16.mxu0 %v3000_v6  ;;  %v1283_v6 = vld [vmem:[%s4327_s23 + $0x1e50] sm:$0xff] }
 0x360   : > { %3511 = vmatpush1.bf16.xpose.msra.mxu1 %v3510_v5  ;;  %v787_v5 = vld [vmem:[%s4327_s23 + $0xed0] sm:$0xff] }
 0x361   : > { %3513 = vmatprep.subr.bf16.mxu1 %v3512_v7  ;;  %v1299_v7 = vld [vmem:[%s4327_s23 + $0x1ed0] sm:$0xff]  ;;  %v3022_v12 = vpack.c.bf16 %v787_v5, %v771_v4  ;;  %v933_v4 = vld [vmem:[%s4327_s23 + $0x1360] sm:$0xff] }
 0x362   : > { %v3534_v13 = vpack.c.bf16 %v1299_v7, %v1283_v6  ;;  %v949_v5 = vld [vmem:[%s4327_s23 + $0x13e0] sm:$0xff]  ;;  %v454_v6 = vld [vmem:[%s4327_s23 + $0x468] sm:$0xff] }
 0x363   : > { %v470_v7 = vld [vmem:[%s4327_s23 + $0x4e8] sm:$0xff]  ;;  %v3554_v11 = vpack.c.bf16 %v949_v5, %v933_v4 }
 0x364   : > { %v1126_v4 = vld [vmem:[%s4327_s23 + $0x1968] sm:$0xff] }
 0x365   : > { %v1142_v5 = vld [vmem:[%s4327_s23 + $0x19e8] sm:$0xff] }
 0x366   : > { %3003 = vmatpush1.bf16.xpose.msra.mxu0 %v3002_v16  ;;  %v803_v16 = vld [vmem:[%s4327_s23 + $0xf50] sm:$0xff] }
 0x367   : > { %3005 = vmatprep.subr.bf16.mxu0 %v3004_v18  ;;  %v1315_v18 = vld [vmem:[%s4327_s23 + $0x1f50] sm:$0xff] }
 0x368   : > { %3515 = vmatpush1.bf16.xpose.msra.mxu1 %v3514_v17  ;;  %v819_v17 = vld [vmem:[%s4327_s23 + $0xfd0] sm:$0xff] }
 0x369   : > { %3517 = vmatprep.subr.bf16.mxu1 %v3516_v19  ;;  %v1331_v19 = vld [vmem:[%s4327_s23 + $0x1fd0] sm:$0xff]  ;;  %v3026_v24 = vpack.c.bf16 %v819_v17, %v803_v16  ;;  %v965_v16 = vld [vmem:[%s4327_s23 + $0x1460] sm:$0xff] }
 0x36a   : > { %v3538_v25 = vpack.c.bf16 %v1331_v19, %v1315_v18  ;;  %v981_v17 = vld [vmem:[%s4327_s23 + $0x14e0] sm:$0xff]  ;;  %v486_v18 = vld [vmem:[%s4327_s23 + $0x568] sm:$0xff] }
 0x36b   : > { %v502_v19 = vld [vmem:[%s4327_s23 + $0x5e8] sm:$0xff]  ;;  %v3558_v23 = vpack.c.bf16 %v981_v17, %v965_v16 }
 0x36c   : > { %v1158_v16 = vld [vmem:[%s4327_s23 + $0x1a68] sm:$0xff] }
 0x36d   : > { %v1174_v17 = vld [vmem:[%s4327_s23 + $0x1ae8] sm:$0xff] }
 0x36e   : > { %3007 = vmatpush1.bf16.xpose.msra.mxu0 %v3006_v28  ;;  %v325_v28 = vld [vmem:[%s4327_s23 + $0x60] sm:$0xff] }
 0x36f   : > { %3009 = vmatprep.subr.bf16.mxu0 %v3008_v30  ;;  %v837_v30 = vld [vmem:[%s4327_s23 + $0x1060] sm:$0xff] }
 0x370   : > { %3519 = vmatpush1.bf16.xpose.msra.mxu1 %v3518_v29  ;;  %v341_v29 = vld [vmem:[%s4327_s23 + $0xe0] sm:$0xff] }
 0x371   : > { %3521 = vmatprep.subr.bf16.mxu1 %v3520_v31  ;;  %v853_v31 = vld [vmem:[%s4327_s23 + $0x10e0] sm:$0xff]  ;;  %v3030_v37 = vpack.c.bf16 %v341_v29, %v325_v28 }
 0x372   : > { %v3542_v38 = vpack.c.bf16 %v853_v31, %v837_v30  ;;  %v997_v28 = vld [vmem:[%s4327_s23 + $0x1560] sm:$0xff]  ;;  %v518_v30 = vld [vmem:[%s4327_s23 + $0x668] sm:$0xff] }
 0x373   : > { %v1013_v29 = vld [vmem:[%s4327_s23 + $0x15e0] sm:$0xff]  ;;  %v534_v31 = vld [vmem:[%s4327_s23 + $0x6e8] sm:$0xff] }
 0x376   : > { %3011 = vmatpush1.bf16.xpose.msra.mxu0 %v3010_v40  ;;  %v3544_v40 = vpack.c.bf16 %v886_v35, %v870_v34  ;;  %v3562_v35 = vpack.c.bf16 %v1013_v29, %v997_v28  ;;  %v1190_v28 = vld [vmem:[%s4327_s23 + $0x1b68] sm:$0xff] }
 0x377   : > { %3013 = vmatprep.subr.bf16.mxu0 %v3012_v42  ;;  %v357_v42 = vld [vmem:[%s4327_s23 + $0x160] sm:$0xff]  ;;  %v1206_v29 = vld [vmem:[%s4327_s23 + $0x1be8] sm:$0xff] }
 0x378   : > { %3523 = vmatpush1.bf16.xpose.msra.mxu1 %v3522_v41  ;;  %v310_v41 = vld [vmem:[%s4402_s18 + $0x68] sm:$0xff] }
 0x379   : > { %3525 = vmatprep.subr.bf16.mxu1 %v3524_v43  ;;  %v373_v43 = vld [vmem:[%s4327_s23 + $0x1e0] sm:$0xff] }
 0x37a   : > { %v3034_v50 = vpack.c.bf16 %v373_v43, %v357_v42  ;;  %v550_v42 = vld [vmem:[%s4327_s23 + $0x768] sm:$0xff] }
 0x37b   : > { %v566_v43 = vld [vmem:[%s4327_s23 + $0x7e8] sm:$0xff] }
 0x37e   : > { %3015 = vmatpush1.bf16.xpose.msra.mxu0 %v3014_v52  ;;  %v3036_v52 = vpack.c.bf16 %v406_v47, %v390_v46 }
 0x37f   : > { %3017 = vmatprep.subr.bf16.mxu0 %v3016_v54  ;;  %v389_v54 = vld [vmem:[%s4327_s23 + $0x260] sm:$0xff] }
 0x380   : > { %3527 = vmatpush1.bf16.xpose.msra.mxu1 %v3526_v53  ;;  %v3548_v53 = vpack.c.bf16 %v918_v49, %v902_v48  ;;  %v3056_v48 = vpack.c.bf16 %v566_v43, %v550_v42  ;;  %v3568_v49 = vpack.c.bf16 %v1078_v45, %v1062_v44 }
 0x381   : > { %3529 = vmatprep.subr.bf16.mxu1 %v3528_v55  ;;  %v405_v55 = vld [vmem:[%s4327_s23 + $0x2e0] sm:$0xff] }
 0x382   : > { %v3038_v62 = vpack.c.bf16 %v405_v55, %v389_v54  ;;  %v582_v54 = vld [vmem:[%s4327_s23 + $0x868] sm:$0xff] }
 0x383   : > { %v598_v55 = vld [vmem:[%s4327_s23 + $0x8e8] sm:$0xff] }
 0x386   : > { %3019 = vmatpush1.bf16.xpose.msra.mxu0 %v3018_v0  ;;  %v3040_v0 = vpack.c.bf16 %v438_v59, %v422_v58 }
 0x387   : > { %3021 = vmatprep.subr.bf16.mxu0 %v3020_v2  ;;  %v421_v2 = vld [vmem:[%s4327_s23 + $0x360] sm:$0xff] }
 0x388   : > { %3531 = vmatpush1.bf16.xpose.msra.mxu1 %v3530_v1  ;;  %v3552_v1 = vpack.c.bf16 %v950_v61, %v934_v60  ;;  %v3060_v60 = vpack.c.bf16 %v598_v55, %v582_v54  ;;  %v3572_v61 = vpack.c.bf16 %v1110_v57, %v1094_v56 }
 0x389   : > { %3533 = vmatprep.subr.bf16.mxu1 %v3532_v3  ;;  %v437_v3 = vld [vmem:[%s4327_s23 + $0x3e0] sm:$0xff] }
 0x38a   : > { %v3042_v10 = vpack.c.bf16 %v437_v3, %v421_v2  ;;  %v614_v2 = vld [vmem:[%s4327_s23 + $0x968] sm:$0xff] }
 0x38b   : > { %v630_v3 = vld [vmem:[%s4327_s23 + $0x9e8] sm:$0xff] }
 0x38e   : > { %3023 = vmatpush1.bf16.xpose.msra.mxu0 %v3022_v12  ;;  %v3044_v12 = vpack.c.bf16 %v470_v7, %v454_v6 }
 0x38f   : > { %3025 = vmatprep.subr.bf16.mxu0 %v3024_v14  ;;  %v453_v14 = vld [vmem:[%s4327_s23 + $0x460] sm:$0xff] }
 0x390   : > { %3535 = vmatpush1.bf16.xpose.msra.mxu1 %v3534_v13  ;;  %v3556_v13 = vpack.c.bf16 %v982_v9, %v966_v8  ;;  %v3064_v8 = vpack.c.bf16 %v630_v3, %v614_v2  ;;  %v3576_v9 = vpack.c.bf16 %v1142_v5, %v1126_v4 }
 0x391   : > { %3537 = vmatprep.subr.bf16.mxu1 %v3536_v15  ;;  %v469_v15 = vld [vmem:[%s4327_s23 + $0x4e0] sm:$0xff] }
 0x392   : > { %v3046_v22 = vpack.c.bf16 %v469_v15, %v453_v14  ;;  %v646_v14 = vld [vmem:[%s4327_s23 + $0xa68] sm:$0xff] }
 0x393   : > { %v662_v15 = vld [vmem:[%s4327_s23 + $0xae8] sm:$0xff] }
 0x396   : > { %3027 = vmatpush1.bf16.xpose.msra.mxu0 %v3026_v24  ;;  %v3048_v24 = vpack.c.bf16 %v502_v19, %v486_v18 }
 0x397   : > { %3029 = vmatprep.subr.bf16.mxu0 %v3028_v26  ;;  %v485_v26 = vld [vmem:[%s4327_s23 + $0x560] sm:$0xff] }
 0x398   : > { %3539 = vmatpush1.bf16.xpose.msra.mxu1 %v3538_v25  ;;  %v3560_v25 = vpack.c.bf16 %v1014_v21, %v998_v20  ;;  %v3068_v20 = vpack.c.bf16 %v662_v15, %v646_v14  ;;  %v3580_v21 = vpack.c.bf16 %v1174_v17, %v1158_v16 }
 0x399   : > { %3541 = vmatprep.subr.bf16.mxu1 %v3540_v27  ;;  %v501_v27 = vld [vmem:[%s4327_s23 + $0x5e0] sm:$0xff] }
 0x39a   : > { %v3050_v34 = vpack.c.bf16 %v501_v27, %v485_v26  ;;  %v678_v26 = vld [vmem:[%s4327_s23 + $0xb68] sm:$0xff] }
 0x39b   : > { %v694_v27 = vld [vmem:[%s4327_s23 + $0xbe8] sm:$0xff] }
 0x39d   : > { %1757 = vmatmul.mubr.f32.vlgmr.msra.gmra.mrb[0].mxu0 %v307_v36 }
 0x39e   : > { %3031 = vmatpush1.bf16.xpose.msra.mxu0 %v3030_v37  ;;  %1827 = vmatprep.mubr.f32.mxu0 %v310_v41  ;;  %v3564_v37 = vpack.c.bf16 %v1046_v33, %v1030_v32  ;;  %v3072_v32 = vpack.c.bf16 %v694_v27, %v678_v26  ;;  %v3584_v33 = vpack.c.bf16 %v1206_v29, %v1190_v28 }
 0x39f   : > { %2325 = vmatmul.mubr.f32.vlgmr.msra.gmra.mrb[0].mxu1 %v307_v36  ;;  %3033 = vmatprep.subr.bf16.mxu0 %v3032_v39  ;;  %v3052_v36 = vpack.c.bf16 %v534_v31, %v518_v30  ;;  %v533_v39 = vld [vmem:[%s4327_s23 + $0x6e0] sm:$0xff] }
 0x3a0   : > { %3543 = vmatpush1.bf16.xpose.msra.mxu1 %v3542_v38  ;;  %2395 = vmatprep.mubr.f32.mxu1 %v310_v41  ;;  %v517_v38 = vld [vmem:[%s4327_s23 + $0x660] sm:$0xff] }
 0x3a1   : > { %3545 = vmatprep.subr.bf16.mxu1 %v3544_v40  ;;  %v1029_v40 = vld [vmem:[%s4327_s23 + $0x1660] sm:$0xff]  ;;  %v3054_v46 = vpack.c.bf16 %v533_v39, %v517_v38  ;;  %v710_v38 = vld [vmem:[%s4327_s23 + $0xc68] sm:$0xff] }
 0x3a2   : > { %v1045_v41 = vld [vmem:[%s4327_s23 + $0x16e0] sm:$0xff]  ;;  %v726_v39 = vld [vmem:[%s4327_s23 + $0xce8] sm:$0xff] }
 0x3a3   : > { %v3566_v47 = vpack.c.bf16 %v1045_v41, %v1029_v40  ;;  %v1222_v40 = vld [vmem:[%s4327_s23 + $0x1c68] sm:$0xff]  ;;  %v3076_v44 = vpack.c.bf16 %v726_v39, %v710_v38  ;;  %v309_v38 = vld [vmem:[%s4402_s18 + $0x60] sm:$0xff] }
 0x3a4   : > { %v1238_v41 = vld [vmem:[%s4327_s23 + $0x1ce8] sm:$0xff] }
 0x3a5   : > { %v3588_v45 = vpack.c.bf16 %v1238_v41, %v1222_v40 }
 0x3a6   : > { %3035 = vmatpush1.bf16.xpose.msra.mxu0 %v3034_v50  ;;  %v549_v50 = vld [vmem:[%s4327_s23 + $0x760] sm:$0xff] }
 0x3a7   : > { %3037 = vmatprep.subr.bf16.mxu0 %v3036_v52  ;;  %v1061_v52 = vld [vmem:[%s4327_s23 + $0x1760] sm:$0xff] }
 0x3a8   : > { %3547 = vmatpush1.bf16.xpose.msra.mxu1 %v3546_v51  ;;  %v565_v51 = vld [vmem:[%s4327_s23 + $0x7e0] sm:$0xff] }
 0x3a9   : > { %3549 = vmatprep.subr.bf16.mxu1 %v3548_v53  ;;  %v1077_v53 = vld [vmem:[%s4327_s23 + $0x17e0] sm:$0xff]  ;;  %v3058_v58 = vpack.c.bf16 %v565_v51, %v549_v50  ;;  %v742_v50 = vld [vmem:[%s4327_s23 + $0xd68] sm:$0xff] }
 0x3aa   : > { %v3570_v59 = vpack.c.bf16 %v1077_v53, %v1061_v52  ;;  %v758_v51 = vld [vmem:[%s4327_s23 + $0xde8] sm:$0xff] }
 0x3ab   : > { %v1254_v52 = vld [vmem:[%s4327_s23 + $0x1d68] sm:$0xff]  ;;  %v3080_v56 = vpack.c.bf16 %v758_v51, %v742_v50  ;;  %v904_v50 = vld [vmem:[%s4327_s23 + $0x1278] sm:$0xff] }
 0x3ac   : > { %v1270_v53 = vld [vmem:[%s4327_s23 + $0x1de8] sm:$0xff]  ;;  %v920_v51 = vld [vmem:[%s4327_s23 + $0x12f8] sm:$0xff] }
 0x3ad   : > { %v3592_v57 = vpack.c.bf16 %v1270_v53, %v1254_v52 }
 0x3ae   : > { %3039 = vmatpush1.bf16.xpose.msra.mxu0 %v3038_v62  ;;  %v581_v62 = vld [vmem:[%s4327_s23 + $0x860] sm:$0xff] }
 0x3af   : > { %3041 = vmatprep.subr.bf16.mxu0 %v3040_v0  ;;  %v1093_v0 = vld [vmem:[%s4327_s23 + $0x1860] sm:$0xff] }
 0x3b0   : > { %3551 = vmatpush1.bf16.xpose.msra.mxu1 %v3550_v63  ;;  %v597_v63 = vld [vmem:[%s4327_s23 + $0x8e0] sm:$0xff] }
 0x3b1   : > { %3553 = vmatprep.subr.bf16.mxu1 %v3552_v1  ;;  %v1109_v1 = vld [vmem:[%s4327_s23 + $0x18e0] sm:$0xff]  ;;  %v3062_v6 = vpack.c.bf16 %v597_v63, %v581_v62  ;;  %v774_v62 = vld [vmem:[%s4327_s23 + $0xe68] sm:$0xff] }
 0x3b2   : > { %v3574_v7 = vpack.c.bf16 %v1109_v1, %v1093_v0  ;;  %v790_v63 = vld [vmem:[%s4327_s23 + $0xee8] sm:$0xff] }
 0x3b3   : > { %v1286_v0 = vld [vmem:[%s4327_s23 + $0x1e68] sm:$0xff]  ;;  %v3084_v4 = vpack.c.bf16 %v790_v63, %v774_v62  ;;  %v936_v62 = vld [vmem:[%s4327_s23 + $0x1378] sm:$0xff] }
 0x3b4   : > { %v1302_v1 = vld [vmem:[%s4327_s23 + $0x1ee8] sm:$0xff]  ;;  %v952_v63 = vld [vmem:[%s4327_s23 + $0x13f8] sm:$0xff] }
 0x3b5   : > { %v3596_v5 = vpack.c.bf16 %v1302_v1, %v1286_v0 }
 0x3b6   : > { %3043 = vmatpush1.bf16.xpose.msra.mxu0 %v3042_v10  ;;  %v613_v10 = vld [vmem:[%s4327_s23 + $0x960] sm:$0xff] }
 0x3b7   : > { %3045 = vmatprep.subr.bf16.mxu0 %v3044_v12  ;;  %v1125_v12 = vld [vmem:[%s4327_s23 + $0x1960] sm:$0xff] }
 0x3b8   : > { %3555 = vmatpush1.bf16.xpose.msra.mxu1 %v3554_v11  ;;  %v629_v11 = vld [vmem:[%s4327_s23 + $0x9e0] sm:$0xff] }
 0x3b9   : > { %3557 = vmatprep.subr.bf16.mxu1 %v3556_v13  ;;  %v1141_v13 = vld [vmem:[%s4327_s23 + $0x19e0] sm:$0xff]  ;;  %v3066_v18 = vpack.c.bf16 %v629_v11, %v613_v10  ;;  %v806_v10 = vld [vmem:[%s4327_s23 + $0xf68] sm:$0xff] }
 0x3ba   : > { %v3578_v19 = vpack.c.bf16 %v1141_v13, %v1125_v12  ;;  %v822_v11 = vld [vmem:[%s4327_s23 + $0xfe8] sm:$0xff] }
 0x3bb   : > { %v1318_v12 = vld [vmem:[%s4327_s23 + $0x1f68] sm:$0xff]  ;;  %v3088_v16 = vpack.c.bf16 %v822_v11, %v806_v10  ;;  %v968_v10 = vld [vmem:[%s4327_s23 + $0x1478] sm:$0xff] }
 0x3bc   : > { %v1334_v13 = vld [vmem:[%s4327_s23 + $0x1fe8] sm:$0xff]  ;;  %v984_v11 = vld [vmem:[%s4327_s23 + $0x14f8] sm:$0xff] }
 0x3bd   : > { %v3600_v17 = vpack.c.bf16 %v1334_v13, %v1318_v12 }
 0x3be   : > { %3047 = vmatpush1.bf16.xpose.msra.mxu0 %v3046_v22  ;;  %v645_v22 = vld [vmem:[%s4327_s23 + $0xa60] sm:$0xff] }
 0x3bf   : > { %3049 = vmatprep.subr.bf16.mxu0 %v3048_v24  ;;  %v1157_v24 = vld [vmem:[%s4327_s23 + $0x1a60] sm:$0xff] }
 0x3c0   : > { %3559 = vmatpush1.bf16.xpose.msra.mxu1 %v3558_v23  ;;  %v661_v23 = vld [vmem:[%s4327_s23 + $0xae0] sm:$0xff] }
 0x3c1   : > { %3561 = vmatprep.subr.bf16.mxu1 %v3560_v25  ;;  %v1173_v25 = vld [vmem:[%s4327_s23 + $0x1ae0] sm:$0xff]  ;;  %v3070_v30 = vpack.c.bf16 %v661_v23, %v645_v22  ;;  %v328_v22 = vld [vmem:[%s4327_s23 + $0x78] sm:$0xff] }
 0x3c2   : > { %v3582_v31 = vpack.c.bf16 %v1173_v25, %v1157_v24  ;;  %v344_v23 = vld [vmem:[%s4327_s23 + $0xf8] sm:$0xff] }
 0x3c3   : > { %v840_v24 = vld [vmem:[%s4327_s23 + $0x1078] sm:$0xff]  ;;  %v3092_v28 = vpack.c.bf16 %v344_v23, %v328_v22 }
 0x3c4   : > { %v856_v25 = vld [vmem:[%s4327_s23 + $0x10f8] sm:$0xff] }
 0x3c5   : > { %v3604_v29 = vpack.c.bf16 %v856_v25, %v840_v24  ;;  %v1000_v22 = vld [vmem:[%s4327_s23 + $0x1578] sm:$0xff] }
 0x3c6   : > { %3051 = vmatpush1.bf16.xpose.msra.mxu0 %v3050_v34  ;;  %v677_v34 = vld [vmem:[%s4327_s23 + $0xb60] sm:$0xff]  ;;  %v1016_v23 = vld [vmem:[%s4327_s23 + $0x15f8] sm:$0xff] }
 0x3c7   : > { %3053 = vmatprep.subr.bf16.mxu0 %v3052_v36  ;;  %v1189_v36 = vld [vmem:[%s4327_s23 + $0x1b60] sm:$0xff] }
 0x3c8   : > { %3563 = vmatpush1.bf16.xpose.msra.mxu1 %v3562_v35  ;;  %v693_v35 = vld [vmem:[%s4327_s23 + $0xbe0] sm:$0xff] }
 0x3c9   : > { %3565 = vmatprep.subr.bf16.mxu1 %v3564_v37  ;;  %v1205_v37 = vld [vmem:[%s4327_s23 + $0x1be0] sm:$0xff]  ;;  %v3074_v42 = vpack.c.bf16 %v693_v35, %v677_v34  ;;  %v360_v34 = vld [vmem:[%s4327_s23 + $0x178] sm:$0xff] }
 0x3ca   : > { %v3586_v43 = vpack.c.bf16 %v1205_v37, %v1189_v36  ;;  %v376_v35 = vld [vmem:[%s4327_s23 + $0x1f8] sm:$0xff] }
 0x3cb   : > { %v872_v36 = vld [vmem:[%s4327_s23 + $0x1178] sm:$0xff]  ;;  %v3096_v41 = vpack.c.bf16 %v376_v35, %v360_v34 }
 0x3cc   : > { %v888_v37 = vld [vmem:[%s4327_s23 + $0x11f8] sm:$0xff] }
 0x3cd   : > { %v1032_v34 = vld [vmem:[%s4327_s23 + $0x1678] sm:$0xff] }
 0x3ce   : > { %3055 = vmatpush1.bf16.xpose.msra.mxu0 %v3054_v46  ;;  %v709_v46 = vld [vmem:[%s4327_s23 + $0xc60] sm:$0xff]  ;;  %v1048_v35 = vld [vmem:[%s4327_s23 + $0x16f8] sm:$0xff] }
 0x3cf   : > { %3057 = vmatprep.subr.bf16.mxu0 %v3056_v48  ;;  %v1221_v48 = vld [vmem:[%s4327_s23 + $0x1c60] sm:$0xff] }
 0x3d0   : > { %3567 = vmatpush1.bf16.xpose.msra.mxu1 %v3566_v47  ;;  %v725_v47 = vld [vmem:[%s4327_s23 + $0xce0] sm:$0xff] }
 0x3d1   : > { %3569 = vmatprep.subr.bf16.mxu1 %v3568_v49  ;;  %v1237_v49 = vld [vmem:[%s4327_s23 + $0x1ce0] sm:$0xff]  ;;  %v3078_v54 = vpack.c.bf16 %v725_v47, %v709_v46  ;;  %v871_v46 = vld [vmem:[%s4327_s23 + $0x1170] sm:$0xff] }
 0x3d2   : > { %v3590_v55 = vpack.c.bf16 %v1237_v49, %v1221_v48  ;;  %v887_v47 = vld [vmem:[%s4327_s23 + $0x11f0] sm:$0xff]  ;;  %v392_v48 = vld [vmem:[%s4327_s23 + $0x278] sm:$0xff] }
 0x3d3   : > { %v408_v49 = vld [vmem:[%s4327_s23 + $0x2f8] sm:$0xff]  ;;  %v3610_v53 = vpack.c.bf16 %v887_v47, %v871_v46 }
 0x3d4   : > { %v1064_v46 = vld [vmem:[%s4327_s23 + $0x1778] sm:$0xff] }
 0x3d5   : > { %v1080_v47 = vld [vmem:[%s4327_s23 + $0x17f8] sm:$0xff] }
 0x3d6   : > { %3059 = vmatpush1.bf16.xpose.msra.mxu0 %v3058_v58  ;;  %v741_v58 = vld [vmem:[%s4327_s23 + $0xd60] sm:$0xff] }
 0x3d7   : > { %3061 = vmatprep.subr.bf16.mxu0 %v3060_v60  ;;  %v1253_v60 = vld [vmem:[%s4327_s23 + $0x1d60] sm:$0xff] }
 0x3d8   : > { %3571 = vmatpush1.bf16.xpose.msra.mxu1 %v3570_v59  ;;  %v757_v59 = vld [vmem:[%s4327_s23 + $0xde0] sm:$0xff] }
 0x3d9   : > { %3573 = vmatprep.subr.bf16.mxu1 %v3572_v61  ;;  %v1269_v61 = vld [vmem:[%s4327_s23 + $0x1de0] sm:$0xff]  ;;  %v3082_v2 = vpack.c.bf16 %v757_v59, %v741_v58  ;;  %v903_v58 = vld [vmem:[%s4327_s23 + $0x1270] sm:$0xff] }
 0x3da   : > { %v3594_v3 = vpack.c.bf16 %v1269_v61, %v1253_v60  ;;  %v919_v59 = vld [vmem:[%s4327_s23 + $0x12f0] sm:$0xff]  ;;  %v424_v60 = vld [vmem:[%s4327_s23 + $0x378] sm:$0xff] }
 0x3db   : > { %v440_v61 = vld [vmem:[%s4327_s23 + $0x3f8] sm:$0xff]  ;;  %v3614_v1 = vpack.c.bf16 %v919_v59, %v903_v58 }
 0x3dc   : > { %v1096_v58 = vld [vmem:[%s4327_s23 + $0x1878] sm:$0xff] }
 0x3dd   : > { %v1112_v59 = vld [vmem:[%s4327_s23 + $0x18f8] sm:$0xff] }
 0x3de   : > { %3063 = vmatpush1.bf16.xpose.msra.mxu0 %v3062_v6  ;;  %v773_v6 = vld [vmem:[%s4327_s23 + $0xe60] sm:$0xff] }
 0x3df   : > { %3065 = vmatprep.subr.bf16.mxu0 %v3064_v8  ;;  %v1285_v8 = vld [vmem:[%s4327_s23 + $0x1e60] sm:$0xff] }
 0x3e0   : > { %3575 = vmatpush1.bf16.xpose.msra.mxu1 %v3574_v7  ;;  %v789_v7 = vld [vmem:[%s4327_s23 + $0xee0] sm:$0xff] }
 0x3e1   : > { %3577 = vmatprep.subr.bf16.mxu1 %v3576_v9  ;;  %v1301_v9 = vld [vmem:[%s4327_s23 + $0x1ee0] sm:$0xff]  ;;  %v3086_v14 = vpack.c.bf16 %v789_v7, %v773_v6  ;;  %v935_v6 = vld [vmem:[%s4327_s23 + $0x1370] sm:$0xff] }
 0x3e2   : > { %v3598_v15 = vpack.c.bf16 %v1301_v9, %v1285_v8  ;;  %v951_v7 = vld [vmem:[%s4327_s23 + $0x13f0] sm:$0xff]  ;;  %v456_v8 = vld [vmem:[%s4327_s23 + $0x478] sm:$0xff] }
 0x3e3   : > { %v472_v9 = vld [vmem:[%s4327_s23 + $0x4f8] sm:$0xff]  ;;  %v3618_v13 = vpack.c.bf16 %v951_v7, %v935_v6 }
 0x3e4   : > { %v1128_v6 = vld [vmem:[%s4327_s23 + $0x1978] sm:$0xff] }
 0x3e5   : > { %v1144_v7 = vld [vmem:[%s4327_s23 + $0x19f8] sm:$0xff] }
 0x3e6   : > { %3067 = vmatpush1.bf16.xpose.msra.mxu0 %v3066_v18  ;;  %v805_v18 = vld [vmem:[%s4327_s23 + $0xf60] sm:$0xff] }
 0x3e7   : > { %3069 = vmatprep.subr.bf16.mxu0 %v3068_v20  ;;  %v1317_v20 = vld [vmem:[%s4327_s23 + $0x1f60] sm:$0xff] }
 0x3e8   : > { %3579 = vmatpush1.bf16.xpose.msra.mxu1 %v3578_v19  ;;  %v821_v19 = vld [vmem:[%s4327_s23 + $0xfe0] sm:$0xff] }
 0x3e9   : > { %3581 = vmatprep.subr.bf16.mxu1 %v3580_v21  ;;  %v1333_v21 = vld [vmem:[%s4327_s23 + $0x1fe0] sm:$0xff]  ;;  %v3090_v26 = vpack.c.bf16 %v821_v19, %v805_v18  ;;  %v967_v18 = vld [vmem:[%s4327_s23 + $0x1470] sm:$0xff] }
 0x3ea   : > { %v3602_v27 = vpack.c.bf16 %v1333_v21, %v1317_v20  ;;  %v983_v19 = vld [vmem:[%s4327_s23 + $0x14f0] sm:$0xff]  ;;  %v488_v20 = vld [vmem:[%s4327_s23 + $0x578] sm:$0xff] }
 0x3eb   : > { %v504_v21 = vld [vmem:[%s4327_s23 + $0x5f8] sm:$0xff]  ;;  %v3622_v25 = vpack.c.bf16 %v983_v19, %v967_v18 }
 0x3ec   : > { %v1160_v18 = vld [vmem:[%s4327_s23 + $0x1a78] sm:$0xff] }
 0x3ed   : > { %v1176_v19 = vld [vmem:[%s4327_s23 + $0x1af8] sm:$0xff] }
 0x3ee   : > { %3071 = vmatpush1.bf16.xpose.msra.mxu0 %v3070_v30  ;;  %v327_v30 = vld [vmem:[%s4327_s23 + $0x70] sm:$0xff] }
 0x3ef   : > { %3073 = vmatprep.subr.bf16.mxu0 %v3072_v32  ;;  %v839_v32 = vld [vmem:[%s4327_s23 + $0x1070] sm:$0xff] }
 0x3f0   : > { %3583 = vmatpush1.bf16.xpose.msra.mxu1 %v3582_v31  ;;  %v343_v31 = vld [vmem:[%s4327_s23 + $0xf0] sm:$0xff] }
 0x3f1   : > { %3585 = vmatprep.subr.bf16.mxu1 %v3584_v33  ;;  %v855_v33 = vld [vmem:[%s4327_s23 + $0x10f0] sm:$0xff]  ;;  %v3094_v39 = vpack.c.bf16 %v343_v31, %v327_v30 }
 0x3f2   : > { %v3606_v40 = vpack.c.bf16 %v855_v33, %v839_v32  ;;  %v999_v30 = vld [vmem:[%s4327_s23 + $0x1570] sm:$0xff]  ;;  %v520_v32 = vld [vmem:[%s4327_s23 + $0x678] sm:$0xff] }
 0x3f3   : > { %v1015_v31 = vld [vmem:[%s4327_s23 + $0x15f0] sm:$0xff]  ;;  %v536_v33 = vld [vmem:[%s4327_s23 + $0x6f8] sm:$0xff] }
 0x3f6   : > { %3075 = vmatpush1.bf16.xpose.msra.mxu0 %v3074_v42  ;;  %v3608_v42 = vpack.c.bf16 %v888_v37, %v872_v36  ;;  %v3626_v37 = vpack.c.bf16 %v1015_v31, %v999_v30  ;;  %v1192_v30 = vld [vmem:[%s4327_s23 + $0x1b78] sm:$0xff] }
 0x3f7   : > { %3077 = vmatprep.subr.bf16.mxu0 %v3076_v44  ;;  %v359_v44 = vld [vmem:[%s4327_s23 + $0x170] sm:$0xff]  ;;  %v1208_v31 = vld [vmem:[%s4327_s23 + $0x1bf8] sm:$0xff] }
 0x3f8   : > { %3587 = vmatpush1.bf16.xpose.msra.mxu1 %v3586_v43  ;;  %v312_v43 = vld [vmem:[%s4402_s18 + $0x78] sm:$0xff] }
 0x3f9   : > { %3589 = vmatprep.subr.bf16.mxu1 %v3588_v45  ;;  %v375_v45 = vld [vmem:[%s4327_s23 + $0x1f0] sm:$0xff] }
 0x3fa   : > { %v3098_v52 = vpack.c.bf16 %v375_v45, %v359_v44  ;;  %v552_v44 = vld [vmem:[%s4327_s23 + $0x778] sm:$0xff] }
 0x3fb   : > { %v568_v45 = vld [vmem:[%s4327_s23 + $0x7f8] sm:$0xff] }
 0x3fe   : > { %3079 = vmatpush1.bf16.xpose.msra.mxu0 %v3078_v54  ;;  %v3100_v54 = vpack.c.bf16 %v408_v49, %v392_v48 }
 0x3ff   : > { %3081 = vmatprep.subr.bf16.mxu0 %v3080_v56  ;;  %v391_v56 = vld [vmem:[%s4327_s23 + $0x270] sm:$0xff] }
 0x400   : > { %3591 = vmatpush1.bf16.xpose.msra.mxu1 %v3590_v55  ;;  %v3612_v55 = vpack.c.bf16 %v920_v51, %v904_v50  ;;  %v3120_v50 = vpack.c.bf16 %v568_v45, %v552_v44  ;;  %v3632_v51 = vpack.c.bf16 %v1080_v47, %v1064_v46 }
 0x401   : > { %3593 = vmatprep.subr.bf16.mxu1 %v3592_v57  ;;  %v407_v57 = vld [vmem:[%s4327_s23 + $0x2f0] sm:$0xff] }
 0x402   : > { %v3102_v0 = vpack.c.bf16 %v407_v57, %v391_v56  ;;  %v584_v56 = vld [vmem:[%s4327_s23 + $0x878] sm:$0xff] }
 0x403   : > { %v600_v57 = vld [vmem:[%s4327_s23 + $0x8f8] sm:$0xff] }
 0x406   : > { %3083 = vmatpush1.bf16.xpose.msra.mxu0 %v3082_v2  ;;  %v3104_v2 = vpack.c.bf16 %v440_v61, %v424_v60 }
 0x407   : > { %3085 = vmatprep.subr.bf16.mxu0 %v3084_v4  ;;  %v423_v4 = vld [vmem:[%s4327_s23 + $0x370] sm:$0xff] }
 0x408   : > { %3595 = vmatpush1.bf16.xpose.msra.mxu1 %v3594_v3  ;;  %v3616_v3 = vpack.c.bf16 %v952_v63, %v936_v62  ;;  %v3124_v62 = vpack.c.bf16 %v600_v57, %v584_v56  ;;  %v3636_v63 = vpack.c.bf16 %v1112_v59, %v1096_v58 }
 0x409   : > { %3597 = vmatprep.subr.bf16.mxu1 %v3596_v5  ;;  %v439_v5 = vld [vmem:[%s4327_s23 + $0x3f0] sm:$0xff] }
 0x40a   : > { %v3106_v12 = vpack.c.bf16 %v439_v5, %v423_v4  ;;  %v616_v4 = vld [vmem:[%s4327_s23 + $0x978] sm:$0xff] }
 0x40b   : > { %v632_v5 = vld [vmem:[%s4327_s23 + $0x9f8] sm:$0xff] }
 0x40e   : > { %3087 = vmatpush1.bf16.xpose.msra.mxu0 %v3086_v14  ;;  %v3108_v14 = vpack.c.bf16 %v472_v9, %v456_v8 }
 0x40f   : > { %3089 = vmatprep.subr.bf16.mxu0 %v3088_v16  ;;  %v455_v16 = vld [vmem:[%s4327_s23 + $0x470] sm:$0xff] }
 0x410   : > { %3599 = vmatpush1.bf16.xpose.msra.mxu1 %v3598_v15  ;;  %v3620_v15 = vpack.c.bf16 %v984_v11, %v968_v10  ;;  %v3128_v10 = vpack.c.bf16 %v632_v5, %v616_v4  ;;  %v3640_v11 = vpack.c.bf16 %v1144_v7, %v1128_v6 }
 0x411   : > { %3601 = vmatprep.subr.bf16.mxu1 %v3600_v17  ;;  %v471_v17 = vld [vmem:[%s4327_s23 + $0x4f0] sm:$0xff] }
 0x412   : > { %v3110_v24 = vpack.c.bf16 %v471_v17, %v455_v16  ;;  %v648_v16 = vld [vmem:[%s4327_s23 + $0xa78] sm:$0xff] }
 0x413   : > { %v664_v17 = vld [vmem:[%s4327_s23 + $0xaf8] sm:$0xff] }
 0x416   : > { %3091 = vmatpush1.bf16.xpose.msra.mxu0 %v3090_v26  ;;  %v3112_v26 = vpack.c.bf16 %v504_v21, %v488_v20 }
 0x417   : > { %3093 = vmatprep.subr.bf16.mxu0 %v3092_v28  ;;  %v487_v28 = vld [vmem:[%s4327_s23 + $0x570] sm:$0xff] }
 0x418   : > { %3603 = vmatpush1.bf16.xpose.msra.mxu1 %v3602_v27  ;;  %v3624_v27 = vpack.c.bf16 %v1016_v23, %v1000_v22  ;;  %v3132_v22 = vpack.c.bf16 %v664_v17, %v648_v16  ;;  %v3644_v23 = vpack.c.bf16 %v1176_v19, %v1160_v18 }
 0x419   : > { %3605 = vmatprep.subr.bf16.mxu1 %v3604_v29  ;;  %v503_v29 = vld [vmem:[%s4327_s23 + $0x5f0] sm:$0xff] }
 0x41a   : > { %v3114_v36 = vpack.c.bf16 %v503_v29, %v487_v28  ;;  %v680_v28 = vld [vmem:[%s4327_s23 + $0xb78] sm:$0xff] }
 0x41b   : > { %v696_v29 = vld [vmem:[%s4327_s23 + $0xbf8] sm:$0xff] }
 0x41d   : > { %1828 = vmatmul.mubr.f32.vlgmr.msra.gmra.mrb[0].mxu0 %v309_v38 }
 0x41e   : > { %3095 = vmatpush1.bf16.xpose.msra.mxu0 %v3094_v39  ;;  %1898 = vmatprep.mubr.f32.mxu0 %v312_v43  ;;  %v3628_v39 = vpack.c.bf16 %v1048_v35, %v1032_v34  ;;  %v3136_v34 = vpack.c.bf16 %v696_v29, %v680_v28  ;;  %v3648_v35 = vpack.c.bf16 %v1208_v31, %v1192_v30  ;;  %v292_v28 = vld [vmem:[%s4342_s4 + $0x10] sm:$0xff]  ;;  %v291_v29 = vld [vmem:[%s4342_s4 + $0x8] sm:$0xff]  ;;  %v293_v31 = vld [vmem:[%s4342_s4 + $0x18] sm:$0xff] }
 0x41f   : > { %2396 = vmatmul.mubr.f32.vlgmr.msra.gmra.mrb[0].mxu1 %v309_v38  ;;  %3097 = vmatprep.subr.bf16.mxu0 %v3096_v41  ;;  %v3116_v38 = vpack.c.bf16 %v536_v33, %v520_v32  ;;  %v535_v41 = vld [vmem:[%s4327_s23 + $0x6f0] sm:$0xff] }
 0x420   : > { %3607 = vmatpush1.bf16.xpose.msra.mxu1 %v3606_v40  ;;  %2466 = vmatprep.mubr.f32.mxu1 %v312_v43  ;;  %v519_v40 = vld [vmem:[%s4327_s23 + $0x670] sm:$0xff] }
 0x421   : > { %3609 = vmatprep.subr.bf16.mxu1 %v3608_v42  ;;  %v1031_v42 = vld [vmem:[%s4327_s23 + $0x1670] sm:$0xff]  ;;  %v3118_v48 = vpack.c.bf16 %v535_v41, %v519_v40  ;;  %v712_v40 = vld [vmem:[%s4327_s23 + $0xc78] sm:$0xff] }
 0x422   : > { %v1047_v43 = vld [vmem:[%s4327_s23 + $0x16f0] sm:$0xff]  ;;  %v728_v41 = vld [vmem:[%s4327_s23 + $0xcf8] sm:$0xff] }
 0x423   : > { %v3630_v49 = vpack.c.bf16 %v1047_v43, %v1031_v42  ;;  %v1224_v42 = vld [vmem:[%s4327_s23 + $0x1c78] sm:$0xff]  ;;  %v3140_v46 = vpack.c.bf16 %v728_v41, %v712_v40 }
 0x424   : > { %v1240_v43 = vld [vmem:[%s4327_s23 + $0x1cf8] sm:$0xff] }
 0x425   : > { %v3652_v47 = vpack.c.bf16 %v1240_v43, %v1224_v42 }
 0x426   : > { %3099 = vmatpush1.bf16.xpose.msra.mxu0 %v3098_v52  ;;  %v551_v52 = vld [vmem:[%s4327_s23 + $0x770] sm:$0xff] }
 0x427   : > { %3101 = vmatprep.subr.bf16.mxu0 %v3100_v54  ;;  %v1063_v54 = vld [vmem:[%s4327_s23 + $0x1770] sm:$0xff] }
 0x428   : > { %3611 = vmatpush1.bf16.xpose.msra.mxu1 %v3610_v53  ;;  %v567_v53 = vld [vmem:[%s4327_s23 + $0x7f0] sm:$0xff] }
 0x429   : > { %3613 = vmatprep.subr.bf16.mxu1 %v3612_v55  ;;  %v1079_v55 = vld [vmem:[%s4327_s23 + $0x17f0] sm:$0xff]  ;;  %v3122_v60 = vpack.c.bf16 %v567_v53, %v551_v52  ;;  %v744_v52 = vld [vmem:[%s4327_s23 + $0xd78] sm:$0xff] }
 0x42a   : > { %v3634_v61 = vpack.c.bf16 %v1079_v55, %v1063_v54  ;;  %v760_v53 = vld [vmem:[%s4327_s23 + $0xdf8] sm:$0xff] }
 0x42b   : > { %v1256_v54 = vld [vmem:[%s4327_s23 + $0x1d78] sm:$0xff]  ;;  %v3144_v58 = vpack.c.bf16 %v760_v53, %v744_v52 }
 0x42c   : > { %v1272_v55 = vld [vmem:[%s4327_s23 + $0x1df8] sm:$0xff] }
 0x42d   : > { %v3656_v59 = vpack.c.bf16 %v1272_v55, %v1256_v54 }
 0x42e   : > { %3103 = vmatpush1.bf16.xpose.msra.mxu0 %v3102_v0  ;;  %v583_v0 = vld [vmem:[%s4327_s23 + $0x870] sm:$0xff] }
 0x42f   : > { %3105 = vmatprep.subr.bf16.mxu0 %v3104_v2  ;;  %v1095_v2 = vld [vmem:[%s4327_s23 + $0x1870] sm:$0xff] }
 0x430   : > { %3615 = vmatpush1.bf16.xpose.msra.mxu1 %v3614_v1  ;;  %v599_v1 = vld [vmem:[%s4327_s23 + $0x8f0] sm:$0xff] }
 0x431   : > { %3617 = vmatprep.subr.bf16.mxu1 %v3616_v3  ;;  %v1111_v3 = vld [vmem:[%s4327_s23 + $0x18f0] sm:$0xff]  ;;  %v3126_v8 = vpack.c.bf16 %v599_v1, %v583_v0  ;;  %v776_v0 = vld [vmem:[%s4327_s23 + $0xe78] sm:$0xff] }
 0x432   : > { %v3638_v9 = vpack.c.bf16 %v1111_v3, %v1095_v2  ;;  %v792_v1 = vld [vmem:[%s4327_s23 + $0xef8] sm:$0xff] }
 0x433   : > { %v1288_v2 = vld [vmem:[%s4327_s23 + $0x1e78] sm:$0xff]  ;;  %v3148_v6 = vpack.c.bf16 %v792_v1, %v776_v0 }
 0x434   : > { %v1304_v3 = vld [vmem:[%s4327_s23 + $0x1ef8] sm:$0xff] }
 0x435   : > { %v3660_v7 = vpack.c.bf16 %v1304_v3, %v1288_v2 }
 0x436   : > { %3107 = vmatpush1.bf16.xpose.msra.mxu0 %v3106_v12  ;;  %v615_v12 = vld [vmem:[%s4327_s23 + $0x970] sm:$0xff] }
 0x437   : > { %3109 = vmatprep.subr.bf16.mxu0 %v3108_v14  ;;  %v1127_v14 = vld [vmem:[%s4327_s23 + $0x1970] sm:$0xff] }
 0x438   : > { %3619 = vmatpush1.bf16.xpose.msra.mxu1 %v3618_v13  ;;  %v631_v13 = vld [vmem:[%s4327_s23 + $0x9f0] sm:$0xff] }
 0x439   : > { %3621 = vmatprep.subr.bf16.mxu1 %v3620_v15  ;;  %v1143_v15 = vld [vmem:[%s4327_s23 + $0x19f0] sm:$0xff]  ;;  %v3130_v20 = vpack.c.bf16 %v631_v13, %v615_v12  ;;  %v808_v12 = vld [vmem:[%s4327_s23 + $0xf78] sm:$0xff] }
 0x43a   : > { %v3642_v21 = vpack.c.bf16 %v1143_v15, %v1127_v14  ;;  %v824_v13 = vld [vmem:[%s4327_s23 + $0xff8] sm:$0xff] }
 0x43b   : > { %v1320_v14 = vld [vmem:[%s4327_s23 + $0x1f78] sm:$0xff]  ;;  %v3152_v18 = vpack.c.bf16 %v824_v13, %v808_v12 }
 0x43c   : > { %v1336_v15 = vld [vmem:[%s4327_s23 + $0x1ff8] sm:$0xff] }
 0x43d   : > { %v3664_v19 = vpack.c.bf16 %v1336_v15, %v1320_v14 }
 0x43e   : > { %3111 = vmatpush1.bf16.xpose.msra.mxu0 %v3110_v24  ;;  %v647_v24 = vld [vmem:[%s4327_s23 + $0xa70] sm:$0xff] }
 0x43f   : > { %3113 = vmatprep.subr.bf16.mxu0 %v3112_v26  ;;  %v1159_v26 = vld [vmem:[%s4327_s23 + $0x1a70] sm:$0xff] }
 0x440   : > { %3623 = vmatpush1.bf16.xpose.msra.mxu1 %v3622_v25  ;;  %v663_v25 = vld [vmem:[%s4327_s23 + $0xaf0] sm:$0xff] }
 0x441   : > { %3625 = vmatprep.subr.bf16.mxu1 %v3624_v27  ;;  %v1175_v27 = vld [vmem:[%s4327_s23 + $0x1af0] sm:$0xff]  ;;  %v3134_v32 = vpack.c.bf16 %v663_v25, %v647_v24 }
 0x442   : > { %v3646_v33 = vpack.c.bf16 %v1175_v27, %v1159_v26  ;;  %v311_v26 = vld [vmem:[%s4402_s18 + $0x70] sm:$0xff]  ;;  %v290_v27 = vld [vmem:[%s4342_s4] sm:$0xff] }
 0x446   : > { %3115 = vmatpush1.bf16.xpose.msra.mxu0 %v3114_v36  ;;  %v679_v36 = vld [vmem:[%s4327_s23 + $0xb70] sm:$0xff] }
 0x447   : > { %3117 = vmatprep.subr.bf16.mxu0 %v3116_v38  ;;  %v1191_v38 = vld [vmem:[%s4327_s23 + $0x1b70] sm:$0xff] }
 0x448   : > { %3627 = vmatpush1.bf16.xpose.msra.mxu1 %v3626_v37  ;;  %v695_v37 = vld [vmem:[%s4327_s23 + $0xbf0] sm:$0xff] }
 0x449   : > { %3629 = vmatprep.subr.bf16.mxu1 %v3628_v39  ;;  %v1207_v39 = vld [vmem:[%s4327_s23 + $0x1bf0] sm:$0xff]  ;;  %v3138_v44 = vpack.c.bf16 %v695_v37, %v679_v36 }
 0x44a   : > { %v3650_v45 = vpack.c.bf16 %v1207_v39, %v1191_v38 }
 0x44e   : > { %3119 = vmatpush1.bf16.xpose.msra.mxu0 %v3118_v48  ;;  %v711_v48 = vld [vmem:[%s4327_s23 + $0xc70] sm:$0xff] }
 0x44f   : > { %3121 = vmatprep.subr.bf16.mxu0 %v3120_v50  ;;  %v1223_v50 = vld [vmem:[%s4327_s23 + $0x1c70] sm:$0xff] }
 0x450   : > { %3631 = vmatpush1.bf16.xpose.msra.mxu1 %v3630_v49  ;;  %v727_v49 = vld [vmem:[%s4327_s23 + $0xcf0] sm:$0xff] }
 0x451   : > { %3633 = vmatprep.subr.bf16.mxu1 %v3632_v51  ;;  %v1239_v51 = vld [vmem:[%s4327_s23 + $0x1cf0] sm:$0xff]  ;;  %v3142_v56 = vpack.c.bf16 %v727_v49, %v711_v48 }
 0x452   : > { %v3654_v57 = vpack.c.bf16 %v1239_v51, %v1223_v50 }
 0x456   : > { %3123 = vmatpush1.bf16.xpose.msra.mxu0 %v3122_v60  ;;  %v743_v60 = vld [vmem:[%s4327_s23 + $0xd70] sm:$0xff] }
 0x457   : > { %3125 = vmatprep.subr.bf16.mxu0 %v3124_v62  ;;  %v1255_v62 = vld [vmem:[%s4327_s23 + $0x1d70] sm:$0xff] }
 0x458   : > { %3635 = vmatpush1.bf16.xpose.msra.mxu1 %v3634_v61  ;;  %v759_v61 = vld [vmem:[%s4327_s23 + $0xdf0] sm:$0xff] }
 0x459   : > { %3637 = vmatprep.subr.bf16.mxu1 %v3636_v63  ;;  %v1271_v63 = vld [vmem:[%s4327_s23 + $0x1df0] sm:$0xff]  ;;  %v3146_v4 = vpack.c.bf16 %v759_v61, %v743_v60 }
 0x45a   : > { %v3658_v5 = vpack.c.bf16 %v1271_v63, %v1255_v62 }
 0x45e   : > { %3127 = vmatpush1.bf16.xpose.msra.mxu0 %v3126_v8  ;;  %v775_v8 = vld [vmem:[%s4327_s23 + $0xe70] sm:$0xff] }
 0x45f   : > { %3129 = vmatprep.subr.bf16.mxu0 %v3128_v10  ;;  %v1287_v10 = vld [vmem:[%s4327_s23 + $0x1e70] sm:$0xff] }
 0x460   : > { %3639 = vmatpush1.bf16.xpose.msra.mxu1 %v3638_v9  ;;  %v791_v9 = vld [vmem:[%s4327_s23 + $0xef0] sm:$0xff] }
 0x461   : > { %3641 = vmatprep.subr.bf16.mxu1 %v3640_v11  ;;  %v1303_v11 = vld [vmem:[%s4327_s23 + $0x1ef0] sm:$0xff]  ;;  %v3150_v16 = vpack.c.bf16 %v791_v9, %v775_v8 }
 0x462   : > { %v3662_v17 = vpack.c.bf16 %v1303_v11, %v1287_v10 }
 0x466   : > { %3131 = vmatpush1.bf16.xpose.msra.mxu0 %v3130_v20  ;;  %v807_v20 = vld [vmem:[%s4327_s23 + $0xf70] sm:$0xff] }
 0x467   : > { %3133 = vmatprep.subr.bf16.mxu0 %v3132_v22  ;;  %v1319_v22 = vld [vmem:[%s4327_s23 + $0x1f70] sm:$0xff] }
 0x468   : > { %3643 = vmatpush1.bf16.xpose.msra.mxu1 %v3642_v21  ;;  %v823_v21 = vld [vmem:[%s4327_s23 + $0xff0] sm:$0xff] }
 0x469   : > { %3645 = vmatprep.subr.bf16.mxu1 %v3644_v23  ;;  %v1335_v23 = vld [vmem:[%s4327_s23 + $0x1ff0] sm:$0xff]  ;;  %v3154_v24 = vpack.c.bf16 %v823_v21, %v807_v20  ;;  %s3909_s23 = sshll.u32 %s4043_s0, 4  ;;  %s3910_s23 = int_to_ptr.vmem [resolvable:$false] %s3909_s23 }
 0x46a   : > { %v3666_v25 = vpack.c.bf16 %v1335_v23, %v1319_v22  ;;  %s3911_s24 = scalar_lea.vmem %s3910_s23, 1024  ;;  %p3912_p7 = scmp.lt.s32.totalorder %s5404_s26, %s3910_s23 }
 0x46b   : > { %p3913_p9 = scmp.lt.s32.totalorder %s3911_s24, %s3905_s28 }
 0x46d   : > { %p3914_p3 = por %p3913_p9, %p3912_p7 }
 0x46e   : > { %3135 = vmatpush1.bf16.xpose.msra.mxu0 %v3134_v32 }
 0x46f   : > { %3137 = vmatprep.subr.bf16.mxu0 %v3136_v34  ;;  %p3915_p6 = pnand %p3914_p3, %p3908_p1 }
 0x470   : > { %3647 = vmatpush1.bf16.xpose.msra.mxu1 %v3646_v33 }
 0x471   : > { %3649 = vmatprep.subr.bf16.mxu1 %v3648_v35 }
 0x476   : > { %3139 = vmatpush1.bf16.xpose.msra.mxu0 %v3138_v44 }
 0x477   : > { %3141 = vmatprep.subr.bf16.mxu0 %v3140_v46 }
 0x478   : > { %3651 = vmatpush1.bf16.xpose.msra.mxu1 %v3650_v45 }
 0x479   : > { %3653 = vmatprep.subr.bf16.mxu1 %v3652_v47 }
 0x47e   : > { %3143 = vmatpush1.bf16.xpose.msra.mxu0 %v3142_v56 }
 0x47f   : > { %3145 = vmatprep.subr.bf16.mxu0 %v3144_v58 }
 0x480   : > { %3655 = vmatpush1.bf16.xpose.msra.mxu1 %v3654_v57 }
 0x481   : > { %3657 = vmatprep.subr.bf16.mxu1 %v3656_v59 }
 0x486   : > { %3147 = vmatpush1.bf16.xpose.msra.mxu0 %v3146_v4 }
 0x487   : > { %3149 = vmatprep.subr.bf16.mxu0 %v3148_v6 }
 0x488   : > { %3659 = vmatpush1.bf16.xpose.msra.mxu1 %v3658_v5 }
 0x489   : > { %3661 = vmatprep.subr.bf16.mxu1 %v3660_v7 }
 0x48e   : > { %3151 = vmatpush1.bf16.xpose.msra.mxu0 %v3150_v16 }
 0x48f   : > { %3153 = vmatprep.subr.bf16.mxu0 %v3152_v18 }
 0x490   : > { %3663 = vmatpush1.bf16.xpose.msra.mxu1 %v3662_v17 }
 0x491   : > { %3665 = vmatprep.subr.bf16.mxu1 %v3664_v19 }
 0x496   : > { %3155 = vmatpush1.bf16.xpose.msra.mxu0 %v3154_v24 }
 0x498   : > { %3667 = vmatpush1.bf16.xpose.msra.mxu1 %v3666_v25 }
 0x49d   : > { %1899 = vmatmul.mubr.f32.vlgmr.msra.gmra.mrb[0].mxu0 %v311_v26 }
 0x49f   : > { %2467 = vmatmul.mubr.f32.vlgmr.msra.gmra.mrb[0].mxu1 %v311_v26 }
 0x570   : > { %v1900_v30 = vpop.f32.mrb[0].mxu0 }
 0x571   : > { %v2473_v32 = vadd.f32 %v1900_v30, %v290_v27  ;;  %v1902_v34 = vpop.f32.mrb[1].mxu0 }
 0x572   : > { %v2468_v33 = vpop.f32.mrb[0].mxu1  ;;  %v2474_v36 = vadd.f32 %v1902_v34, %v291_v29 }
 0x573   : > { %v2475_v35 = vadd.f32 %v2468_v33, %v292_v28  ;;  %v2470_v37 = vpop.f32.mrb[1].mxu1  ;;  %2477 = vst [vmem:[%s4342_s4] sm:$0xff] %v2473_v32 }
 0x574   : > { %v2476_v38 = vadd.f32 %v2470_v37, %v293_v31  ;;  %2478 = vst [vmem:[%s4342_s4 + $0x8] sm:$0xff] %v2474_v36 }
 0x575   : > { %2479 = vst [vmem:[%s4342_s4 + $0x10] sm:$0xff] %v2475_v35 }
 0x576   : > { %2480 = vst [vmem:[%s4342_s4 + $0x18] sm:$0xff] %v2476_v38 }
 0x577   : > { %3918 = shalt.err (!%p3915_p6)
}
 0x578   : > { %s3919_s30 = scalar_lea.hbm %s5402_s6, 512  ;;  %s3923_s4 = scalar_lea.hbm %s5507_s29, 1024 }
 0x579   : > { %p3920_p10 = scmp.ne.s32.totalorder %s5402_s6, %s3919_s30  ;;  %p3924_p13 = scmp.lt.u32.totalorder %s5402_s6, %s5507_s29 }
 0x57a   : > { %p3925_p12 = scmp.lt.u32.totalorder %s3923_s4, %s3919_s30  ;;  %p3927_p0 = scmp.lt.u32.totalorder %s3919_s30, %s5402_s6 }
 0x57b   : > { %p3921_p11 = pnand %p3920_p10, %p5508_p4 }
 0x57c   : > { %p3926_p5 = por %p3925_p12, %p3924_p13 }
 0x57d   : > { %p3922_p2 = pneg %p3921_p11 }
 0x57e   : > { %p3928_p8 = por %p3927_p0, %p3926_p5 }
 0x580   : > { %p3929_p1 = pnand %p3928_p8, %p3922_p2 }
 0x582   : > { %3932 = shalt.err (!%p3929_p1)
}
 0x583   : > { %3704 = dma.vmem_to_hbm [thread:$0]  (%p5508_p4), %s5404_s26, 512, %s5402_s6, %s2482_s19  }
 0x584 PF: > { %p3724_p7 = scmp.ge.s32.totalorder %s4035_s22, 2  ;;  %s2508_s27 = sand.u32 1, %s3995_s12  }
 0x585   : > { %p5509_p9 = scmp.ne.s32.totalorder %s5500_s25, 0  ;;  %s2509_s10 = scalar_lea.sflag [#allocation4], %s2508_s27 }
 0x587   : > { %p3718_p3 = pnand %p3724_p7, %p5509_p9 }
 0x589   : > { %3990 = dma.done.wait (!%p3718_p3), %s2509_s10, 512  }
 0x58a   : > { %3992 = vsyncadd (!%p3718_p3), %s2509_s10, 4294966784  ;;  %s20_s22 = sadd.s32 1, %s4035_s22   ;;  %s5510_s11 = sld [smem:[#allocation13_spill]] }
 0x58b   : > { %p17_p6 = scmp.ge.s32.totalorder %s20_s22, 6   ;;  %s5511_s26 = sld [smem:[#allocation14_spill]] }
 0x58c   : > { %s5512_s12 = smov %s3999_s13  ;;  %s5513_s13 = smov %s4003_s14 }
 0x58d   : > { %s5514_s14 = smov %s4250_s15  ;;  %s5515_s15 = smov %s4011_s16 }
 0x58e   : > { %s5516_s16 = smov %s4015_s17  ;;  %s5517_s17 = smov %s4148_s7 }
 0x58f   : > { %s5518_s18 = smov %s4027_s20  ;;  %s5519_s19 = smov %s4031_s21 }
 0x590   : > { %s5520_s20 = smov %s5510_s11  ;;  %19 = sbr.rel (!%p17_p6) target bundleno = 13 (0xd), region = 98 }
 0x591   : > { %s5521_s21 = smov %s5511_s26 }
 0x597   :  { %2514 = vsyncpa [#allocation3], 1 }
 0x598   :  { %2516 = vsyncpa [#allocation3 + $0x1], 1 }
 0x599   :  { %2517 = vsyncpa [#allocation6], 1 }
 0x59a   :  { %2519 = vsyncpa [#allocation6 + $0x1], 1 }
 0x59b   :  { %2520 = vsyncpa [#allocation4], 1 }
 0x59c   :  { %2522 = vsyncpa [#allocation4 + $0x1], 1 }

</bundles_post_ra>
